<compile_context>
chip_gen: v7x
topology: tpu7x:2x2x1
jax: 0.10.0
libtpu: 0.0.40
codegen_flags: <defaults>
</compile_context>

<pallas_src>
import functools

import jax
import jax.numpy as jnp
from jax import lax
from jax.experimental import pallas as pl
from jax.experimental.pallas import tpu as pltpu

MIN_VALUE = -4.042531001996488
MAX_VALUE = 4.048737071724017

C_IN = 3
C_OUT = 8
K = 2        # kernel size
STRIDE = 2   # == K, so contributions of different input pixels never overlap
PAD = 2      # crops exactly input row/col 0 and H-1 / W-1


def _convt_fused_kernel(w_ref, b_ref, x_ref, o_ref, *, h, w):
    """Fused ConvTranspose2d(3->8, k=2, s=2, p=2) + clamp over the whole image.

    w_ref : SMEM (C_IN*C_OUT*K*K,)  flat weights, idx = ((c*C_OUT+oc)*K+ky)*K+kx
    b_ref : SMEM (C_OUT,)
    x_ref : VMEM (C_IN, h, w)
    o_ref : VMEM (C_OUT, (h-2)*K, (w-2)*K)   -- final PyTorch output layout
    """
    f32 = jnp.float32
    hi = h - 2            # interior input rows used (rows 1 .. h-2)
    wi = w - 2
    ho = hi * K
    wo = wi * K

    # ---- 0/1 scatter ("dilate by 2") matrices built from iota; no HBM cost.
    # S[kx] : (wi, wo),  S[kx][jj, l] = 1  iff  l == 2*jj + kx   (lane dilate)
    jj = lax.broadcasted_iota(jnp.int32, (wi, wo), 0)
    ll = lax.broadcasted_iota(jnp.int32, (wi, wo), 1)
    S = [jnp.where(ll == 2 * jj + kx, 1.0, 0.0).astype(f32) for kx in range(K)]
    # R[ky] : (ho, hi),  R[ky][r, ii] = 1  iff  r == 2*ii + ky   (sublane dilate)
    rr = lax.broadcasted_iota(jnp.int32, (ho, hi), 0)
    ii = lax.broadcasted_iota(jnp.int32, (ho, hi), 1)
    R = [jnp.where(rr == 2 * ii + ky, 1.0, 0.0).astype(f32) for ky in range(K)]

    # ---- place every input channel onto the output grid with two tiny matmuls:
    #   H[ky][kx][c][r, l] = x[c, r//2 + 1, l//2 + 1]  if r%2==ky and l%2==kx
    #                      = 0                          otherwise
    # (exact: the 0/1 matmuls only move data; the MXU is otherwise idle)
    H = [[[None] * C_IN for _ in range(K)] for _ in range(K)]
    for c in range(C_IN):
        xc = x_ref[c][1:h - 1, 1:w - 1]                            # (hi, wi)
        for kx in range(K):
            g = jnp.dot(xc, S[kx], preferred_element_type=f32)     # (hi, wo)
            for ky in range(K):
                H[ky][kx][c] = jnp.dot(R[ky], g,
                                       preferred_element_type=f32)  # (ho, wo)

    # ---- per output channel: weighted sum of the 12 placed planes + bias ---
    for oc in range(C_OUT):
        acc = jnp.full((ho, wo), b_ref[oc], dtype=f32)
        for ky in range(K):
            for kx in range(K):
                for c in range(C_IN):
                    wv = w_ref[((c * C_OUT + oc) * K + ky) * K + kx]
                    acc = acc + wv * H[ky][kx][c]
        acc = jnp.minimum(acc, MAX_VALUE)   # clamp_max
        acc = jnp.maximum(acc, MIN_VALUE)   # clamp_min
        o_ref[oc, :, :] = acc


def conv_transpose_clamp(x_nchw, weight, bias):
    """x_nchw: (1, C_IN, H, W); weight: (C_IN, C_OUT, K, K); bias: (C_OUT,)."""
    n, c_in, h, w = x_nchw.shape
    assert n == 1 and c_in == C_IN and h >= 3 and w >= 3
    ho, wo = (h - 2) * K, (w - 2) * K

    # TODO(synk): whole-image kernel assumes the problem fits VMEM comfortably
    # (true for the module's real 64x64 input: ~1.3 MiB including temporaries).
    # Tile over output-row blocks if spatial dims ever grow past ~512x512.
    # TODO(synk): clamp bounds are baked in as Python constants; pass them via
    # SMEM scalars if they ever become traced values.

    # Only free / tiny layout glue: squeeze the batch dim (leading size-1 dim,
    # no data movement) and flatten the 96-element weight for SMEM.  No pad,
    # transpose, or copy over the activation or the output.
    x3 = x_nchw[0]                      # (3, h, w)
    w_flat = weight.reshape(-1)         # (96,)

    kernel = functools.partial(_convt_fused_kernel, h=h, w=w)
    y = pl.pallas_call(
        kernel,
        out_shape=jax.ShapeDtypeStruct((C_OUT, ho, wo), jnp.float32),
        in_specs=[
            pl.BlockSpec(memory_space=pltpu.MemorySpace.SMEM),   # weights
            pl.BlockSpec(memory_space=pltpu.MemorySpace.SMEM),   # bias
            pl.BlockSpec(memory_space=pltpu.MemorySpace.VMEM),   # activation
        ],
        out_specs=pl.BlockSpec(memory_space=pltpu.MemorySpace.VMEM),
    )(w_flat, bias, x3)

    return y[None]                      # (1, 8, H_out, W_out)


def _reference(x_nchw, weight, bias):
    """Pure-JAX reference of the PyTorch module's forward."""
    x = x_nchw[0]
    h, w = x.shape[1], x.shape[2]
    full = jnp.einsum('cij,cokl->oikjl', x, weight).reshape(C_OUT, h * K, w * K)
    full = full + bias[:, None, None]
    out = full[:, PAD:h * STRIDE - PAD, PAD:w * STRIDE - PAD]
    out = jnp.minimum(out, MAX_VALUE)
    out = jnp.maximum(out, MIN_VALUE)
    return out[None]


if __name__ == "__main__":
    key = jax.random.PRNGKey(0)
    k_x, k_w, k_b = jax.random.split(key, 3)

    # small spatial size consistent with the module (module's real input is 64x64)
    H = W_SP = 16
    x = jax.random.normal(k_x, (1, C_IN, H, W_SP), dtype=jnp.float32)

    # deterministic parameters (ConvTranspose2d weight layout: (C_in, C_out, kH, kW))
    fan = C_OUT * K * K
    bound = 1.0 / jnp.sqrt(fan)
    weight = jax.random.uniform(k_w, (C_IN, C_OUT, K, K),
                                minval=-bound, maxval=bound, dtype=jnp.float32)
    bias = jax.random.uniform(k_b, (C_OUT,),
                              minval=-bound, maxval=bound, dtype=jnp.float32)

    fn = jax.jit(conv_transpose_clamp)
    out = jax.block_until_ready(fn(x, weight, bias))

    expected_hw = (H - 1) * STRIDE - 2 * PAD + (K - 1) + 1
    assert out.shape == (1, C_OUT, expected_hw, expected_hw), out.shape
    assert bool(jnp.all(out <= MAX_VALUE)) and bool(jnp.all(out >= MIN_VALUE))

    ref = _reference(x, weight, bias)
    assert jnp.allclose(out, ref, atol=1e-5, rtol=1e-5), float(
        jnp.max(jnp.abs(out - ref)))

    print("KERNEL_OK")
</pallas_src>

<mosaic_0001>
module attributes {stable_mosaic.version = 11 : i64} {
  func.func @_convt_fused_kernel(%arg0: memref<96xf32, #tpu.memory_space<smem>>, %arg1: memref<8xf32, #tpu.memory_space<smem>>, %arg2: memref<3x16x16xf32, #tpu.memory_space<vmem>>, %arg3: memref<8x28x28xf32, #tpu.memory_space<vmem>>) attributes {dimension_semantics = [], scalar_prefetch = 0 : i64, scratch_operands = 0 : i64, tpu.core_type = #tpu.core_type<tc>} {
    %0 = tpu.iota {dimensions = array<i32: 0>} : vector<14x28xi32>
    %1 = tpu.iota {dimensions = array<i32: 1>} : vector<14x28xi32>
    %c2_i32 = arith.constant 2 : i32
    %2 = vector.broadcast %c2_i32 : i32 to vector<14x28xi32>
    %3 = arith.muli %2, %0 : vector<14x28xi32>
    %c0_i32 = arith.constant 0 : i32
    %4 = vector.broadcast %c0_i32 : i32 to vector<14x28xi32>
    %5 = arith.addi %3, %4 : vector<14x28xi32>
    %6 = arith.cmpi eq, %1, %5 : vector<14x28xi32>
    %cst = arith.constant 1.000000e+00 : f32
    %cst_0 = arith.constant 0.000000e+00 : f32
    %7 = vector.broadcast %cst : f32 to vector<14x28xf32>
    %8 = vector.broadcast %cst_0 : f32 to vector<14x28xf32>
    %9 = arith.select %6, %7, %8 : vector<14x28xi1>, vector<14x28xf32>
    %c2_i32_1 = arith.constant 2 : i32
    %10 = vector.broadcast %c2_i32_1 : i32 to vector<14x28xi32>
    %11 = arith.muli %10, %0 : vector<14x28xi32>
    %c1_i32 = arith.constant 1 : i32
    %12 = vector.broadcast %c1_i32 : i32 to vector<14x28xi32>
    %13 = arith.addi %11, %12 : vector<14x28xi32>
    %14 = arith.cmpi eq, %1, %13 : vector<14x28xi32>
    %cst_2 = arith.constant 1.000000e+00 : f32
    %cst_3 = arith.constant 0.000000e+00 : f32
    %15 = vector.broadcast %cst_2 : f32 to vector<14x28xf32>
    %16 = vector.broadcast %cst_3 : f32 to vector<14x28xf32>
    %17 = arith.select %14, %15, %16 : vector<14x28xi1>, vector<14x28xf32>
    %18 = tpu.iota {dimensions = array<i32: 0>} : vector<28x14xi32>
    %19 = tpu.iota {dimensions = array<i32: 1>} : vector<28x14xi32>
    %c2_i32_4 = arith.constant 2 : i32
    %20 = vector.broadcast %c2_i32_4 : i32 to vector<28x14xi32>
    %21 = arith.muli %20, %19 : vector<28x14xi32>
    %c0_i32_5 = arith.constant 0 : i32
    %22 = vector.broadcast %c0_i32_5 : i32 to vector<28x14xi32>
    %23 = arith.addi %21, %22 : vector<28x14xi32>
    %24 = arith.cmpi eq, %18, %23 : vector<28x14xi32>
    %cst_6 = arith.constant 1.000000e+00 : f32
    %cst_7 = arith.constant 0.000000e+00 : f32
    %25 = vector.broadcast %cst_6 : f32 to vector<28x14xf32>
    %26 = vector.broadcast %cst_7 : f32 to vector<28x14xf32>
    %27 = arith.select %24, %25, %26 : vector<28x14xi1>, vector<28x14xf32>
    %c2_i32_8 = arith.constant 2 : i32
    %28 = vector.broadcast %c2_i32_8 : i32 to vector<28x14xi32>
    %29 = arith.muli %28, %19 : vector<28x14xi32>
    %c1_i32_9 = arith.constant 1 : i32
    %30 = vector.broadcast %c1_i32_9 : i32 to vector<28x14xi32>
    %31 = arith.addi %29, %30 : vector<28x14xi32>
    %32 = arith.cmpi eq, %18, %31 : vector<28x14xi32>
    %cst_10 = arith.constant 1.000000e+00 : f32
    %cst_11 = arith.constant 0.000000e+00 : f32
    %33 = vector.broadcast %cst_10 : f32 to vector<28x14xf32>
    %34 = vector.broadcast %cst_11 : f32 to vector<28x14xf32>
    %35 = arith.select %32, %33, %34 : vector<28x14xi1>, vector<28x14xf32>
    %c0 = arith.constant 0 : index
    %c0_12 = arith.constant 0 : index
    %c0_13 = arith.constant 0 : index
    %36 = vector.load %arg2[%c0, %c0_12, %c0_13] : memref<3x16x16xf32, #tpu.memory_space<vmem>>, vector<1x16x16xf32>
    %37 = vector.shape_cast %36 : vector<1x16x16xf32> to vector<16x16xf32>
    %38 = vector.extract_strided_slice %37 {offsets = [1, 1], sizes = [14, 14], strides = [1, 1]} : vector<16x16xf32> to vector<14x14xf32>
    %cst_14 = arith.constant dense<0.000000e+00> : vector<14x28xf32>
    %39 = tpu.matmul %38, %9, %cst_14 {dimension_numbers = #tpu.dot_dimension_numbers<[1], [0], [0], [1], [0, 0, 1, 1], [], []>} : vector<14x14xf32>, vector<14x28xf32>, vector<14x28xf32> -> vector<14x28xf32>
    %cst_15 = arith.constant dense<0.000000e+00> : vector<28x28xf32>
    %40 = tpu.matmul %27, %39, %cst_15 {dimension_numbers = #tpu.dot_dimension_numbers<[1], [0], [0], [1], [0, 0, 1, 1], [], []>} : vector<28x14xf32>, vector<14x28xf32>, vector<28x28xf32> -> vector<28x28xf32>
    %cst_16 = arith.constant dense<0.000000e+00> : vector<28x28xf32>
    %41 = tpu.matmul %35, %39, %cst_16 {dimension_numbers = #tpu.dot_dimension_numbers<[1], [0], [0], [1], [0, 0, 1, 1], [], []>} : vector<28x14xf32>, vector<14x28xf32>, vector<28x28xf32> -> vector<28x28xf32>
    %cst_17 = arith.constant dense<0.000000e+00> : vector<14x28xf32>
    %42 = tpu.matmul %38, %17, %cst_17 {dimension_numbers = #tpu.dot_dimension_numbers<[1], [0], [0], [1], [0, 0, 1, 1], [], []>} : vector<14x14xf32>, vector<14x28xf32>, vector<14x28xf32> -> vector<14x28xf32>
    %cst_18 = arith.constant dense<0.000000e+00> : vector<28x28xf32>
    %43 = tpu.matmul %27, %42, %cst_18 {dimension_numbers = #tpu.dot_dimension_numbers<[1], [0], [0], [1], [0, 0, 1, 1], [], []>} : vector<28x14xf32>, vector<14x28xf32>, vector<28x28xf32> -> vector<28x28xf32>
    %cst_19 = arith.constant dense<0.000000e+00> : vector<28x28xf32>
    %44 = tpu.matmul %35, %42, %cst_19 {dimension_numbers = #tpu.dot_dimension_numbers<[1], [0], [0], [1], [0, 0, 1, 1], [], []>} : vector<28x14xf32>, vector<14x28xf32>, vector<28x28xf32> -> vector<28x28xf32>
    %c1 = arith.constant 1 : index
    %c0_20 = arith.constant 0 : index
    %c0_21 = arith.constant 0 : index
    %45 = vector.load %arg2[%c1, %c0_20, %c0_21] : memref<3x16x16xf32, #tpu.memory_space<vmem>>, vector<1x16x16xf32>
    %46 = vector.shape_cast %45 : vector<1x16x16xf32> to vector<16x16xf32>
    %47 = vector.extract_strided_slice %46 {offsets = [1, 1], sizes = [14, 14], strides = [1, 1]} : vector<16x16xf32> to vector<14x14xf32>
    %cst_22 = arith.constant dense<0.000000e+00> : vector<14x28xf32>
    %48 = tpu.matmul %47, %9, %cst_22 {dimension_numbers = #tpu.dot_dimension_numbers<[1], [0], [0], [1], [0, 0, 1, 1], [], []>} : vector<14x14xf32>, vector<14x28xf32>, vector<14x28xf32> -> vector<14x28xf32>
    %cst_23 = arith.constant dense<0.000000e+00> : vector<28x28xf32>
    %49 = tpu.matmul %27, %48, %cst_23 {dimension_numbers = #tpu.dot_dimension_numbers<[1], [0], [0], [1], [0, 0, 1, 1], [], []>} : vector<28x14xf32>, vector<14x28xf32>, vector<28x28xf32> -> vector<28x28xf32>
    %cst_24 = arith.constant dense<0.000000e+00> : vector<28x28xf32>
    %50 = tpu.matmul %35, %48, %cst_24 {dimension_numbers = #tpu.dot_dimension_numbers<[1], [0], [0], [1], [0, 0, 1, 1], [], []>} : vector<28x14xf32>, vector<14x28xf32>, vector<28x28xf32> -> vector<28x28xf32>
    %cst_25 = arith.constant dense<0.000000e+00> : vector<14x28xf32>
    %51 = tpu.matmul %47, %17, %cst_25 {dimension_numbers = #tpu.dot_dimension_numbers<[1], [0], [0], [1], [0, 0, 1, 1], [], []>} : vector<14x14xf32>, vector<14x28xf32>, vector<14x28xf32> -> vector<14x28xf32>
    %cst_26 = arith.constant dense<0.000000e+00> : vector<28x28xf32>
    %52 = tpu.matmul %27, %51, %cst_26 {dimension_numbers = #tpu.dot_dimension_numbers<[1], [0], [0], [1], [0, 0, 1, 1], [], []>} : vector<28x14xf32>, vector<14x28xf32>, vector<28x28xf32> -> vector<28x28xf32>
    %cst_27 = arith.constant dense<0.000000e+00> : vector<28x28xf32>
    %53 = tpu.matmul %35, %51, %cst_27 {dimension_numbers = #tpu.dot_dimension_numbers<[1], [0], [0], [1], [0, 0, 1, 1], [], []>} : vector<28x14xf32>, vector<14x28xf32>, vector<28x28xf32> -> vector<28x28xf32>
    %c2 = arith.constant 2 : index
    %c0_28 = arith.constant 0 : index
    %c0_29 = arith.constant 0 : index
    %54 = vector.load %arg2[%c2, %c0_28, %c0_29] : memref<3x16x16xf32, #tpu.memory_space<vmem>>, vector<1x16x16xf32>
    %55 = vector.shape_cast %54 : vector<1x16x16xf32> to vector<16x16xf32>
    %56 = vector.extract_strided_slice %55 {offsets = [1, 1], sizes = [14, 14], strides = [1, 1]} : vector<16x16xf32> to vector<14x14xf32>
    %cst_30 = arith.constant dense<0.000000e+00> : vector<14x28xf32>
    %57 = tpu.matmul %56, %9, %cst_30 {dimension_numbers = #tpu.dot_dimension_numbers<[1], [0], [0], [1], [0, 0, 1, 1], [], []>} : vector<14x14xf32>, vector<14x28xf32>, vector<14x28xf32> -> vector<14x28xf32>
    %cst_31 = arith.constant dense<0.000000e+00> : vector<28x28xf32>
    %58 = tpu.matmul %27, %57, %cst_31 {dimension_numbers = #tpu.dot_dimension_numbers<[1], [0], [0], [1], [0, 0, 1, 1], [], []>} : vector<28x14xf32>, vector<14x28xf32>, vector<28x28xf32> -> vector<28x28xf32>
    %cst_32 = arith.constant dense<0.000000e+00> : vector<28x28xf32>
    %59 = tpu.matmul %35, %57, %cst_32 {dimension_numbers = #tpu.dot_dimension_numbers<[1], [0], [0], [1], [0, 0, 1, 1], [], []>} : vector<28x14xf32>, vector<14x28xf32>, vector<28x28xf32> -> vector<28x28xf32>
    %cst_33 = arith.constant dense<0.000000e+00> : vector<14x28xf32>
    %60 = tpu.matmul %56, %17, %cst_33 {dimension_numbers = #tpu.dot_dimension_numbers<[1], [0], [0], [1], [0, 0, 1, 1], [], []>} : vector<14x14xf32>, vector<14x28xf32>, vector<14x28xf32> -> vector<14x28xf32>
    %cst_34 = arith.constant dense<0.000000e+00> : vector<28x28xf32>
    %61 = tpu.matmul %27, %60, %cst_34 {dimension_numbers = #tpu.dot_dimension_numbers<[1], [0], [0], [1], [0, 0, 1, 1], [], []>} : vector<28x14xf32>, vector<14x28xf32>, vector<28x28xf32> -> vector<28x28xf32>
    %cst_35 = arith.constant dense<0.000000e+00> : vector<28x28xf32>
    %62 = tpu.matmul %35, %60, %cst_35 {dimension_numbers = #tpu.dot_dimension_numbers<[1], [0], [0], [1], [0, 0, 1, 1], [], []>} : vector<28x14xf32>, vector<14x28xf32>, vector<28x28xf32> -> vector<28x28xf32>
    %c0_36 = arith.constant 0 : index
    %63 = memref.load %arg1[%c0_36] : memref<8xf32, #tpu.memory_space<smem>>
    %64 = vector.broadcast %63 : f32 to vector<28x28xf32>
    %c0_37 = arith.constant 0 : index
    %65 = memref.load %arg0[%c0_37] : memref<96xf32, #tpu.memory_space<smem>>
    %66 = vector.broadcast %65 : f32 to vector<28x28xf32>
    %67 = arith.mulf %66, %40 : vector<28x28xf32>
    %68 = arith.addf %64, %67 : vector<28x28xf32>
    %c32 = arith.constant 32 : index
    %69 = memref.load %arg0[%c32] : memref<96xf32, #tpu.memory_space<smem>>
    %70 = vector.broadcast %69 : f32 to vector<28x28xf32>
    %71 = arith.mulf %70, %49 : vector<28x28xf32>
    %72 = arith.addf %68, %71 : vector<28x28xf32>
    %c64 = arith.constant 64 : index
    %73 = memref.load %arg0[%c64] : memref<96xf32, #tpu.memory_space<smem>>
    %74 = vector.broadcast %73 : f32 to vector<28x28xf32>
    %75 = arith.mulf %74, %58 : vector<28x28xf32>
    %76 = arith.addf %72, %75 : vector<28x28xf32>
    %c1_38 = arith.constant 1 : index
    %77 = memref.load %arg0[%c1_38] : memref<96xf32, #tpu.memory_space<smem>>
    %78 = vector.broadcast %77 : f32 to vector<28x28xf32>
    %79 = arith.mulf %78, %43 : vector<28x28xf32>
    %80 = arith.addf %76, %79 : vector<28x28xf32>
    %c33 = arith.constant 33 : index
    %81 = memref.load %arg0[%c33] : memref<96xf32, #tpu.memory_space<smem>>
    %82 = vector.broadcast %81 : f32 to vector<28x28xf32>
    %83 = arith.mulf %82, %52 : vector<28x28xf32>
    %84 = arith.addf %80, %83 : vector<28x28xf32>
    %c65 = arith.constant 65 : index
    %85 = memref.load %arg0[%c65] : memref<96xf32, #tpu.memory_space<smem>>
    %86 = vector.broadcast %85 : f32 to vector<28x28xf32>
    %87 = arith.mulf %86, %61 : vector<28x28xf32>
    %88 = arith.addf %84, %87 : vector<28x28xf32>
    %c2_39 = arith.constant 2 : index
    %89 = memref.load %arg0[%c2_39] : memref<96xf32, #tpu.memory_space<smem>>
    %90 = vector.broadcast %89 : f32 to vector<28x28xf32>
    %91 = arith.mulf %90, %41 : vector<28x28xf32>
    %92 = arith.addf %88, %91 : vector<28x28xf32>
    %c34 = arith.constant 34 : index
    %93 = memref.load %arg0[%c34] : memref<96xf32, #tpu.memory_space<smem>>
    %94 = vector.broadcast %93 : f32 to vector<28x28xf32>
    %95 = arith.mulf %94, %50 : vector<28x28xf32>
    %96 = arith.addf %92, %95 : vector<28x28xf32>
    %c66 = arith.constant 66 : index
    %97 = memref.load %arg0[%c66] : memref<96xf32, #tpu.memory_space<smem>>
    %98 = vector.broadcast %97 : f32 to vector<28x28xf32>
    %99 = arith.mulf %98, %59 : vector<28x28xf32>
    %100 = arith.addf %96, %99 : vector<28x28xf32>
    %c3 = arith.constant 3 : index
    %101 = memref.load %arg0[%c3] : memref<96xf32, #tpu.memory_space<smem>>
    %102 = vector.broadcast %101 : f32 to vector<28x28xf32>
    %103 = arith.mulf %102, %44 : vector<28x28xf32>
    %104 = arith.addf %100, %103 : vector<28x28xf32>
    %c35 = arith.constant 35 : index
    %105 = memref.load %arg0[%c35] : memref<96xf32, #tpu.memory_space<smem>>
    %106 = vector.broadcast %105 : f32 to vector<28x28xf32>
    %107 = arith.mulf %106, %53 : vector<28x28xf32>
    %108 = arith.addf %104, %107 : vector<28x28xf32>
    %c67 = arith.constant 67 : index
    %109 = memref.load %arg0[%c67] : memref<96xf32, #tpu.memory_space<smem>>
    %110 = vector.broadcast %109 : f32 to vector<28x28xf32>
    %111 = arith.mulf %110, %62 : vector<28x28xf32>
    %112 = arith.addf %108, %111 : vector<28x28xf32>
    %cst_40 = arith.constant 4.04873705 : f32
    %113 = vector.broadcast %cst_40 : f32 to vector<28x28xf32>
    %114 = arith.minimumf %112, %113 : vector<28x28xf32>
    %cst_41 = arith.constant -4.04253101 : f32
    %115 = vector.broadcast %cst_41 : f32 to vector<28x28xf32>
    %116 = arith.maximumf %114, %115 : vector<28x28xf32>
    %c0_42 = arith.constant 0 : index
    %c0_43 = arith.constant 0 : index
    %c0_44 = arith.constant 0 : index
    %117 = vector.load %arg3[%c0_42, %c0_43, %c0_44] : memref<8x28x28xf32, #tpu.memory_space<vmem>>, vector<1x28x28xf32>
    %118 = vector.shape_cast %117 : vector<1x28x28xf32> to vector<28x28xf32>
    %119 = vector.shape_cast %116 : vector<28x28xf32> to vector<1x28x28xf32>
    tpu.vector_store %arg3[%c0_42, %c0_43, %c0_44], %119 {strides = array<i32>} : memref<8x28x28xf32, #tpu.memory_space<vmem>>, vector<1x28x28xf32>,
    %c1_45 = arith.constant 1 : index
    %120 = memref.load %arg1[%c1_45] : memref<8xf32, #tpu.memory_space<smem>>
    %121 = vector.broadcast %120 : f32 to vector<28x28xf32>
    %c4 = arith.constant 4 : index
    %122 = memref.load %arg0[%c4] : memref<96xf32, #tpu.memory_space<smem>>
    %123 = vector.broadcast %122 : f32 to vector<28x28xf32>
    %124 = arith.mulf %123, %40 : vector<28x28xf32>
    %125 = arith.addf %121, %124 : vector<28x28xf32>
    %c36 = arith.constant 36 : index
    %126 = memref.load %arg0[%c36] : memref<96xf32, #tpu.memory_space<smem>>
    %127 = vector.broadcast %126 : f32 to vector<28x28xf32>
    %128 = arith.mulf %127, %49 : vector<28x28xf32>
    %129 = arith.addf %125, %128 : vector<28x28xf32>
    %c68 = arith.constant 68 : index
    %130 = memref.load %arg0[%c68] : memref<96xf32, #tpu.memory_space<smem>>
    %131 = vector.broadcast %130 : f32 to vector<28x28xf32>
    %132 = arith.mulf %131, %58 : vector<28x28xf32>
    %133 = arith.addf %129, %132 : vector<28x28xf32>
    %c5 = arith.constant 5 : index
    %134 = memref.load %arg0[%c5] : memref<96xf32, #tpu.memory_space<smem>>
    %135 = vector.broadcast %134 : f32 to vector<28x28xf32>
    %136 = arith.mulf %135, %43 : vector<28x28xf32>
    %137 = arith.addf %133, %136 : vector<28x28xf32>
    %c37 = arith.constant 37 : index
    %138 = memref.load %arg0[%c37] : memref<96xf32, #tpu.memory_space<smem>>
    %139 = vector.broadcast %138 : f32 to vector<28x28xf32>
    %140 = arith.mulf %139, %52 : vector<28x28xf32>
    %141 = arith.addf %137, %140 : vector<28x28xf32>
    %c69 = arith.constant 69 : index
    %142 = memref.load %arg0[%c69] : memref<96xf32, #tpu.memory_space<smem>>
    %143 = vector.broadcast %142 : f32 to vector<28x28xf32>
    %144 = arith.mulf %143, %61 : vector<28x28xf32>
    %145 = arith.addf %141, %144 : vector<28x28xf32>
    %c6 = arith.constant 6 : index
    %146 = memref.load %arg0[%c6] : memref<96xf32, #tpu.memory_space<smem>>
    %147 = vector.broadcast %146 : f32 to vector<28x28xf32>
    %148 = arith.mulf %147, %41 : vector<28x28xf32>
    %149 = arith.addf %145, %148 : vector<28x28xf32>
    %c38 = arith.constant 38 : index
    %150 = memref.load %arg0[%c38] : memref<96xf32, #tpu.memory_space<smem>>
    %151 = vector.broadcast %150 : f32 to vector<28x28xf32>
    %152 = arith.mulf %151, %50 : vector<28x28xf32>
    %153 = arith.addf %149, %152 : vector<28x28xf32>
    %c70 = arith.constant 70 : index
    %154 = memref.load %arg0[%c70] : memref<96xf32, #tpu.memory_space<smem>>
    %155 = vector.broadcast %154 : f32 to vector<28x28xf32>
    %156 = arith.mulf %155, %59 : vector<28x28xf32>
    %157 = arith.addf %153, %156 : vector<28x28xf32>
    %c7 = arith.constant 7 : index
    %158 = memref.load %arg0[%c7] : memref<96xf32, #tpu.memory_space<smem>>
    %159 = vector.broadcast %158 : f32 to vector<28x28xf32>
    %160 = arith.mulf %159, %44 : vector<28x28xf32>
    %161 = arith.addf %157, %160 : vector<28x28xf32>
    %c39 = arith.constant 39 : index
    %162 = memref.load %arg0[%c39] : memref<96xf32, #tpu.memory_space<smem>>
    %163 = vector.broadcast %162 : f32 to vector<28x28xf32>
    %164 = arith.mulf %163, %53 : vector<28x28xf32>
    %165 = arith.addf %161, %164 : vector<28x28xf32>
    %c71 = arith.constant 71 : index
    %166 = memref.load %arg0[%c71] : memref<96xf32, #tpu.memory_space<smem>>
    %167 = vector.broadcast %166 : f32 to vector<28x28xf32>
    %168 = arith.mulf %167, %62 : vector<28x28xf32>
    %169 = arith.addf %165, %168 : vector<28x28xf32>
    %cst_46 = arith.constant 4.04873705 : f32
    %170 = vector.broadcast %cst_46 : f32 to vector<28x28xf32>
    %171 = arith.minimumf %169, %170 : vector<28x28xf32>
    %cst_47 = arith.constant -4.04253101 : f32
    %172 = vector.broadcast %cst_47 : f32 to vector<28x28xf32>
    %173 = arith.maximumf %171, %172 : vector<28x28xf32>
    %c1_48 = arith.constant 1 : index
    %c0_49 = arith.constant 0 : index
    %c0_50 = arith.constant 0 : index
    %174 = vector.load %arg3[%c1_48, %c0_49, %c0_50] : memref<8x28x28xf32, #tpu.memory_space<vmem>>, vector<1x28x28xf32>
    %175 = vector.shape_cast %174 : vector<1x28x28xf32> to vector<28x28xf32>
    %176 = vector.shape_cast %173 : vector<28x28xf32> to vector<1x28x28xf32>
    tpu.vector_store %arg3[%c1_48, %c0_49, %c0_50], %176 {strides = array<i32>} : memref<8x28x28xf32, #tpu.memory_space<vmem>>, vector<1x28x28xf32>,
    %c2_51 = arith.constant 2 : index
    %177 = memref.load %arg1[%c2_51] : memref<8xf32, #tpu.memory_space<smem>>
    %178 = vector.broadcast %177 : f32 to vector<28x28xf32>
    %c8 = arith.constant 8 : index
    %179 = memref.load %arg0[%c8] : memref<96xf32, #tpu.memory_space<smem>>
    %180 = vector.broadcast %179 : f32 to vector<28x28xf32>
    %181 = arith.mulf %180, %40 : vector<28x28xf32>
    %182 = arith.addf %178, %181 : vector<28x28xf32>
    %c40 = arith.constant 40 : index
    %183 = memref.load %arg0[%c40] : memref<96xf32, #tpu.memory_space<smem>>
    %184 = vector.broadcast %183 : f32 to vector<28x28xf32>
    %185 = arith.mulf %184, %49 : vector<28x28xf32>
    %186 = arith.addf %182, %185 : vector<28x28xf32>
    %c72 = arith.constant 72 : index
    %187 = memref.load %arg0[%c72] : memref<96xf32, #tpu.memory_space<smem>>
    %188 = vector.broadcast %187 : f32 to vector<28x28xf32>
    %189 = arith.mulf %188, %58 : vector<28x28xf32>
    %190 = arith.addf %186, %189 : vector<28x28xf32>
    %c9 = arith.constant 9 : index
    %191 = memref.load %arg0[%c9] : memref<96xf32, #tpu.memory_space<smem>>
    %192 = vector.broadcast %191 : f32 to vector<28x28xf32>
    %193 = arith.mulf %192, %43 : vector<28x28xf32>
    %194 = arith.addf %190, %193 : vector<28x28xf32>
    %c41 = arith.constant 41 : index
    %195 = memref.load %arg0[%c41] : memref<96xf32, #tpu.memory_space<smem>>
    %196 = vector.broadcast %195 : f32 to vector<28x28xf32>
    %197 = arith.mulf %196, %52 : vector<28x28xf32>
    %198 = arith.addf %194, %197 : vector<28x28xf32>
    %c73 = arith.constant 73 : index
    %199 = memref.load %arg0[%c73] : memref<96xf32, #tpu.memory_space<smem>>
    %200 = vector.broadcast %199 : f32 to vector<28x28xf32>
    %201 = arith.mulf %200, %61 : vector<28x28xf32>
    %202 = arith.addf %198, %201 : vector<28x28xf32>
    %c10 = arith.constant 10 : index
    %203 = memref.load %arg0[%c10] : memref<96xf32, #tpu.memory_space<smem>>
    %204 = vector.broadcast %203 : f32 to vector<28x28xf32>
    %205 = arith.mulf %204, %41 : vector<28x28xf32>
    %206 = arith.addf %202, %205 : vector<28x28xf32>
    %c42 = arith.constant 42 : index
    %207 = memref.load %arg0[%c42] : memref<96xf32, #tpu.memory_space<smem>>
    %208 = vector.broadcast %207 : f32 to vector<28x28xf32>
    %209 = arith.mulf %208, %50 : vector<28x28xf32>
    %210 = arith.addf %206, %209 : vector<28x28xf32>
    %c74 = arith.constant 74 : index
    %211 = memref.load %arg0[%c74] : memref<96xf32, #tpu.memory_space<smem>>
    %212 = vector.broadcast %211 : f32 to vector<28x28xf32>
    %213 = arith.mulf %212, %59 : vector<28x28xf32>
    %214 = arith.addf %210, %213 : vector<28x28xf32>
    %c11 = arith.constant 11 : index
    %215 = memref.load %arg0[%c11] : memref<96xf32, #tpu.memory_space<smem>>
    %216 = vector.broadcast %215 : f32 to vector<28x28xf32>
    %217 = arith.mulf %216, %44 : vector<28x28xf32>
    %218 = arith.addf %214, %217 : vector<28x28xf32>
    %c43 = arith.constant 43 : index
    %219 = memref.load %arg0[%c43] : memref<96xf32, #tpu.memory_space<smem>>
    %220 = vector.broadcast %219 : f32 to vector<28x28xf32>
    %221 = arith.mulf %220, %53 : vector<28x28xf32>
    %222 = arith.addf %218, %221 : vector<28x28xf32>
    %c75 = arith.constant 75 : index
    %223 = memref.load %arg0[%c75] : memref<96xf32, #tpu.memory_space<smem>>
    %224 = vector.broadcast %223 : f32 to vector<28x28xf32>
    %225 = arith.mulf %224, %62 : vector<28x28xf32>
    %226 = arith.addf %222, %225 : vector<28x28xf32>
    %cst_52 = arith.constant 4.04873705 : f32
    %227 = vector.broadcast %cst_52 : f32 to vector<28x28xf32>
    %228 = arith.minimumf %226, %227 : vector<28x28xf32>
    %cst_53 = arith.constant -4.04253101 : f32
    %229 = vector.broadcast %cst_53 : f32 to vector<28x28xf32>
    %230 = arith.maximumf %228, %229 : vector<28x28xf32>
    %c2_54 = arith.constant 2 : index
    %c0_55 = arith.constant 0 : index
    %c0_56 = arith.constant 0 : index
    %231 = vector.load %arg3[%c2_54, %c0_55, %c0_56] : memref<8x28x28xf32, #tpu.memory_space<vmem>>, vector<1x28x28xf32>
    %232 = vector.shape_cast %231 : vector<1x28x28xf32> to vector<28x28xf32>
    %233 = vector.shape_cast %230 : vector<28x28xf32> to vector<1x28x28xf32>
    tpu.vector_store %arg3[%c2_54, %c0_55, %c0_56], %233 {strides = array<i32>} : memref<8x28x28xf32, #tpu.memory_space<vmem>>, vector<1x28x28xf32>,
    %c3_57 = arith.constant 3 : index
    %234 = memref.load %arg1[%c3_57] : memref<8xf32, #tpu.memory_space<smem>>
    %235 = vector.broadcast %234 : f32 to vector<28x28xf32>
    %c12 = arith.constant 12 : index
    %236 = memref.load %arg0[%c12] : memref<96xf32, #tpu.memory_space<smem>>
    %237 = vector.broadcast %236 : f32 to vector<28x28xf32>
    %238 = arith.mulf %237, %40 : vector<28x28xf32>
    %239 = arith.addf %235, %238 : vector<28x28xf32>
    %c44 = arith.constant 44 : index
    %240 = memref.load %arg0[%c44] : memref<96xf32, #tpu.memory_space<smem>>
    %241 = vector.broadcast %240 : f32 to vector<28x28xf32>
    %242 = arith.mulf %241, %49 : vector<28x28xf32>
    %243 = arith.addf %239, %242 : vector<28x28xf32>
    %c76 = arith.constant 76 : index
    %244 = memref.load %arg0[%c76] : memref<96xf32, #tpu.memory_space<smem>>
    %245 = vector.broadcast %244 : f32 to vector<28x28xf32>
    %246 = arith.mulf %245, %58 : vector<28x28xf32>
    %247 = arith.addf %243, %246 : vector<28x28xf32>
    %c13 = arith.constant 13 : index
    %248 = memref.load %arg0[%c13] : memref<96xf32, #tpu.memory_space<smem>>
    %249 = vector.broadcast %248 : f32 to vector<28x28xf32>
    %250 = arith.mulf %249, %43 : vector<28x28xf32>
    %251 = arith.addf %247, %250 : vector<28x28xf32>
    %c45 = arith.constant 45 : index
    %252 = memref.load %arg0[%c45] : memref<96xf32, #tpu.memory_space<smem>>
    %253 = vector.broadcast %252 : f32 to vector<28x28xf32>
    %254 = arith.mulf %253, %52 : vector<28x28xf32>
    %255 = arith.addf %251, %254 : vector<28x28xf32>
    %c77 = arith.constant 77 : index
    %256 = memref.load %arg0[%c77] : memref<96xf32, #tpu.memory_space<smem>>
    %257 = vector.broadcast %256 : f32 to vector<28x28xf32>
    %258 = arith.mulf %257, %61 : vector<28x28xf32>
    %259 = arith.addf %255, %258 : vector<28x28xf32>
    %c14 = arith.constant 14 : index
    %260 = memref.load %arg0[%c14] : memref<96xf32, #tpu.memory_space<smem>>
    %261 = vector.broadcast %260 : f32 to vector<28x28xf32>
    %262 = arith.mulf %261, %41 : vector<28x28xf32>
    %263 = arith.addf %259, %262 : vector<28x28xf32>
    %c46 = arith.constant 46 : index
    %264 = memref.load %arg0[%c46] : memref<96xf32, #tpu.memory_space<smem>>
    %265 = vector.broadcast %264 : f32 to vector<28x28xf32>
    %266 = arith.mulf %265, %50 : vector<28x28xf32>
    %267 = arith.addf %263, %266 : vector<28x28xf32>
    %c78 = arith.constant 78 : index
    %268 = memref.load %arg0[%c78] : memref<96xf32, #tpu.memory_space<smem>>
    %269 = vector.broadcast %268 : f32 to vector<28x28xf32>
    %270 = arith.mulf %269, %59 : vector<28x28xf32>
    %271 = arith.addf %267, %270 : vector<28x28xf32>
    %c15 = arith.constant 15 : index
    %272 = memref.load %arg0[%c15] : memref<96xf32, #tpu.memory_space<smem>>
    %273 = vector.broadcast %272 : f32 to vector<28x28xf32>
    %274 = arith.mulf %273, %44 : vector<28x28xf32>
    %275 = arith.addf %271, %274 : vector<28x28xf32>
    %c47 = arith.constant 47 : index
    %276 = memref.load %arg0[%c47] : memref<96xf32, #tpu.memory_space<smem>>
    %277 = vector.broadcast %276 : f32 to vector<28x28xf32>
    %278 = arith.mulf %277, %53 : vector<28x28xf32>
    %279 = arith.addf %275, %278 : vector<28x28xf32>
    %c79 = arith.constant 79 : index
    %280 = memref.load %arg0[%c79] : memref<96xf32, #tpu.memory_space<smem>>
    %281 = vector.broadcast %280 : f32 to vector<28x28xf32>
    %282 = arith.mulf %281, %62 : vector<28x28xf32>
    %283 = arith.addf %279, %282 : vector<28x28xf32>
    %cst_58 = arith.constant 4.04873705 : f32
    %284 = vector.broadcast %cst_58 : f32 to vector<28x28xf32>
    %285 = arith.minimumf %283, %284 : vector<28x28xf32>
    %cst_59 = arith.constant -4.04253101 : f32
    %286 = vector.broadcast %cst_59 : f32 to vector<28x28xf32>
    %287 = arith.maximumf %285, %286 : vector<28x28xf32>
    %c3_60 = arith.constant 3 : index
    %c0_61 = arith.constant 0 : index
    %c0_62 = arith.constant 0 : index
    %288 = vector.load %arg3[%c3_60, %c0_61, %c0_62] : memref<8x28x28xf32, #tpu.memory_space<vmem>>, vector<1x28x28xf32>
    %289 = vector.shape_cast %288 : vector<1x28x28xf32> to vector<28x28xf32>
    %290 = vector.shape_cast %287 : vector<28x28xf32> to vector<1x28x28xf32>
    tpu.vector_store %arg3[%c3_60, %c0_61, %c0_62], %290 {strides = array<i32>} : memref<8x28x28xf32, #tpu.memory_space<vmem>>, vector<1x28x28xf32>,
    %c4_63 = arith.constant 4 : index
    %291 = memref.load %arg1[%c4_63] : memref<8xf32, #tpu.memory_space<smem>>
    %292 = vector.broadcast %291 : f32 to vector<28x28xf32>
    %c16 = arith.constant 16 : index
    %293 = memref.load %arg0[%c16] : memref<96xf32, #tpu.memory_space<smem>>
    %294 = vector.broadcast %293 : f32 to vector<28x28xf32>
    %295 = arith.mulf %294, %40 : vector<28x28xf32>
    %296 = arith.addf %292, %295 : vector<28x28xf32>
    %c48 = arith.constant 48 : index
    %297 = memref.load %arg0[%c48] : memref<96xf32, #tpu.memory_space<smem>>
    %298 = vector.broadcast %297 : f32 to vector<28x28xf32>
    %299 = arith.mulf %298, %49 : vector<28x28xf32>
    %300 = arith.addf %296, %299 : vector<28x28xf32>
    %c80 = arith.constant 80 : index
    %301 = memref.load %arg0[%c80] : memref<96xf32, #tpu.memory_space<smem>>
    %302 = vector.broadcast %301 : f32 to vector<28x28xf32>
    %303 = arith.mulf %302, %58 : vector<28x28xf32>
    %304 = arith.addf %300, %303 : vector<28x28xf32>
    %c17 = arith.constant 17 : index
    %305 = memref.load %arg0[%c17] : memref<96xf32, #tpu.memory_space<smem>>
    %306 = vector.broadcast %305 : f32 to vector<28x28xf32>
    %307 = arith.mulf %306, %43 : vector<28x28xf32>
    %308 = arith.addf %304, %307 : vector<28x28xf32>
    %c49 = arith.constant 49 : index
    %309 = memref.load %arg0[%c49] : memref<96xf32, #tpu.memory_space<smem>>
    %310 = vector.broadcast %309 : f32 to vector<28x28xf32>
    %311 = arith.mulf %310, %52 : vector<28x28xf32>
    %312 = arith.addf %308, %311 : vector<28x28xf32>
    %c81 = arith.constant 81 : index
    %313 = memref.load %arg0[%c81] : memref<96xf32, #tpu.memory_space<smem>>
    %314 = vector.broadcast %313 : f32 to vector<28x28xf32>
    %315 = arith.mulf %314, %61 : vector<28x28xf32>
    %316 = arith.addf %312, %315 : vector<28x28xf32>
    %c18 = arith.constant 18 : index
    %317 = memref.load %arg0[%c18] : memref<96xf32, #tpu.memory_space<smem>>
    %318 = vector.broadcast %317 : f32 to vector<28x28xf32>
    %319 = arith.mulf %318, %41 : vector<28x28xf32>
    %320 = arith.addf %316, %319 : vector<28x28xf32>
    %c50 = arith.constant 50 : index
    %321 = memref.load %arg0[%c50] : memref<96xf32, #tpu.memory_space<smem>>
    %322 = vector.broadcast %321 : f32 to vector<28x28xf32>
    %323 = arith.mulf %322, %50 : vector<28x28xf32>
    %324 = arith.addf %320, %323 : vector<28x28xf32>
    %c82 = arith.constant 82 : index
    %325 = memref.load %arg0[%c82] : memref<96xf32, #tpu.memory_space<smem>>
    %326 = vector.broadcast %325 : f32 to vector<28x28xf32>
    %327 = arith.mulf %326, %59 : vector<28x28xf32>
    %328 = arith.addf %324, %327 : vector<28x28xf32>
    %c19 = arith.constant 19 : index
    %329 = memref.load %arg0[%c19] : memref<96xf32, #tpu.memory_space<smem>>
    %330 = vector.broadcast %329 : f32 to vector<28x28xf32>
    %331 = arith.mulf %330, %44 : vector<28x28xf32>
    %332 = arith.addf %328, %331 : vector<28x28xf32>
    %c51 = arith.constant 51 : index
    %333 = memref.load %arg0[%c51] : memref<96xf32, #tpu.memory_space<smem>>
    %334 = vector.broadcast %333 : f32 to vector<28x28xf32>
    %335 = arith.mulf %334, %53 : vector<28x28xf32>
    %336 = arith.addf %332, %335 : vector<28x28xf32>
    %c83 = arith.constant 83 : index
    %337 = memref.load %arg0[%c83] : memref<96xf32, #tpu.memory_space<smem>>
    %338 = vector.broadcast %337 : f32 to vector<28x28xf32>
    %339 = arith.mulf %338, %62 : vector<28x28xf32>
    %340 = arith.addf %336, %339 : vector<28x28xf32>
    %cst_64 = arith.constant 4.04873705 : f32
    %341 = vector.broadcast %cst_64 : f32 to vector<28x28xf32>
    %342 = arith.minimumf %340, %341 : vector<28x28xf32>
    %cst_65 = arith.constant -4.04253101 : f32
    %343 = vector.broadcast %cst_65 : f32 to vector<28x28xf32>
    %344 = arith.maximumf %342, %343 : vector<28x28xf32>
    %c4_66 = arith.constant 4 : index
    %c0_67 = arith.constant 0 : index
    %c0_68 = arith.constant 0 : index
    %345 = vector.load %arg3[%c4_66, %c0_67, %c0_68] : memref<8x28x28xf32, #tpu.memory_space<vmem>>, vector<1x28x28xf32>
    %346 = vector.shape_cast %345 : vector<1x28x28xf32> to vector<28x28xf32>
    %347 = vector.shape_cast %344 : vector<28x28xf32> to vector<1x28x28xf32>
    tpu.vector_store %arg3[%c4_66, %c0_67, %c0_68], %347 {strides = array<i32>} : memref<8x28x28xf32, #tpu.memory_space<vmem>>, vector<1x28x28xf32>,
    %c5_69 = arith.constant 5 : index
    %348 = memref.load %arg1[%c5_69] : memref<8xf32, #tpu.memory_space<smem>>
    %349 = vector.broadcast %348 : f32 to vector<28x28xf32>
    %c20 = arith.constant 20 : index
    %350 = memref.load %arg0[%c20] : memref<96xf32, #tpu.memory_space<smem>>
    %351 = vector.broadcast %350 : f32 to vector<28x28xf32>
    %352 = arith.mulf %351, %40 : vector<28x28xf32>
    %353 = arith.addf %349, %352 : vector<28x28xf32>
    %c52 = arith.constant 52 : index
    %354 = memref.load %arg0[%c52] : memref<96xf32, #tpu.memory_space<smem>>
    %355 = vector.broadcast %354 : f32 to vector<28x28xf32>
    %356 = arith.mulf %355, %49 : vector<28x28xf32>
    %357 = arith.addf %353, %356 : vector<28x28xf32>
    %c84 = arith.constant 84 : index
    %358 = memref.load %arg0[%c84] : memref<96xf32, #tpu.memory_space<smem>>
    %359 = vector.broadcast %358 : f32 to vector<28x28xf32>
    %360 = arith.mulf %359, %58 : vector<28x28xf32>
    %361 = arith.addf %357, %360 : vector<28x28xf32>
    %c21 = arith.constant 21 : index
    %362 = memref.load %arg0[%c21] : memref<96xf32, #tpu.memory_space<smem>>
    %363 = vector.broadcast %362 : f32 to vector<28x28xf32>
    %364 = arith.mulf %363, %43 : vector<28x28xf32>
    %365 = arith.addf %361, %364 : vector<28x28xf32>
    %c53 = arith.constant 53 : index
    %366 = memref.load %arg0[%c53] : memref<96xf32, #tpu.memory_space<smem>>
    %367 = vector.broadcast %366 : f32 to vector<28x28xf32>
    %368 = arith.mulf %367, %52 : vector<28x28xf32>
    %369 = arith.addf %365, %368 : vector<28x28xf32>
    %c85 = arith.constant 85 : index
    %370 = memref.load %arg0[%c85] : memref<96xf32, #tpu.memory_space<smem>>
    %371 = vector.broadcast %370 : f32 to vector<28x28xf32>
    %372 = arith.mulf %371, %61 : vector<28x28xf32>
    %373 = arith.addf %369, %372 : vector<28x28xf32>
    %c22 = arith.constant 22 : index
    %374 = memref.load %arg0[%c22] : memref<96xf32, #tpu.memory_space<smem>>
    %375 = vector.broadcast %374 : f32 to vector<28x28xf32>
    %376 = arith.mulf %375, %41 : vector<28x28xf32>
    %377 = arith.addf %373, %376 : vector<28x28xf32>
    %c54 = arith.constant 54 : index
    %378 = memref.load %arg0[%c54] : memref<96xf32, #tpu.memory_space<smem>>
    %379 = vector.broadcast %378 : f32 to vector<28x28xf32>
    %380 = arith.mulf %379, %50 : vector<28x28xf32>
    %381 = arith.addf %377, %380 : vector<28x28xf32>
    %c86 = arith.constant 86 : index
    %382 = memref.load %arg0[%c86] : memref<96xf32, #tpu.memory_space<smem>>
    %383 = vector.broadcast %382 : f32 to vector<28x28xf32>
    %384 = arith.mulf %383, %59 : vector<28x28xf32>
    %385 = arith.addf %381, %384 : vector<28x28xf32>
    %c23 = arith.constant 23 : index
    %386 = memref.load %arg0[%c23] : memref<96xf32, #tpu.memory_space<smem>>
    %387 = vector.broadcast %386 : f32 to vector<28x28xf32>
    %388 = arith.mulf %387, %44 : vector<28x28xf32>
    %389 = arith.addf %385, %388 : vector<28x28xf32>
    %c55 = arith.constant 55 : index
    %390 = memref.load %arg0[%c55] : memref<96xf32, #tpu.memory_space<smem>>
    %391 = vector.broadcast %390 : f32 to vector<28x28xf32>
    %392 = arith.mulf %391, %53 : vector<28x28xf32>
    %393 = arith.addf %389, %392 : vector<28x28xf32>
    %c87 = arith.constant 87 : index
    %394 = memref.load %arg0[%c87] : memref<96xf32, #tpu.memory_space<smem>>
    %395 = vector.broadcast %394 : f32 to vector<28x28xf32>
    %396 = arith.mulf %395, %62 : vector<28x28xf32>
    %397 = arith.addf %393, %396 : vector<28x28xf32>
    %cst_70 = arith.constant 4.04873705 : f32
    %398 = vector.broadcast %cst_70 : f32 to vector<28x28xf32>
    %399 = arith.minimumf %397, %398 : vector<28x28xf32>
    %cst_71 = arith.constant -4.04253101 : f32
    %400 = vector.broadcast %cst_71 : f32 to vector<28x28xf32>
    %401 = arith.maximumf %399, %400 : vector<28x28xf32>
    %c5_72 = arith.constant 5 : index
    %c0_73 = arith.constant 0 : index
    %c0_74 = arith.constant 0 : index
    %402 = vector.load %arg3[%c5_72, %c0_73, %c0_74] : memref<8x28x28xf32, #tpu.memory_space<vmem>>, vector<1x28x28xf32>
    %403 = vector.shape_cast %402 : vector<1x28x28xf32> to vector<28x28xf32>
    %404 = vector.shape_cast %401 : vector<28x28xf32> to vector<1x28x28xf32>
    tpu.vector_store %arg3[%c5_72, %c0_73, %c0_74], %404 {strides = array<i32>} : memref<8x28x28xf32, #tpu.memory_space<vmem>>, vector<1x28x28xf32>,
    %c6_75 = arith.constant 6 : index
    %405 = memref.load %arg1[%c6_75] : memref<8xf32, #tpu.memory_space<smem>>
    %406 = vector.broadcast %405 : f32 to vector<28x28xf32>
    %c24 = arith.constant 24 : index
    %407 = memref.load %arg0[%c24] : memref<96xf32, #tpu.memory_space<smem>>
    %408 = vector.broadcast %407 : f32 to vector<28x28xf32>
    %409 = arith.mulf %408, %40 : vector<28x28xf32>
    %410 = arith.addf %406, %409 : vector<28x28xf32>
    %c56 = arith.constant 56 : index
    %411 = memref.load %arg0[%c56] : memref<96xf32, #tpu.memory_space<smem>>
    %412 = vector.broadcast %411 : f32 to vector<28x28xf32>
    %413 = arith.mulf %412, %49 : vector<28x28xf32>
    %414 = arith.addf %410, %413 : vector<28x28xf32>
    %c88 = arith.constant 88 : index
    %415 = memref.load %arg0[%c88] : memref<96xf32, #tpu.memory_space<smem>>
    %416 = vector.broadcast %415 : f32 to vector<28x28xf32>
    %417 = arith.mulf %416, %58 : vector<28x28xf32>
    %418 = arith.addf %414, %417 : vector<28x28xf32>
    %c25 = arith.constant 25 : index
    %419 = memref.load %arg0[%c25] : memref<96xf32, #tpu.memory_space<smem>>
    %420 = vector.broadcast %419 : f32 to vector<28x28xf32>
    %421 = arith.mulf %420, %43 : vector<28x28xf32>
    %422 = arith.addf %418, %421 : vector<28x28xf32>
    %c57 = arith.constant 57 : index
    %423 = memref.load %arg0[%c57] : memref<96xf32, #tpu.memory_space<smem>>
    %424 = vector.broadcast %423 : f32 to vector<28x28xf32>
    %425 = arith.mulf %424, %52 : vector<28x28xf32>
    %426 = arith.addf %422, %425 : vector<28x28xf32>
    %c89 = arith.constant 89 : index
    %427 = memref.load %arg0[%c89] : memref<96xf32, #tpu.memory_space<smem>>
    %428 = vector.broadcast %427 : f32 to vector<28x28xf32>
    %429 = arith.mulf %428, %61 : vector<28x28xf32>
    %430 = arith.addf %426, %429 : vector<28x28xf32>
    %c26 = arith.constant 26 : index
    %431 = memref.load %arg0[%c26] : memref<96xf32, #tpu.memory_space<smem>>
    %432 = vector.broadcast %431 : f32 to vector<28x28xf32>
    %433 = arith.mulf %432, %41 : vector<28x28xf32>
    %434 = arith.addf %430, %433 : vector<28x28xf32>
    %c58 = arith.constant 58 : index
    %435 = memref.load %arg0[%c58] : memref<96xf32, #tpu.memory_space<smem>>
    %436 = vector.broadcast %435 : f32 to vector<28x28xf32>
    %437 = arith.mulf %436, %50 : vector<28x28xf32>
    %438 = arith.addf %434, %437 : vector<28x28xf32>
    %c90 = arith.constant 90 : index
    %439 = memref.load %arg0[%c90] : memref<96xf32, #tpu.memory_space<smem>>
    %440 = vector.broadcast %439 : f32 to vector<28x28xf32>
    %441 = arith.mulf %440, %59 : vector<28x28xf32>
    %442 = arith.addf %438, %441 : vector<28x28xf32>
    %c27 = arith.constant 27 : index
    %443 = memref.load %arg0[%c27] : memref<96xf32, #tpu.memory_space<smem>>
    %444 = vector.broadcast %443 : f32 to vector<28x28xf32>
    %445 = arith.mulf %444, %44 : vector<28x28xf32>
    %446 = arith.addf %442, %445 : vector<28x28xf32>
    %c59 = arith.constant 59 : index
    %447 = memref.load %arg0[%c59] : memref<96xf32, #tpu.memory_space<smem>>
    %448 = vector.broadcast %447 : f32 to vector<28x28xf32>
    %449 = arith.mulf %448, %53 : vector<28x28xf32>
    %450 = arith.addf %446, %449 : vector<28x28xf32>
    %c91 = arith.constant 91 : index
    %451 = memref.load %arg0[%c91] : memref<96xf32, #tpu.memory_space<smem>>
    %452 = vector.broadcast %451 : f32 to vector<28x28xf32>
    %453 = arith.mulf %452, %62 : vector<28x28xf32>
    %454 = arith.addf %450, %453 : vector<28x28xf32>
    %cst_76 = arith.constant 4.04873705 : f32
    %455 = vector.broadcast %cst_76 : f32 to vector<28x28xf32>
    %456 = arith.minimumf %454, %455 : vector<28x28xf32>
    %cst_77 = arith.constant -4.04253101 : f32
    %457 = vector.broadcast %cst_77 : f32 to vector<28x28xf32>
    %458 = arith.maximumf %456, %457 : vector<28x28xf32>
    %c6_78 = arith.constant 6 : index
    %c0_79 = arith.constant 0 : index
    %c0_80 = arith.constant 0 : index
    %459 = vector.load %arg3[%c6_78, %c0_79, %c0_80] : memref<8x28x28xf32, #tpu.memory_space<vmem>>, vector<1x28x28xf32>
    %460 = vector.shape_cast %459 : vector<1x28x28xf32> to vector<28x28xf32>
    %461 = vector.shape_cast %458 : vector<28x28xf32> to vector<1x28x28xf32>
    tpu.vector_store %arg3[%c6_78, %c0_79, %c0_80], %461 {strides = array<i32>} : memref<8x28x28xf32, #tpu.memory_space<vmem>>, vector<1x28x28xf32>,
    %c7_81 = arith.constant 7 : index
    %462 = memref.load %arg1[%c7_81] : memref<8xf32, #tpu.memory_space<smem>>
    %463 = vector.broadcast %462 : f32 to vector<28x28xf32>
    %c28 = arith.constant 28 : index
    %464 = memref.load %arg0[%c28] : memref<96xf32, #tpu.memory_space<smem>>
    %465 = vector.broadcast %464 : f32 to vector<28x28xf32>
    %466 = arith.mulf %465, %40 : vector<28x28xf32>
    %467 = arith.addf %463, %466 : vector<28x28xf32>
    %c60 = arith.constant 60 : index
    %468 = memref.load %arg0[%c60] : memref<96xf32, #tpu.memory_space<smem>>
    %469 = vector.broadcast %468 : f32 to vector<28x28xf32>
    %470 = arith.mulf %469, %49 : vector<28x28xf32>
    %471 = arith.addf %467, %470 : vector<28x28xf32>
    %c92 = arith.constant 92 : index
    %472 = memref.load %arg0[%c92] : memref<96xf32, #tpu.memory_space<smem>>
    %473 = vector.broadcast %472 : f32 to vector<28x28xf32>
    %474 = arith.mulf %473, %58 : vector<28x28xf32>
    %475 = arith.addf %471, %474 : vector<28x28xf32>
    %c29 = arith.constant 29 : index
    %476 = memref.load %arg0[%c29] : memref<96xf32, #tpu.memory_space<smem>>
    %477 = vector.broadcast %476 : f32 to vector<28x28xf32>
    %478 = arith.mulf %477, %43 : vector<28x28xf32>
    %479 = arith.addf %475, %478 : vector<28x28xf32>
    %c61 = arith.constant 61 : index
    %480 = memref.load %arg0[%c61] : memref<96xf32, #tpu.memory_space<smem>>
    %481 = vector.broadcast %480 : f32 to vector<28x28xf32>
    %482 = arith.mulf %481, %52 : vector<28x28xf32>
    %483 = arith.addf %479, %482 : vector<28x28xf32>
    %c93 = arith.constant 93 : index
    %484 = memref.load %arg0[%c93] : memref<96xf32, #tpu.memory_space<smem>>
    %485 = vector.broadcast %484 : f32 to vector<28x28xf32>
    %486 = arith.mulf %485, %61 : vector<28x28xf32>
    %487 = arith.addf %483, %486 : vector<28x28xf32>
    %c30 = arith.constant 30 : index
    %488 = memref.load %arg0[%c30] : memref<96xf32, #tpu.memory_space<smem>>
    %489 = vector.broadcast %488 : f32 to vector<28x28xf32>
    %490 = arith.mulf %489, %41 : vector<28x28xf32>
    %491 = arith.addf %487, %490 : vector<28x28xf32>
    %c62 = arith.constant 62 : index
    %492 = memref.load %arg0[%c62] : memref<96xf32, #tpu.memory_space<smem>>
    %493 = vector.broadcast %492 : f32 to vector<28x28xf32>
    %494 = arith.mulf %493, %50 : vector<28x28xf32>
    %495 = arith.addf %491, %494 : vector<28x28xf32>
    %c94 = arith.constant 94 : index
    %496 = memref.load %arg0[%c94] : memref<96xf32, #tpu.memory_space<smem>>
    %497 = vector.broadcast %496 : f32 to vector<28x28xf32>
    %498 = arith.mulf %497, %59 : vector<28x28xf32>
    %499 = arith.addf %495, %498 : vector<28x28xf32>
    %c31 = arith.constant 31 : index
    %500 = memref.load %arg0[%c31] : memref<96xf32, #tpu.memory_space<smem>>
    %501 = vector.broadcast %500 : f32 to vector<28x28xf32>
    %502 = arith.mulf %501, %44 : vector<28x28xf32>
    %503 = arith.addf %499, %502 : vector<28x28xf32>
    %c63 = arith.constant 63 : index
    %504 = memref.load %arg0[%c63] : memref<96xf32, #tpu.memory_space<smem>>
    %505 = vector.broadcast %504 : f32 to vector<28x28xf32>
    %506 = arith.mulf %505, %53 : vector<28x28xf32>
    %507 = arith.addf %503, %506 : vector<28x28xf32>
    %c95 = arith.constant 95 : index
    %508 = memref.load %arg0[%c95] : memref<96xf32, #tpu.memory_space<smem>>
    %509 = vector.broadcast %508 : f32 to vector<28x28xf32>
    %510 = arith.mulf %509, %62 : vector<28x28xf32>
    %511 = arith.addf %507, %510 : vector<28x28xf32>
    %cst_82 = arith.constant 4.04873705 : f32
    %512 = vector.broadcast %cst_82 : f32 to vector<28x28xf32>
    %513 = arith.minimumf %511, %512 : vector<28x28xf32>
    %cst_83 = arith.constant -4.04253101 : f32
    %514 = vector.broadcast %cst_83 : f32 to vector<28x28xf32>
    %515 = arith.maximumf %513, %514 : vector<28x28xf32>
    %c7_84 = arith.constant 7 : index
    %c0_85 = arith.constant 0 : index
    %c0_86 = arith.constant 0 : index
    %516 = vector.load %arg3[%c7_84, %c0_85, %c0_86] : memref<8x28x28xf32, #tpu.memory_space<vmem>>, vector<1x28x28xf32>
    %517 = vector.shape_cast %516 : vector<1x28x28xf32> to vector<28x28xf32>
    %518 = vector.shape_cast %515 : vector<28x28xf32> to vector<1x28x28xf32>
    tpu.vector_store %arg3[%c7_84, %c0_85, %c0_86], %518 {strides = array<i32>} : memref<8x28x28xf32, #tpu.memory_space<vmem>>, vector<1x28x28xf32>,
    return
  }
}

</mosaic_0001>

<bundles_post_ra>
// kernel: conv_transpose_clamp.1
= control target key start
LH: loop header
LB: loop body
LE: loop exit
PB: predicated region body
PF: predicated region fallthrough
CT: control target
= control target key end

     0   :  { %8 = vsyncpa [#allocation3], 0  ;;  %s5792_s0 = inlined_call_operand.vmem [shape: f32[96], index: 0, kind: input, shape index: {}]   ;;  %s5793_s1 = inlined_call_operand.vmem [shape: f32[8], index: 1, kind: input, shape index: {}]   ;;  %s5794_s2 = inlined_call_operand.vmem [shape: f32[3,16,16], index: 2, kind: input, shape index: {}]   ;;  %s5795_s3 = inlined_call_operand.vmem [shape: f32[8,28,28], index: 3, kind: output, shape index: {}]  }
   0x1   :  { %s16_s14 = sshll.u32 %s5792_s0, 4  ;;  %s17_s14 = int_to_ptr.vmem [resolvable:$true] %s16_s14 }
   0x2   :  { %9 = vsyncpa [#allocation5], 0  ;;  %s26_s17 = sshll.u32 %s5793_s1, 4  ;;  %s3321_s18 = scalar_lea.vmem %s17_s14, 16  ;;  %s27_s17 = int_to_ptr.vmem [resolvable:$true] %s26_s17 }
   0x3   :  { %p3322_p0 = scmp.ne.s32.totalorder %s17_s14, %s3321_s18  ;;  %p3326_p1 = scmp.lt.s32.totalorder %s17_s14, %s17_s14 }
   0x4   :  { %p3327_p2 = scmp.lt.s32.totalorder %s3321_s18, %s3321_s18 }
   0x6   :  { %p3328_p3 = por %p3327_p2, %p3326_p1 }
   0x8   :  { %p3329_p4 = pnand %p3328_p3, %p3322_p0 }
   0xa   :  { %3332 = shalt.err (!%p3329_p4)
}
   0xb   :  { %s3349_s19 = smov [#allocation2]   ;;  %s3333_s20 = scalar_lea.vmem %s27_s17, 16 }
   0xc   :  { %19 = dma.vmem_to_smem %s17_s14, 16, %s3349_s19, [#allocation3]  }
   0xd   :  { %p3334_p5 = scmp.ne.s32.totalorder %s27_s17, %s3333_s20  ;;  %p3338_p6 = scmp.lt.s32.totalorder %s27_s17, %s27_s17 }
   0xe   :  { %p3339_p7 = scmp.lt.s32.totalorder %s3333_s20, %s3333_s20 }
  0x10   :  { %p3340_p8 = por %p3339_p7, %p3338_p6 }
  0x12   :  { %p3341_p9 = pnand %p3340_p8, %p3334_p5 }
  0x14   :  { %3344 = shalt.err (!%p3341_p9)
}
  0x15   :  { %s3350_s0 = smov [#allocation4]  }
  0x16   :  { %29 = dma.vmem_to_smem %s27_s17, 16, %s3350_s0, [#allocation5]  }
  0x17   :  { %3345 = dma.done.wait [#allocation3], 16  }
  0x18   :  { %3346 = vsyncadd [#allocation3], 4294967280 }
  0x19   :  { %3347 = dma.done.wait [#allocation5], 16  }
  0x1a   :  { %3348 = vsyncadd [#allocation5], 4294967280 }
  0x1b   :  { %38 = sfence }
  0x1c   :  { %v76_v0 = vld [vmem:[%s5794_s2] sm:$0xff]  ;;  %v77_v1 = vld [vmem:[%s5794_s2 + $0x8] sm:$0xff]  ;;  %vm80_vm0 = vcmask 1046528   ;;  %v39_v2 = vlaneseq  ;;  %s3351_s24 = smov 127   ;;  %vm93_vm2 = vcmask 1045504   ;;  %v3352_v11 = vmov 0.0  }
  0x1d   :  { %v81_v3 = vrot.slane %v76_v0, 1  ;;  %v82_v4 = vrot.slane %v77_v1, 1  ;;  %v3353_v14 = vmov 1.0   ;;  %vm88_vm5 = vcmask 113664   ;;  %v2759_v20 = vld [vmem:[%s5794_s2 + $0x10] sm:$0xff]  ;;  %v2760_v21 = vld [vmem:[%s5794_s2 + $0x18] sm:$0xff] }
  0x1e   :  { %v3387_v5 = vshrl.u32 %v39_v2, 7  ;;  %v43_v8 = vand.u32 127, %v39_v2  ;;  %v625_v22 = vrot.slane %v2759_v20, 1  ;;  %v626_v23 = vrot.slane %v2760_v21, 1  ;;  %v2789_v57 = vld [vmem:[%s5794_s2 + $0x20] sm:$0xff]  ;;  %v2790_v58 = vld [vmem:[%s5794_s2 + $0x28] sm:$0xff] }
  0x1f   :  { %v83_v6 = vsel %vm80_vm0, %v81_v3, %v82_v4  ;;  %vm3354_vm9 = vmmov 1   ;;  %v5870_v30 = vmov 0  ;;  %v5874_v35 = vmov 0  ;;  %s1646_s2 = sld [smem:[#allocation2]]  ;;  %s2831_s6 = sld [smem:[#allocation2 + $0x4]] }
  0x20   :  { %84 = vrot.lane.b32.xlu0 %v83_v6, %s3351_s24  ;;  %v3392_v7 = vadd.s32 8, %v3387_v5  ;;  %v44_v9 = vmul.u32 2, %v3387_v5  ;;  %v58_v18 = vmul.u32 2, %v43_v8  ;;  %v627_v24 = vsel %vm80_vm0, %v625_v22, %v626_v23  ;;  %vm3431_vm10 = vmpackc.low %vm93_vm2, %vm3354_vm9  ;;  %s2848_s7 = sld [smem:[#allocation2 + $0x8]]  ;;  %s2865_s8 = sld [smem:[#allocation2 + $0xc]] }
  0x21   :  { %628 = vrot.lane.b32.xlu1 %v627_v24, %s3351_s24  ;;  %v56_v27 = vadd.s32 16, %v3387_v5  ;;  %v5871_v30 = vsel %vm3431_vm10, 4294967295, %v5870_v30  ;;  %v57_v33 = vadd.s32 24, %v3387_v5  ;;  %v1137_v59 = vrot.slane %v2789_v57, 1  ;;  %s1644_s9 = sld [smem:[#allocation4]]  ;;  %s2830_s10 = sld [smem:[#allocation4 + $0x1]] }
  0x22   :  { %v45_v10 = vmul.u32 2, %v3392_v7  ;;  %vm46_vm1 = vcmp.eq.s32.totalorder %v43_v8, %v44_v9  ;;  %vm59_vm6 = vcmp.eq.s32.totalorder %v3387_v5, %v58_v18  ;;  %v50_v26 = vadd.s32 1, %v44_v9  ;;  %5872 = vst [vmem:[#allocation9_spill] sm:$0xff] %v5871_v30  ;;  %s2882_s11 = sld [smem:[#allocation2 + $0x10]]  ;;  %s2899_s12 = sld [smem:[#allocation2 + $0x14]] }
  0x23   :  { %vm3399_vm4 = vmpackc.low %vm93_vm2, %vm46_vm1  ;;  %v3415_v19 = vsel %vm59_vm6, 1.0, %v3352_v11  ;;  %vm60_vm11 = vcmp.eq.s32.totalorder %v3392_v7, %v58_v18  ;;  %vm61_vm12 = vcmp.eq.s32.totalorder %v56_v27, %v58_v18  ;;  %vm62_vm14 = vcmp.eq.s32.totalorder %v57_v33, %v58_v18  ;;  %s2916_s13 = sld [smem:[#allocation2 + $0x18]]  ;;  %s2933_s14 = sld [smem:[#allocation2 + $0x1c]] }
  0x24   :  { %86 = vrot.lane.b32.xlu0 %v82_v4, %s3351_s24  ;;  %vm47_vm3 = vcmp.eq.s32.totalorder %v43_v8, %v45_v10  ;;  %5869 = vst [vmem:[#allocation8_spill] sm:$0xff] %v3415_v19  ;;  %3056 = vmatprep.mubr.msk.f32.mxu1 %vm88_vm5, %v3415_v19  ;;  %v51_v25 = vadd.s32 1, %v45_v10  ;;  %vm52_vm8 = vcmp.eq.s32.totalorder %v43_v8, %v50_v26  ;;  %v3453_v36 = vsel %vm60_vm11, 1.0, %v3352_v11  ;;  %s2847_s15 = sld [smem:[#allocation4 + $0x2]]  ;;  %s2864_s16 = sld [smem:[#allocation4 + $0x3]] }
  0x25   :  { %v49_v12 = vsel %vm47_vm3, 1.0, %v3352_v11  ;;  %630 = vrot.lane.b32.xlu1 %v626_v23, %s3351_s24  ;;  %vm3440_vm13 = vmpackc.low %vm93_vm2, %vm52_vm8  ;;  %5877 = vst [vmem:[#allocation12_spill] sm:$0xff] %v3453_v36  ;;  %v3456_v37 = vsel %vm61_vm12, 1.0, %v3352_v11  ;;  %v3466_v38 = vsel %vm62_vm14, 1.0, %v3352_v11  ;;  %v67_v39 = vadd.s32 1, %v58_v18  ;;  %s2881_s17 = sld [smem:[#allocation4 + $0x4]] }
  0x26   :  { %v3403_v15 = vpack.c.bf16 %v49_v12, %v3353_v14  ;;  %vm53_vm7 = vcmp.eq.s32.totalorder %v43_v8, %v51_v25  ;;  %v5875_v35 = vsel %vm3440_vm13, 4294967295, %v5874_v35  ;;  %5878 = vst [vmem:[#allocation13_spill] sm:$0xff] %v3456_v37  ;;  %5879 = vst [vmem:[#allocation14_spill] sm:$0xff] %v3466_v38  ;;  %v1138_v60 = vrot.slane %v2790_v58, 1  ;;  %s2898_s18 = sld [smem:[#allocation4 + $0x5]]  ;;  %s2915_s19 = sld [smem:[#allocation4 + $0x6]] }
  0x27   :  { %v55_v28 = vsel %vm53_vm7, 1.0, %v3352_v11  ;;  %5876 = vst [vmem:[#allocation11_spill] sm:$0xff] %v5875_v35  ;;  %vm68_vm15 = vcmp.eq.s32.totalorder %v3387_v5, %v67_v39  ;;  %vm69_vm1 = vcmp.eq.s32.totalorder %v3392_v7, %v67_v39  ;;  %vm70_vm2 = vcmp.eq.s32.totalorder %v56_v27, %v67_v39  ;;  %s2932_s20 = sld [smem:[#allocation4 + $0x7]]  ;;  %s3694_s0 = sld [smem:[#allocation2 + $0x20]] }
  0x28   :  { %3209 = vmatprep.subr.msk.bf16.mxu0 %vm3399_vm4, %v3403_v15  ;;  %v3437_v34 = vpack.c.bf16 %v55_v28, %v3353_v14  ;;  %v3477_v40 = vsel %vm68_vm15, 1.0, %v3352_v11  ;;  %v3483_v41 = vsel %vm69_vm1, 1.0, %v3352_v11  ;;  %v3490_v42 = vsel %vm70_vm2, 1.0, %v3352_v11  ;;  %s3696_s1 = sld [smem:[#allocation2 + $0x24]]  ;;  %s3710_s21 = sld [smem:[#allocation2 + $0x28]] }
  0x29   :  { %3212 = vmatpush3.bf16.msk.msra.mxu0 %vm3399_vm4, %v3403_v15  ;;  %5880 = vst [vmem:[#allocation15_spill] sm:$0xff] %v3477_v40  ;;  %5881 = vst [vmem:[#allocation16_spill] sm:$0xff] %v3483_v41  ;;  %vm71_vm3 = vcmp.eq.s32.totalorder %v57_v33, %v67_v39  ;;  %v1139_v61 = vsel %vm80_vm0, %v1137_v59, %v1138_v60  ;;  %1142 = vrot.lane.b32.xlu1 %v1138_v60, %s3351_s24  ;;  %v3606_v9 = vstv %s1646_s2  ;;  %s3712_s22 = sld [smem:[#allocation2 + $0x2c]]  ;;  %s3722_s23 = sld [smem:[#allocation2 + $0x30]]  ;;  %vm1774_vm0 = vcmask 228352  }
  0x2a   :  { %5873 = vst [vmem:[#allocation10_spill] sm:$0xff] %v3437_v34  ;;  %5882 = vst [vmem:[#allocation17_spill] sm:$0xff] %v3490_v42  ;;  %v3495_v43 = vsel %vm71_vm3, 1.0, %v3352_v11  ;;  %1140 = vrot.lane.b32.xlu0 %v1139_v61, %s3351_s24  ;;  %v3608_v10 = vstv %s2831_s6  ;;  %v3610_v11 = vstv %s2848_s7  ;;  %v3612_v12 = vstv %s2865_s8  ;;  %s3724_s24 = sld [smem:[#allocation2 + $0x34]]  ;;  %s3734_s25 = sld [smem:[#allocation2 + $0x38]] }
  0x2b   :  { %5883 = vst [vmem:[#allocation18_spill] sm:$0xff] %v3495_v43  ;;  %v3614_v14 = vstv %s2882_s11  ;;  %v3620_v18 = vstv %s2933_s14  ;;  %v3622_v20 = vstv %s1644_s9  ;;  %v3624_v21 = vstv %s2830_s10  ;;  %s3736_s26 = sld [smem:[#allocation2 + $0x3c]]  ;;  %s2821_s27 = sld [smem:[#allocation2 + $0x1]] }
  0x2c   :  { %v3626_v22 = vstv %s2847_s15  ;;  %v3628_v23 = vstv %s2864_s16  ;;  %v3646_v33 = vstv %s2881_s17  ;;  %v3648_v39 = vstv %s2898_s18  ;;  %s2834_s28 = sld [smem:[#allocation2 + $0x5]]  ;;  %s2851_s29 = sld [smem:[#allocation2 + $0x9]] }
  0x2d   :  { %s2868_s30 = sld [smem:[#allocation2 + $0xd]]  ;;  %s2885_s4 = sld [smem:[#allocation2 + $0x11]] }
  0x2e   :  { %s2902_s5 = sld [smem:[#allocation2 + $0x15]]  ;;  %s2919_s2 = sld [smem:[#allocation2 + $0x19]] }
  0x2f   :  { %s2936_s6 = sld [smem:[#allocation2 + $0x1d]]  ;;  %s4054_s7 = sld [smem:[#allocation2 + $0x21]] }
  0x30   :  { %v5920_v13 = vld [vmem:[#allocation15_spill] sm:$0xff]  ;;  %s4056_s8 = sld [smem:[#allocation2 + $0x25]]  ;;  %s4058_s9 = sld [smem:[#allocation2 + $0x29]] }
  0x31   :  { %s4060_s10 = sld [smem:[#allocation2 + $0x2d]]  ;;  %s4070_s11 = sld [smem:[#allocation2 + $0x31]] }
  0x32   :  { %s4084_s14 = sld [smem:[#allocation2 + $0x3d]]  ;;  %s4150_s15 = sld [smem:[#allocation2 + $0x40]] }
  0x33   :  { %s4152_s16 = sld [smem:[#allocation2 + $0x44]]  ;;  %s4170_s17 = sld [smem:[#allocation2 + $0x48]] }
  0x34   :  { %s4172_s18 = sld [smem:[#allocation2 + $0x4c]] }
  0x35   :  { %v4175_v30 = vstv %s4054_s7  ;;  %s4618_s7 = sld [smem:[#allocation2 + $0x1b]] }
  0x36   :  { %5947 = vst [vmem:[#allocation66_spill] sm:$0xff] %v4175_v30 }
  0x92   :  { %v85_v16 = vpop.permute.xlu0 %84 }
  0x93   :  { %3049 = vmatprep.mubr.msk.f32.mxu0 %vm88_vm5, %v85_v16  ;;  %v629_v51 = vpop.permute.xlu1 %628 }
  0x96   :  { %v87_v17 = vpop.permute.xlu0 %86 }
  0x97   :  { %3050 = vmatmul.mubr.msk.f32.vlgmr.msra.gmra.mrb[0].mxu0 %vm88_vm5, %v87_v17  ;;  %v631_v52 = vpop.permute.xlu1 %630 }
  0x98   :  { %3066 = vmatprep.mubr.msk.f32.mxu0 %vm88_vm5, %v3477_v40 }
 0x16a   :  { %v3051_v29 = vpop.f32.mrb[0].mxu0 }
 0x16b   :  { %v163_v31 = vpop.f32.mrb[1].mxu0 }
 0x16c   :  { %v3213_v32 = vpack.c.bf16 %v3051_v29, %v163_v31 }
 0x16e   :  { %3215 = vmatprep.subr.msk.bf16.mxu1 %vm3431_vm10, %v3213_v32  ;;  %3221 = vmatprep.subr.msk.bf16.mxu0 %vm3431_vm10, %v3213_v32 }
 0x16f   :  { %3218 = vmatpush3.bf16.msk.msra.mxu1 %vm3431_vm10, %v3213_v32  ;;  %3224 = vmatpush3.bf16.msk.msra.mxu0 %vm3431_vm10, %v3213_v32 }
 0x170   :  { %3227 = vmatprep.subr.msk.bf16.mxu1 %vm3440_vm13, %v3437_v34 }
 0x172   :  { %3057 = vmatmul.mubr.msk.f32.vlgmr.msra.gmra.mrb[0].mxu1 %vm88_vm5, %v3453_v36  ;;  %3067 = vmatmul.mubr.msk.f32.vlgmr.msra.gmra.mrb[2].mxu0 %vm88_vm5, %v3483_v41 }
 0x173   :  { %3059 = vmatprep.mubr.msk.f32.mxu1 %vm88_vm5, %v3456_v37  ;;  %3230 = vmatpush3.bf16.msk.msra.mxu1 %vm3440_vm13, %v3437_v34 }
 0x174   :  { %3069 = vmatprep.mubr.msk.f32.mxu0 %vm88_vm5, %v3490_v42 }
 0x176   :  { %3060 = vmatmul.mubr.msk.f32.gmra.mrb[2].mxu1 %vm88_vm5, %v3466_v38  ;;  %3070 = vmatmul.mubr.msk.f32.gmra.mrb[4].mxu0 %vm88_vm5, %v3495_v43 }
 0x177   :  { %3076 = vmatprep.mubr.msk.f32.mxu1 %vm88_vm5, %v85_v16  ;;  %3083 = vmatprep.mubr.msk.f32.mxu0 %vm88_vm5, %v3415_v19  ;;  %v3616_v16 = vstv %s2899_s12  ;;  %s4072_s12 = sld [smem:[#allocation2 + $0x35]] }
 0x17a   :  { %3077 = vmatmul.mubr.msk.f32.vlgmr.msra.gmra.mrb[4].mxu1 %vm88_vm5, %v87_v17  ;;  %v3618_v17 = vstv %s2916_s13  ;;  %s4082_s13 = sld [smem:[#allocation2 + $0x39]] }
 0x17b   :  { %3093 = vmatprep.mubr.msk.f32.mxu1 %vm88_vm5, %v3477_v40 }
 0x245   :  { %v3501_v44 = vpop.f32.mrb[0].mxu1  ;;  %v3541_v53 = vpop.f32.mrb[2].mxu0 }
 0x246   :  { %v3503_v45 = vpop.f32.mrb[1].mxu1  ;;  %5884 = vst [vmem:[#allocation19_spill] sm:$0xff] %v3541_v53  ;;  %v3543_v54 = vpop.f32.mrb[3].mxu0  ;;  %v1649_v24 = vmul.f32 %v3501_v44, %v3606_v9  ;;  %v1785_v25 = vmul.f32 %v3501_v44, %v3608_v10  ;;  %v1920_v26 = vmul.f32 %v3501_v44, %v3610_v11  ;;  %v2055_v27 = vmul.f32 %v3501_v44, %v3612_v12 }
 0x247   :  { %5885 = vst [vmem:[#allocation20_spill] sm:$0xff] %v3543_v54  ;;  %v2190_v28 = vmul.f32 %v3501_v44, %v3614_v14  ;;  %v2325_v29 = vmul.f32 %v3501_v44, %v3616_v16  ;;  %v2460_v31 = vmul.f32 %v3501_v44, %v3618_v17  ;;  %v2595_v32 = vmul.f32 %v3501_v44, %v3620_v18 }
 0x248   :  { %v2054_v44 = vmul.f32 %v3612_v12, %v3503_v45  ;;  %v3663_v57 = vadd.f32 %v1649_v24, %v3622_v20  ;;  %v3666_v58 = vadd.f32 %v1785_v25, %v3624_v21  ;;  %v3669_v59 = vadd.f32 %v1920_v26, %v3626_v22 }
 0x249   :  { %v3505_v46 = vpop.f32.mrb[2].mxu1  ;;  %v3545_v55 = vpop.f32.mrb[4].mxu0  ;;  %v3672_v60 = vadd.f32 %v2055_v27, %v3628_v23  ;;  %v3675_v61 = vadd.f32 %v2190_v28, %v3646_v33  ;;  %v2189_v24 = vmul.f32 %v3614_v14, %v3503_v45  ;;  %v2324_v25 = vmul.f32 %v3616_v16, %v3503_v45 }
 0x24a   :  { %v3507_v47 = vpop.f32.mrb[3].mxu1  ;;  %5886 = vst [vmem:[#allocation21_spill] sm:$0xff] %v3545_v55  ;;  %v3547_v56 = vpop.f32.mrb[5].mxu0  ;;  %v2459_v26 = vmul.f32 %v3618_v17, %v3503_v45  ;;  %v2594_v27 = vmul.f32 %v3620_v18, %v3503_v45 }
 0x24b   :  { %5887 = vst [vmem:[#allocation22_spill] sm:$0xff] %v3547_v56  ;;  %v3742_v56 = vadd.f32 %v2324_v25, %v3648_v39  ;;  %v1650_v53 = vmul.f32 %v3606_v9, %v3507_v47 }
 0x24d   :  { %v3078_v48 = vpop.f32.mrb[4].mxu1 }
 0x24e   :  { %v438_v49 = vpop.f32.mrb[5].mxu1 }
 0x24f   :  { %v3231_v50 = vpack.c.bf16 %v3078_v48, %v438_v49  ;;  %v3650_v48 = vstv %s2915_s19  ;;  %v3652_v49 = vstv %s2932_s20  ;;  %s4186_s19 = sld [smem:[#allocation2 + $0x50]]  ;;  %s4188_s20 = sld [smem:[#allocation2 + $0x54]] }
 0x250   :  { %v3745_v55 = vadd.f32 %v2459_v26, %v3650_v48  ;;  %v3748_v54 = vadd.f32 %v2594_v27, %v3652_v49 }
 0x251   :  { %3233 = vmatprep.subr.msk.bf16.mxu0 %vm3431_vm10, %v3231_v50  ;;  %3239 = vmatprep.subr.msk.bf16.mxu1 %vm3431_vm10, %v3231_v50 }
 0x252   :  { %3236 = vmatpush3.bf16.msk.msra.mxu0 %vm3431_vm10, %v3231_v50  ;;  %3242 = vmatpush3.bf16.msk.msra.mxu1 %vm3431_vm10, %v3231_v50  ;;  %v1648_v50 = vmul.f32 %v3606_v9, %v3503_v45 }
 0x253   :  { %3245 = vmatprep.subr.msk.bf16.mxu0 %vm3399_vm4, %v3403_v15 }
 0x254   :  { %v3699_v28 = vadd.f32 %v1648_v50, %v3622_v20  ;;  %v1787_v50 = vmul.f32 %v3505_v46, %v3608_v10 }
 0x255   :  { %3084 = vmatmul.mubr.msk.f32.vlgmr.msra.gmra.mrb[6].mxu0 %vm88_vm5, %v3453_v36  ;;  %3094 = vmatmul.mubr.msk.f32.vlgmr.msra.gmra.mrb[6].mxu1 %vm88_vm5, %v3483_v41 }
 0x256   :  { %3086 = vmatprep.mubr.msk.f32.mxu0 %vm88_vm5, %v3456_v37  ;;  %3248 = vmatpush3.bf16.msk.msra.mxu0 %vm3399_vm4, %v3403_v15  ;;  %v3762_v26 = vadd.f32 %v1787_v50, %v3624_v21  ;;  %v2191_v50 = vmul.f32 %v3614_v14, %v3507_v47 }
 0x257   :  { %3096 = vmatprep.mubr.msk.f32.mxu1 %vm88_vm5, %v3490_v42 }
 0x259   :  { %3087 = vmatmul.mubr.msk.f32.gmra.mrb[8].mxu0 %vm88_vm5, %v3466_v38  ;;  %3097 = vmatmul.mubr.msk.f32.gmra.mrb[8].mxu1 %vm88_vm5, %v3495_v43 }
 0x25a   :  { %3103 = vmatprep.mubr.msk.f32.mxu0 %vm88_vm5, %v629_v51  ;;  %3110 = vmatprep.mubr.msk.f32.mxu1 %vm88_vm5, %v3415_v19 }
 0x25d   :  { %3104 = vmatmul.mubr.msk.f32.vlgmr.msra.gmra.mrb[10].mxu0 %vm88_vm5, %v631_v52 }
 0x25e   :  { %3120 = vmatprep.mubr.msk.f32.mxu0 %vm88_vm5, %v3477_v40 }
 0x328   :  { %v3558_v62 = vpop.f32.mrb[6].mxu0  ;;  %v3560_v63 = vpop.f32.mrb[6].mxu1 }
 0x329   :  { %5888 = vst [vmem:[#allocation23_spill] sm:$0xff] %v3558_v62  ;;  %5889 = vst [vmem:[#allocation24_spill] sm:$0xff] %v3560_v63  ;;  %v3562_v0 = vpop.f32.mrb[7].mxu0  ;;  %v3564_v1 = vpop.f32.mrb[7].mxu1  ;;  %v3739_v63 = vadd.f32 %v2189_v24, %v3646_v33  ;;  %v2056_v24 = vmul.f32 %v3612_v12, %v3507_v47 }
 0x32a   :  { %5890 = vst [vmem:[#allocation25_spill] sm:$0xff] %v3562_v0  ;;  %5891 = vst [vmem:[#allocation26_spill] sm:$0xff] %v3564_v1  ;;  %v2597_v1 = vmul.f32 %v3505_v46, %v3620_v18  ;;  %v3812_v0 = vstv %s3712_s22  ;;  %s2837_s22 = sld [smem:[#allocation2 + $0x6]] }
 0x32c   :  { %v3566_v2 = vpop.f32.mrb[8].mxu0  ;;  %v3568_v3 = vpop.f32.mrb[8].mxu1 }
 0x32d   :  { %5892 = vst [vmem:[#allocation27_spill] sm:$0xff] %v3566_v2  ;;  %5893 = vst [vmem:[#allocation28_spill] sm:$0xff] %v3568_v3  ;;  %v3570_v4 = vpop.f32.mrb[9].mxu0  ;;  %v3572_v5 = vpop.f32.mrb[9].mxu1  ;;  %v2462_v3 = vmul.f32 %v3505_v46, %v3618_v17  ;;  %v3803_v2 = vstv %s3694_s0  ;;  %s4202_s0 = sld [smem:[#allocation2 + $0x58]] }
 0x32e   :  { %5894 = vst [vmem:[#allocation29_spill] sm:$0xff] %v3570_v4  ;;  %5895 = vst [vmem:[#allocation30_spill] sm:$0xff] %v3572_v5  ;;  %v2327_v5 = vmul.f32 %v3505_v46, %v3616_v16  ;;  %v1921_v4 = vmul.f32 %v3610_v11, %v3507_v47 }
 0x330   :  { %v3105_v6 = vpop.f32.mrb[10].mxu0 }
 0x331   :  { %v702_v7 = vpop.f32.mrb[11].mxu0 }
 0x332   :  { %v3249_v8 = vpack.c.bf16 %v3105_v6, %v702_v7  ;;  %v3678_v6 = vadd.f32 %v2325_v29, %v3648_v39  ;;  %v3681_v7 = vadd.f32 %v2460_v31, %v3650_v48 }
 0x334   :  { %3251 = vmatprep.subr.msk.bf16.mxu1 %vm3431_vm10, %v3249_v8  ;;  %3257 = vmatprep.subr.msk.bf16.mxu0 %vm3431_vm10, %v3249_v8 }
 0x335   :  { %3254 = vmatpush3.bf16.msk.msra.mxu1 %vm3431_vm10, %v3249_v8  ;;  %3260 = vmatpush3.bf16.msk.msra.mxu0 %vm3431_vm10, %v3249_v8  ;;  %v3684_v8 = vadd.f32 %v2595_v32, %v3652_v49  ;;  %v3708_v32 = vadd.f32 %v2054_v44, %v3628_v23  ;;  %v2192_v44 = vmul.f32 %v3505_v46, %v3614_v14 }
 0x336   :  { %3263 = vmatprep.subr.msk.bf16.mxu1 %vm3440_vm13, %v3437_v34  ;;  %v3800_v14 = vadd.f32 %v2056_v24, %v3628_v23 }
 0x338   :  { %3111 = vmatmul.mubr.msk.f32.vlgmr.msra.gmra.mrb[10].mxu1 %vm88_vm5, %v3453_v36  ;;  %3121 = vmatmul.mubr.msk.f32.vlgmr.msra.gmra.mrb[12].mxu0 %vm88_vm5, %v3483_v41 }
 0x339   :  { %3113 = vmatprep.mubr.msk.f32.mxu1 %vm88_vm5, %v3456_v37  ;;  %3266 = vmatpush3.bf16.msk.msra.mxu1 %vm3440_vm13, %v3437_v34 }
 0x33a   :  { %3123 = vmatprep.mubr.msk.f32.mxu0 %vm88_vm5, %v3490_v42 }
 0x33c   :  { %3114 = vmatmul.mubr.msk.f32.gmra.mrb[12].mxu1 %vm88_vm5, %v3466_v38  ;;  %3124 = vmatmul.mubr.msk.f32.gmra.mrb[14].mxu0 %vm88_vm5, %v3495_v43 }
 0x33d   :  { %3130 = vmatprep.mubr.msk.f32.mxu1 %vm88_vm5, %v629_v51  ;;  %3137 = vmatprep.mubr.msk.f32.mxu0 %vm88_vm5, %v3415_v19  ;;  %v1784_v51 = vmul.f32 %v3608_v10, %v3503_v45 }
 0x33f   :  { %v3702_v29 = vadd.f32 %v1784_v51, %v3624_v21  ;;  %v1922_v51 = vmul.f32 %v3505_v46, %v3610_v11 }
 0x340   :  { %3131 = vmatmul.mubr.msk.f32.vlgmr.msra.gmra.mrb[14].mxu1 %vm88_vm5, %v631_v52  ;;  %v1919_v52 = vmul.f32 %v3610_v11, %v3503_v45  ;;  %v1651_v45 = vmul.f32 %v3505_v46, %v3606_v9  ;;  %v3774_v11 = vadd.f32 %v2327_v5, %v3648_v39  ;;  %v2596_v5 = vmul.f32 %v3620_v18, %v3507_v47 }
 0x341   :  { %3147 = vmatprep.mubr.msk.f32.mxu1 %vm88_vm5, %v3477_v40  ;;  %v3765_v27 = vadd.f32 %v1922_v51, %v3626_v22  ;;  %v2326_v51 = vmul.f32 %v3616_v16, %v3507_v47  ;;  %v3806_v16 = vstv %s3696_s1  ;;  %v3821_v18 = vstv %s3734_s25  ;;  %s4204_s1 = sld [smem:[#allocation2 + $0x5c]]  ;;  %s2888_s25 = sld [smem:[#allocation2 + $0x12]] }
 0x342   :  { %v3705_v31 = vadd.f32 %v1919_v52, %v3626_v22  ;;  %v2057_v52 = vmul.f32 %v3505_v46, %v3612_v12  ;;  %v1786_v46 = vmul.f32 %v3608_v10, %v3507_v47  ;;  %v3759_v25 = vadd.f32 %v1651_v45, %v3622_v20 }
 0x343   :  { %v3771_v10 = vadd.f32 %v2192_v44, %v3646_v33  ;;  %v3777_v12 = vadd.f32 %v2462_v3, %v3650_v48  ;;  %v3780_v45 = vadd.f32 %v2597_v1, %v3652_v49  ;;  %v3791_v3 = vadd.f32 %v1650_v53, %v3622_v20 }
 0x344   :  { %v3768_v9 = vadd.f32 %v2057_v52, %v3628_v23  ;;  %v2461_v52 = vmul.f32 %v3618_v17, %v3507_v47  ;;  %v3794_v44 = vadd.f32 %v1786_v46, %v3624_v21  ;;  %v3797_v1 = vadd.f32 %v1921_v4, %v3626_v22 }
 0x345   :  { %v3809_v17 = vstv %s3710_s21  ;;  %v3815_v47 = vstv %s3722_s23  ;;  %v3818_v53 = vstv %s3724_s24  ;;  %v3824_v20 = vstv %s3736_s26  ;;  %s2824_s21 = sld [smem:[#allocation2 + $0x2]]  ;;  %s2871_s24 = sld [smem:[#allocation2 + $0xe]] }
 0x346   :  { %v3827_v4 = vadd.f32 %v2191_v50, %v3646_v33  ;;  %v3830_v21 = vadd.f32 %v2326_v51, %v3648_v39  ;;  %v3833_v22 = vadd.f32 %v2461_v52, %v3650_v48  ;;  %v3836_v23 = vadd.f32 %v2596_v5, %v3652_v49  ;;  %s2854_s23 = sld [smem:[#allocation2 + $0xa]]  ;;  %s2905_s26 = sld [smem:[#allocation2 + $0x16]] }
 0x40b   :  { %v3112_v46 = vpop.f32.mrb[10].mxu1  ;;  %v3846_v49 = vpop.f32.mrb[12].mxu0 }
 0x40c   :  { %v1659_v24 = vmul.f32 %v3112_v46, %v3803_v2  ;;  %v1795_v62 = vmul.f32 %v3112_v46, %v3806_v16  ;;  %v1930_v35 = vmul.f32 %v3112_v46, %v3809_v17  ;;  %v2065_v34 = vmul.f32 %v3112_v46, %v3812_v0  ;;  %v780_v33 = vpop.f32.mrb[11].mxu1  ;;  %5896 = vst [vmem:[#allocation31_spill] sm:$0xff] %v3846_v49  ;;  %v3860_v43 = vpop.f32.mrb[13].mxu0 }
 0x40d   :  { %v2200_v50 = vmul.f32 %v3112_v46, %v3815_v47  ;;  %v2335_v39 = vmul.f32 %v3112_v46, %v3818_v53  ;;  %v2470_v48 = vmul.f32 %v3112_v46, %v3821_v18  ;;  %v2605_v51 = vmul.f32 %v3112_v46, %v3824_v20  ;;  %5897 = vst [vmem:[#allocation32_spill] sm:$0xff] %v3860_v43 }
 0x40e   :  { %v3849_v52 = vadd.f32 %v1659_v24, %v3663_v57  ;;  %v3852_v5 = vadd.f32 %v1795_v62, %v3666_v58  ;;  %v3855_v40 = vadd.f32 %v1930_v35, %v3669_v59  ;;  %v3858_v19 = vadd.f32 %v2065_v34, %v3672_v60 }
 0x40f   :  { %v3863_v38 = vadd.f32 %v2200_v50, %v3675_v61  ;;  %v3866_v46 = vadd.f32 %v2335_v39, %v3678_v6  ;;  %v3869_v57 = vadd.f32 %v2470_v48, %v3681_v7  ;;  %v3872_v62 = vadd.f32 %v2605_v51, %v3684_v8  ;;  %v3115_v58 = vpop.f32.mrb[12].mxu1  ;;  %v3882_v8 = vpop.f32.mrb[14].mxu0 }
 0x410   :  { %v1658_v35 = vmul.f32 %v3803_v2, %v780_v33  ;;  %v1794_v34 = vmul.f32 %v3806_v16, %v780_v33  ;;  %v1929_v59 = vmul.f32 %v3809_v17, %v780_v33  ;;  %v2064_v60 = vmul.f32 %v3812_v0, %v780_v33  ;;  %v790_v61 = vpop.f32.mrb[13].mxu1  ;;  %5899 = vst [vmem:[#allocation34_spill] sm:$0xff] %v3882_v8  ;;  %v3896_v49 = vpop.f32.mrb[15].mxu0 }
 0x411   :  { %5898 = vst [vmem:[#allocation33_spill] sm:$0xff] %v3872_v62  ;;  %v2199_v24 = vmul.f32 %v3815_v47, %v780_v33  ;;  %v2334_v6 = vmul.f32 %v3818_v53, %v780_v33  ;;  %v2469_v7 = vmul.f32 %v3821_v18, %v780_v33  ;;  %v2604_v50 = vmul.f32 %v3824_v20, %v780_v33 }
 0x412   :  { %v3885_v39 = vadd.f32 %v1658_v35, %v3699_v28  ;;  %v3888_v48 = vadd.f32 %v1794_v34, %v3702_v29  ;;  %v3891_v51 = vadd.f32 %v1929_v59, %v3705_v31  ;;  %v3894_v43 = vadd.f32 %v2064_v60, %v3708_v32  ;;  %5900 = vst [vmem:[#allocation35_spill] sm:$0xff] %v3896_v49 }
 0x413   :  { %v3899_v62 = vadd.f32 %v2199_v24, %v3739_v63  ;;  %v3902_v33 = vadd.f32 %v2334_v6, %v3742_v56  ;;  %v3905_v28 = vadd.f32 %v2469_v7, %v3745_v55  ;;  %v3908_v29 = vadd.f32 %v2604_v50, %v3748_v54  ;;  %v3132_v35 = vpop.f32.mrb[14].mxu1 }
 0x414   :  { %v1661_v31 = vmul.f32 %v3115_v58, %v3803_v2  ;;  %v1797_v32 = vmul.f32 %v3115_v58, %v3806_v16  ;;  %v1932_v34 = vmul.f32 %v3115_v58, %v3809_v17  ;;  %v2067_v59 = vmul.f32 %v3115_v58, %v3812_v0  ;;  %v950_v63 = vpop.f32.mrb[15].mxu1 }
 0x415   :  { %v2202_v60 = vmul.f32 %v3115_v58, %v3815_v47  ;;  %v2337_v56 = vmul.f32 %v3115_v58, %v3818_v53  ;;  %v2472_v55 = vmul.f32 %v3115_v58, %v3821_v18  ;;  %v2607_v24 = vmul.f32 %v3115_v58, %v3824_v20 }
 0x416   :  { %v3919_v54 = vadd.f32 %v1661_v31, %v3759_v25  ;;  %v3922_v6 = vadd.f32 %v1797_v32, %v3762_v26  ;;  %v3925_v7 = vadd.f32 %v1932_v34, %v3765_v27  ;;  %v3928_v50 = vadd.f32 %v2067_v59, %v3768_v9 }
 0x417   :  { %v3931_v49 = vadd.f32 %v2202_v60, %v3771_v10  ;;  %v3934_v8 = vadd.f32 %v2337_v56, %v3774_v11  ;;  %v3937_v58 = vadd.f32 %v2472_v55, %v3777_v12  ;;  %v3940_v25 = vadd.f32 %v2607_v24, %v3780_v45  ;;  %v5926_v55 = vld [vmem:[#allocation10_spill] sm:$0xff]  ;;  %v5937_v24 = vld [vmem:[#allocation25_spill] sm:$0xff] }
 0x418   :  { %5901 = vst [vmem:[#allocation36_spill] sm:$0xff] %v3919_v54  ;;  %5902 = vst [vmem:[#allocation37_spill] sm:$0xff] %v3922_v6  ;;  %v1660_v26 = vmul.f32 %v3803_v2, %v790_v61  ;;  %v1796_v27 = vmul.f32 %v3806_v16, %v790_v61  ;;  %v1931_v31 = vmul.f32 %v3809_v17, %v790_v61  ;;  %v4309_v6 = vstv %s4170_s17  ;;  %s4818_s17 = sld [smem:[#allocation2 + $0x23]] }
 0x419   :  { %5903 = vst [vmem:[#allocation38_spill] sm:$0xff] %v3925_v7  ;;  %5904 = vst [vmem:[#allocation39_spill] sm:$0xff] %v3928_v50  ;;  %v2066_v9 = vmul.f32 %v3812_v0, %v790_v61  ;;  %v2201_v10 = vmul.f32 %v3815_v47, %v790_v61  ;;  %v2336_v32 = vmul.f32 %v3818_v53, %v790_v61  ;;  %v1143_v53 = vpop.permute.xlu1 %1142  ;;  %v4303_v7 = vstv %s4150_s15  ;;  %s4738_s15 = sld [smem:[#allocation2 + $0x3a]] }
 0x41a   :  { %5905 = vst [vmem:[#allocation40_spill] sm:$0xff] %v3931_v49  ;;  %5906 = vst [vmem:[#allocation41_spill] sm:$0xff] %v3934_v8  ;;  %v2471_v11 = vmul.f32 %v3821_v18, %v790_v61  ;;  %v2606_v12 = vmul.f32 %v3824_v20, %v790_v61  ;;  %v3951_v34 = vadd.f32 %v1660_v26, %v3791_v3  ;;  %v5918_v18 = vld [vmem:[#allocation18_spill] sm:$0xff]  ;;  %v5919_v20 = vld [vmem:[#allocation8_spill] sm:$0xff]  ;;  %v4062_v26 = vstv %s2821_s27  ;;  %s2922_s27 = sld [smem:[#allocation2 + $0x1a]] }
 0x41b   :  { %5907 = vst [vmem:[#allocation42_spill] sm:$0xff] %v3937_v58  ;;  %5908 = vst [vmem:[#allocation43_spill] sm:$0xff] %v3940_v25  ;;  %v3954_v45 = vadd.f32 %v1796_v27, %v3794_v44  ;;  %v3957_v2 = vadd.f32 %v1931_v31, %v3797_v1  ;;  %v3960_v16 = vadd.f32 %v2066_v9, %v3800_v14  ;;  %v1141_v1 = vpop.permute.xlu0 %1140  ;;  %v5917_v14 = vld [vmem:[#allocation14_spill] sm:$0xff]  ;;  %v4064_v27 = vstv %s2834_s28  ;;  %s2939_s28 = sld [smem:[#allocation2 + $0x1e]] }
 0x41c   :  { %5909 = vst [vmem:[#allocation44_spill] sm:$0xff] %v3951_v34  ;;  %v3963_v0 = vadd.f32 %v2201_v10, %v3827_v4  ;;  %v3966_v17 = vadd.f32 %v2336_v32, %v3830_v21  ;;  %v3969_v47 = vadd.f32 %v2471_v11, %v3833_v22  ;;  %v3972_v3 = vadd.f32 %v2606_v12, %v3836_v23 }
 0x41d   :  { %5910 = vst [vmem:[#allocation45_spill] sm:$0xff] %v3954_v45  ;;  %5911 = vst [vmem:[#allocation46_spill] sm:$0xff] %v3957_v2  ;;  %v3267_v44 = vpack.c.bf16 %v3132_v35, %v950_v63  ;;  %v4066_v31 = vstv %s2851_s29  ;;  %v4068_v9 = vstv %s2868_s30  ;;  %v4074_v10 = vstv %s2885_s4  ;;  %s4594_s29 = sld [smem:[#allocation2 + $0x3]]  ;;  %s4596_s30 = sld [smem:[#allocation2 + $0x7]] }
 0x41e   :  { %5912 = vst [vmem:[#allocation47_spill] sm:$0xff] %v3960_v16  ;;  %5913 = vst [vmem:[#allocation48_spill] sm:$0xff] %v3963_v0  ;;  %v4076_v32 = vstv %s2902_s5  ;;  %v4078_v11 = vstv %s2919_s2  ;;  %v4080_v12 = vstv %s2936_s6  ;;  %s4598_s4 = sld [smem:[#allocation2 + $0xb]]  ;;  %s4600_s5 = sld [smem:[#allocation2 + $0xf]] }
 0x41f   :  { %5914 = vst [vmem:[#allocation49_spill] sm:$0xff] %v3966_v17  ;;  %5915 = vst [vmem:[#allocation50_spill] sm:$0xff] %v3969_v47  ;;  %3269 = vmatprep.subr.msk.bf16.mxu0 %vm3431_vm10, %v3267_v44  ;;  %3275 = vmatprep.subr.msk.bf16.mxu1 %vm3431_vm10, %v3267_v44  ;;  %v4197_v47 = vstv %s4082_s13  ;;  %v4200_v17 = vstv %s4084_s14  ;;  %s4602_s2 = sld [smem:[#allocation2 + $0x13]]  ;;  %s4604_s6 = sld [smem:[#allocation2 + $0x17]] }
 0x420   :  { %5916 = vst [vmem:[#allocation51_spill] sm:$0xff] %v3972_v3  ;;  %3272 = vmatpush3.bf16.msk.msra.mxu0 %vm3431_vm10, %v3267_v44  ;;  %3278 = vmatpush3.bf16.msk.msra.mxu1 %vm3431_vm10, %v3267_v44  ;;  %5928 = vst [vmem:[#allocation10_spill] sm:$0xff] %v4062_v26  ;;  %v5936_v44 = vld [vmem:[#allocation23_spill] sm:$0xff]  ;;  %v4181_v3 = vstv %s4058_s9  ;;  %s4698_s9 = sld [smem:[#allocation2 + $0x22]]  ;;  %s4724_s14 = sld [smem:[#allocation2 + $0x36]] }
 0x421   :  { %3281 = vmatprep.subr.msk.bf16.mxu0 %vm3399_vm4, %v3403_v15  ;;  %5929 = vst [vmem:[#allocation11_spill] sm:$0xff] %v4064_v27  ;;  %5930 = vst [vmem:[#allocation55_spill] sm:$0xff] %v4066_v31  ;;  %s4722_s13 = sld [smem:[#allocation2 + $0x32]] }
 0x422   :  { %5931 = vst [vmem:[#allocation56_spill] sm:$0xff] %v4068_v9  ;;  %5932 = vst [vmem:[#allocation57_spill] sm:$0xff] %v4074_v10 }
 0x423   :  { %3138 = vmatmul.mubr.msk.f32.vlgmr.msra.gmra.mrb[16].mxu0 %vm88_vm5, %v3453_v36  ;;  %3148 = vmatmul.mubr.msk.f32.vlgmr.msra.gmra.mrb[16].mxu1 %vm88_vm5, %v3483_v41  ;;  %5933 = vst [vmem:[#allocation58_spill] sm:$0xff] %v4076_v32  ;;  %5934 = vst [vmem:[#allocation59_spill] sm:$0xff] %v4078_v11 }
 0x424   :  { %3140 = vmatprep.mubr.msk.f32.mxu0 %vm88_vm5, %v3456_v37  ;;  %3284 = vmatpush3.bf16.msk.msra.mxu0 %vm3399_vm4, %v3403_v15  ;;  %5935 = vst [vmem:[#allocation60_spill] sm:$0xff] %v4080_v12  ;;  %5949 = vst [vmem:[#allocation68_spill] sm:$0xff] %v4181_v3  ;;  %vm1778_vm4 = vcmask 224256  }
 0x425   :  { %3150 = vmatprep.mubr.msk.f32.mxu1 %vm88_vm5, %v3490_v42  ;;  %5953 = vst [vmem:[#allocation72_spill] sm:$0xff] %v4197_v47  ;;  %5954 = vst [vmem:[#allocation73_spill] sm:$0xff] %v4200_v17 }
 0x427   :  { %3141 = vmatmul.mubr.msk.f32.gmra.mrb[18].mxu0 %vm88_vm5, %v5917_v14  ;;  %3151 = vmatmul.mubr.msk.f32.gmra.mrb[18].mxu1 %vm88_vm5, %v5918_v18 }
 0x428   :  { %3157 = vmatprep.mubr.msk.f32.mxu0 %vm88_vm5, %v1141_v1  ;;  %3164 = vmatprep.mubr.msk.f32.mxu1 %vm88_vm5, %v5919_v20 }
 0x42b   :  { %3158 = vmatmul.mubr.msk.f32.vlgmr.msra.gmra.mrb[20].mxu0 %vm88_vm5, %v1143_v53 }
 0x42c   :  { %3174 = vmatprep.mubr.msk.f32.mxu0 %vm88_vm5, %v5920_v13 }
 0x4f6   :  { %v4006_v15 = vpop.f32.mrb[16].mxu0  ;;  %v4010_v21 = vpop.f32.mrb[16].mxu1 }
 0x4f7   :  { %v4008_v4 = vpop.f32.mrb[17].mxu0  ;;  %5921 = vst [vmem:[#allocation8_spill] sm:$0xff] %v4010_v21  ;;  %v4012_v22 = vpop.f32.mrb[17].mxu1  ;;  %v4132_v21 = vmul.f32 %v4068_v9, %v5937_v24  ;;  %v4224_v34 = vmul.f32 %v4006_v15, %v4175_v30 }
 0x4f8   :  { %5922 = vst [vmem:[#allocation15_spill] sm:$0xff] %v4012_v22  ;;  %v4128_v22 = vmul.f32 %v4066_v31, %v5937_v24  ;;  %v4284_v25 = vmul.f32 %v4200_v17, %v4008_v4 }
 0x4fa   :  { %v4014_v23 = vpop.f32.mrb[18].mxu0  ;;  %v4018_v35 = vpop.f32.mrb[18].mxu1  ;;  %5966 = vst [vmem:[#allocation85_spill] sm:$0xff] %v4284_v25 }
 0x4fb   :  { %v4016_v61 = vpop.f32.mrb[19].mxu0  ;;  %5924 = vst [vmem:[#allocation53_spill] sm:$0xff] %v4018_v35  ;;  %v4020_v59 = vpop.f32.mrb[19].mxu1  ;;  %v4124_v35 = vmul.f32 %v4064_v27, %v5937_v24  ;;  %v4288_v58 = vmul.f32 %v4014_v23, %v4175_v30  ;;  %v4296_v49 = vmul.f32 %v4014_v23, %v4181_v3  ;;  %v4340_v54 = vmul.f32 %v4014_v23, %v4200_v17 }
 0x4fc   :  { %5923 = vst [vmem:[#allocation52_spill] sm:$0xff] %v4016_v61  ;;  %5925 = vst [vmem:[#allocation54_spill] sm:$0xff] %v4020_v59  ;;  %v4120_v59 = vmul.f32 %v4062_v26, %v5937_v24 }
 0x4fd   :  { %5967 = vst [vmem:[#allocation86_spill] sm:$0xff] %v4288_v58  ;;  %5969 = vst [vmem:[#allocation88_spill] sm:$0xff] %v4296_v49  ;;  %v4315_v58 = vstv %s4186_s19  ;;  %v4336_v49 = vmul.f32 %v4014_v23, %v4197_v47  ;;  %s4826_s19 = sld [smem:[#allocation2 + $0x2b]] }
 0x4fe   :  { %v3159_v63 = vpop.f32.mrb[20].mxu0  ;;  %5974 = vst [vmem:[#allocation93_spill] sm:$0xff] %v4340_v54 }
 0x4ff   :  { %v1214_v60 = vpop.f32.mrb[21].mxu0  ;;  %5973 = vst [vmem:[#allocation92_spill] sm:$0xff] %v4336_v49 }
 0x500   :  { %v3285_v56 = vpack.c.bf16 %v3159_v63, %v1214_v60  ;;  %v4104_v63 = vmul.f32 %v5936_v44, %v4074_v10  ;;  %v4108_v60 = vmul.f32 %v5936_v44, %v4076_v32 }
 0x502   :  { %3287 = vmatprep.subr.msk.bf16.mxu1 %vm3431_vm10, %v3285_v56  ;;  %3293 = vmatprep.subr.msk.bf16.mxu0 %vm3431_vm10, %v3285_v56 }
 0x503   :  { %3290 = vmatpush3.bf16.msk.msra.mxu1 %vm3431_vm10, %v3285_v56  ;;  %3296 = vmatpush3.bf16.msk.msra.mxu0 %vm3431_vm10, %v3285_v56  ;;  %v4112_v56 = vmul.f32 %v5936_v44, %v4078_v11 }
 0x504   :  { %3299 = vmatprep.subr.msk.bf16.mxu1 %vm3440_vm13, %v5926_v55 }
 0x506   :  { %3165 = vmatmul.mubr.msk.f32.vlgmr.msra.gmra.mrb[20].mxu1 %vm88_vm5, %v3453_v36  ;;  %3175 = vmatmul.mubr.msk.f32.vlgmr.msra.gmra.mrb[22].mxu0 %vm88_vm5, %v3483_v41 }
 0x507   :  { %3167 = vmatprep.mubr.msk.f32.mxu1 %vm88_vm5, %v3456_v37  ;;  %3302 = vmatpush3.bf16.msk.msra.mxu1 %vm3440_vm13, %v5926_v55  ;;  %v4116_v55 = vmul.f32 %v5936_v44, %v4080_v12  ;;  %v5942_v37 = vld [vmem:[#allocation27_spill] sm:$0xff] }
 0x508   :  { %3177 = vmatprep.mubr.msk.f32.mxu0 %vm88_vm5, %v3490_v42  ;;  %v4148_v42 = vmul.f32 %v4080_v12, %v5937_v24  ;;  %v4156_v61 = vmul.f32 %v5942_v37, %v4062_v26  ;;  %v4160_v41 = vmul.f32 %v5942_v37, %v4064_v27  ;;  %v4164_v36 = vmul.f32 %v5942_v37, %v4066_v31 }
 0x509   :  { %v4208_v0 = vmul.f32 %v5942_v37, %v4074_v10  ;;  %v4212_v16 = vmul.f32 %v5942_v37, %v4076_v32  ;;  %v4216_v2 = vmul.f32 %v5942_v37, %v4078_v11  ;;  %v4220_v45 = vmul.f32 %v5942_v37, %v4080_v12 }
 0x50a   :  { %3168 = vmatmul.mubr.msk.f32.gmra.mrb[22].mxu1 %vm88_vm5, %v5917_v14  ;;  %3178 = vmatmul.mubr.msk.f32.gmra.mrb[24].mxu0 %vm88_vm5, %v5918_v18  ;;  %v4140_v18 = vmul.f32 %v4076_v32, %v5937_v24  ;;  %v4144_v14 = vmul.f32 %v4078_v11, %v5937_v24  ;;  %5941 = vst [vmem:[#allocation62_spill] sm:$0xff] %v4148_v42  ;;  %5943 = vst [vmem:[#allocation27_spill] sm:$0xff] %v4156_v61 }
 0x50b   :  { %3184 = vmatprep.mubr.msk.f32.mxu1 %vm88_vm5, %v1141_v1  ;;  %3191 = vmatprep.mubr.msk.f32.mxu0 %vm88_vm5, %v5919_v20  ;;  %v4088_v1 = vmul.f32 %v5936_v44, %v4062_v26  ;;  %v4096_v20 = vmul.f32 %v5936_v44, %v4066_v31  ;;  %5944 = vst [vmem:[#allocation63_spill] sm:$0xff] %v4160_v41  ;;  %5945 = vst [vmem:[#allocation64_spill] sm:$0xff] %v4164_v36  ;;  %v4178_v26 = vstv %s4056_s8  ;;  %s4620_s8 = sld [smem:[#allocation2 + $0x1f]] }
 0x50c   :  { %5939 = vst [vmem:[#allocation25_spill] sm:$0xff] %v4140_v18  ;;  %5940 = vst [vmem:[#allocation61_spill] sm:$0xff] %v4144_v14  ;;  %v4191_v31 = vstv %s4070_s11  ;;  %v4232_v32 = vmul.f32 %v4006_v15, %v4181_v3  ;;  %v4280_v61 = vmul.f32 %v4197_v47, %v4008_v4  ;;  %v4292_v8 = vmul.f32 %v4014_v23, %v4178_v26  ;;  %v5976_v18 = vld [vmem:[#allocation33_spill] sm:$0xff]  ;;  %s4706_s11 = sld [smem:[#allocation2 + $0x2a]] }
 0x50d   :  { %5948 = vst [vmem:[#allocation67_spill] sm:$0xff] %v4178_v26  ;;  %5951 = vst [vmem:[#allocation70_spill] sm:$0xff] %v4191_v31  ;;  %v4272_v36 = vmul.f32 %v4191_v31, %v4008_v4 }
 0x50e   :  { %3185 = vmatmul.mubr.msk.f32.vlgmr.msra.gmra.mrb[24].mxu1 %vm88_vm5, %v1143_v53  ;;  %v4092_v53 = vmul.f32 %v5936_v44, %v4064_v27  ;;  %v4184_v27 = vstv %s4060_s10  ;;  %5955 = vst [vmem:[#allocation74_spill] sm:$0xff] %v4208_v0  ;;  %5956 = vst [vmem:[#allocation75_spill] sm:$0xff] %v4212_v16  ;;  %v4256_v16 = vmul.f32 %v4175_v30, %v4008_v4  ;;  %v4312_v30 = vstv %s4172_s18  ;;  %s4700_s10 = sld [smem:[#allocation2 + $0x26]]  ;;  %s4820_s18 = sld [smem:[#allocation2 + $0x27]] }
 0x50f   :  { %3201 = vmatprep.mubr.msk.f32.mxu1 %vm88_vm5, %v5920_v13  ;;  %v4100_v13 = vmul.f32 %v5936_v44, %v4068_v9  ;;  %v4136_v44 = vmul.f32 %v4074_v10, %v5937_v24  ;;  %v4168_v24 = vmul.f32 %v5942_v37, %v4068_v9  ;;  %5950 = vst [vmem:[#allocation69_spill] sm:$0xff] %v4184_v27  ;;  %v4194_v9 = vstv %s4072_s12  ;;  %s4708_s12 = sld [smem:[#allocation2 + $0x2e]] }
 0x510   :  { %5952 = vst [vmem:[#allocation71_spill] sm:$0xff] %v4194_v9  ;;  %5957 = vst [vmem:[#allocation76_spill] sm:$0xff] %v4216_v2  ;;  %v4228_v10 = vmul.f32 %v4006_v15, %v4178_v26  ;;  %v4236_v11 = vmul.f32 %v4006_v15, %v4184_v27  ;;  %v4240_v37 = vmul.f32 %v4006_v15, %v4191_v31 }
 0x511   :  { %5938 = vst [vmem:[#allocation23_spill] sm:$0xff] %v4136_v44  ;;  %5946 = vst [vmem:[#allocation65_spill] sm:$0xff] %v4168_v24  ;;  %v4244_v12 = vmul.f32 %v4006_v15, %v4194_v9  ;;  %v4252_v2 = vmul.f32 %v4006_v15, %v4200_v17  ;;  %v4260_v0 = vmul.f32 %v4178_v26, %v4008_v4  ;;  %v4318_v26 = vstv %s4188_s20  ;;  %s4828_s20 = sld [smem:[#allocation2 + $0x2f]] }
 0x512   :  { %5958 = vst [vmem:[#allocation77_spill] sm:$0xff] %v4220_v45  ;;  %v4248_v45 = vmul.f32 %v4006_v15, %v4197_v47  ;;  %5959 = vst [vmem:[#allocation78_spill] sm:$0xff] %v4256_v16  ;;  %v4264_v24 = vmul.f32 %v4181_v3, %v4008_v4  ;;  %v4268_v15 = vmul.f32 %v4184_v27, %v4008_v4  ;;  %v4324_v3 = vstv %s4204_s1  ;;  %s4844_s1 = sld [smem:[#allocation2 + $0x37]] }
 0x513   :  { %5960 = vst [vmem:[#allocation79_spill] sm:$0xff] %v4260_v0  ;;  %5963 = vst [vmem:[#allocation82_spill] sm:$0xff] %v4272_v36  ;;  %v4276_v41 = vmul.f32 %v4194_v9, %v4008_v4  ;;  %v4300_v50 = vmul.f32 %v4014_v23, %v4184_v27  ;;  %v4306_v4 = vstv %s4152_s16  ;;  %v4328_v27 = vmul.f32 %v4014_v23, %v4191_v31  ;;  %s4740_s16 = sld [smem:[#allocation2 + $0x3e]] }
 0x514   :  { %5961 = vst [vmem:[#allocation80_spill] sm:$0xff] %v4264_v24  ;;  %5962 = vst [vmem:[#allocation81_spill] sm:$0xff] %v4268_v15 }
 0x515   :  { %5964 = vst [vmem:[#allocation83_spill] sm:$0xff] %v4276_v41  ;;  %5965 = vst [vmem:[#allocation84_spill] sm:$0xff] %v4280_v61 }
 0x516   :  { %5968 = vst [vmem:[#allocation87_spill] sm:$0xff] %v4292_v8  ;;  %5970 = vst [vmem:[#allocation89_spill] sm:$0xff] %v4300_v50  ;;  %v4321_v8 = vstv %s4202_s0  ;;  %v4332_v50 = vmul.f32 %v4014_v23, %v4194_v9  ;;  %s4842_s0 = sld [smem:[#allocation2 + $0x33]] }
 0x517   :  { %5971 = vst [vmem:[#allocation90_spill] sm:$0xff] %v4328_v27 }
 0x518   :  { %5972 = vst [vmem:[#allocation91_spill] sm:$0xff] %v4332_v50 }
 0x5d9   :  { %v3166_v25 = vpop.f32.mrb[20].mxu1  ;;  %v4350_v23 = vpop.f32.mrb[22].mxu0 }
 0x5da   :  { %v1669_v61 = vmul.f32 %v3166_v25, %v4303_v7  ;;  %v1805_v41 = vmul.f32 %v3166_v25, %v4306_v4  ;;  %v1940_v31 = vmul.f32 %v3166_v25, %v4309_v6  ;;  %v2075_v27 = vmul.f32 %v3166_v25, %v4312_v30  ;;  %v1292_v36 = vpop.f32.mrb[21].mxu1  ;;  %5975 = vst [vmem:[#allocation94_spill] sm:$0xff] %v4350_v23  ;;  %v4356_v0 = vpop.f32.mrb[23].mxu0 }
 0x5db   :  { %v2210_v9 = vmul.f32 %v3166_v25, %v4315_v58  ;;  %v2345_v50 = vmul.f32 %v3166_v25, %v4318_v26  ;;  %v2480_v47 = vmul.f32 %v3166_v25, %v4321_v8  ;;  %v2615_v49 = vmul.f32 %v3166_v25, %v4324_v3 }
 0x5dc   :  { %v1673_v17 = vadd.f32 %v1669_v61, %v3849_v52  ;;  %v1809_v54 = vadd.f32 %v1805_v41, %v3852_v5  ;;  %v1944_v15 = vadd.f32 %v1940_v31, %v3855_v40  ;;  %v2079_v24 = vadd.f32 %v2075_v27, %v3858_v19 }
 0x5dd   :  { %v2214_v16 = vadd.f32 %v2210_v9, %v3863_v38  ;;  %v2349_v42 = vadd.f32 %v2345_v50, %v3866_v46  ;;  %v2484_v14 = vadd.f32 %v2480_v47, %v3869_v57  ;;  %v2619_v25 = vadd.f32 %v2615_v49, %v5976_v18  ;;  %v3169_v44 = vpop.f32.mrb[22].mxu1  ;;  %v4372_v49 = vpop.f32.mrb[24].mxu0 }
 0x5de   :  { %v1683_v23 = vadd.f32 %v4088_v1, %v1673_v17  ;;  %v1819_v52 = vadd.f32 %v4092_v53, %v1809_v54  ;;  %v1954_v41 = vadd.f32 %v4096_v20, %v1944_v15  ;;  %v2089_v40 = vadd.f32 %v4100_v13, %v2079_v24  ;;  %v4366_v19 = vpop.f32.mrb[23].mxu1  ;;  %v5982_v15 = vld [vmem:[#allocation25_spill] sm:$0xff] }
 0x5df   :  { %v2224_v5 = vadd.f32 %v4104_v63, %v2214_v16  ;;  %v2359_v38 = vadd.f32 %v4108_v60, %v2349_v42  ;;  %v2494_v46 = vadd.f32 %v4112_v56, %v2484_v14  ;;  %v2629_v57 = vadd.f32 %v4116_v55, %v2619_v25  ;;  %v4386_v16 = vpop.f32.mrb[25].mxu0  ;;  %v5984_v25 = vld [vmem:[#allocation62_spill] sm:$0xff] }
 0x5e0   :  { %v4375_v50 = vadd.f32 %v4224_v34, %v1683_v23  ;;  %v4378_v54 = vadd.f32 %v4228_v10, %v1819_v52  ;;  %v4381_v17 = vadd.f32 %v4232_v32, %v1954_v41  ;;  %v4384_v47 = vadd.f32 %v4236_v11, %v2089_v40  ;;  %v5983_v23 = vld [vmem:[#allocation61_spill] sm:$0xff]  ;;  %v5985_v52 = vld [vmem:[#allocation78_spill] sm:$0xff] }
 0x5e1   :  { %v4389_v42 = vadd.f32 %v4240_v37, %v2224_v5  ;;  %v4392_v14 = vadd.f32 %v4244_v12, %v2359_v38  ;;  %v4395_v34 = vadd.f32 %v4248_v45, %v2494_v46  ;;  %v4398_v18 = vadd.f32 %v4252_v2, %v2629_v57  ;;  %v4400_v61 = vpop.f32.mrb[24].mxu1  ;;  %v5981_v37 = vld [vmem:[#allocation23_spill] sm:$0xff]  ;;  %v5993_v57 = vld [vmem:[#allocation84_spill] sm:$0xff] }
 0x5e2   :  { %v1668_v27 = vmul.f32 %v4303_v7, %v1292_v36  ;;  %v1804_v31 = vmul.f32 %v4306_v4, %v1292_v36  ;;  %v1939_v9 = vmul.f32 %v4309_v6, %v1292_v36  ;;  %v2074_v10 = vmul.f32 %v4312_v30, %v1292_v36  ;;  %v4406_v32 = vpop.f32.mrb[25].mxu1  ;;  %v5991_v38 = vld [vmem:[#allocation83_spill] sm:$0xff] }
 0x5e3   :  { %5977 = vst [vmem:[#allocation33_spill] sm:$0xff] %v4389_v42  ;;  %5978 = vst [vmem:[#allocation95_spill] sm:$0xff] %v4392_v14  ;;  %v2209_v11 = vmul.f32 %v4315_v58, %v1292_v36  ;;  %v2344_v45 = vmul.f32 %v4318_v26, %v1292_v36  ;;  %v2479_v12 = vmul.f32 %v4321_v8, %v1292_v36  ;;  %v2123_v14 = vstv %s4708_s12  ;;  %s5104_s12 = sld [smem:[#allocation2 + $0x47]] }
 0x5e4   :  { %5979 = vst [vmem:[#allocation96_spill] sm:$0xff] %v4395_v34  ;;  %5980 = vst [vmem:[#allocation97_spill] sm:$0xff] %v4398_v18  ;;  %v2614_v2 = vmul.f32 %v4324_v3, %v1292_v36  ;;  %v1672_v1 = vadd.f32 %v1668_v27, %v3885_v39  ;;  %v1808_v53 = vadd.f32 %v1804_v31, %v3888_v48  ;;  %v5995_v31 = vld [vmem:[#allocation85_spill] sm:$0xff]  ;;  %v6080_v18 = vld [vmem:[#allocation22_spill] sm:$0xff]  ;;  %v1873_v34 = vstv %s4596_s30  ;;  %s4980_s30 = sld [smem:[#allocation2 + $0x5e]] }
 0x5e5   :  { %v1943_v20 = vadd.f32 %v1939_v9, %v3891_v51  ;;  %v2078_v13 = vadd.f32 %v2074_v10, %v3894_v43  ;;  %v2213_v63 = vadd.f32 %v2209_v11, %v3899_v62  ;;  %v2348_v60 = vadd.f32 %v2344_v45, %v3902_v33 }
 0x5e6   :  { %v2483_v56 = vadd.f32 %v2479_v12, %v3905_v28  ;;  %v2618_v55 = vadd.f32 %v2614_v2, %v3908_v29  ;;  %v1682_v24 = vadd.f32 %v4120_v59, %v1672_v1  ;;  %v1818_v36 = vadd.f32 %v4124_v35, %v1808_v53  ;;  %v5986_v29 = vld [vmem:[#allocation79_spill] sm:$0xff]  ;;  %v5987_v59 = vld [vmem:[#allocation80_spill] sm:$0xff] }
 0x5e7   :  { %v1953_v39 = vadd.f32 %v4128_v22, %v1943_v20  ;;  %v2088_v48 = vadd.f32 %v4132_v21, %v2078_v13  ;;  %v2223_v51 = vadd.f32 %v5981_v37, %v2213_v63  ;;  %v2358_v43 = vadd.f32 %v5982_v15, %v2348_v60  ;;  %v5988_v22 = vld [vmem:[#allocation81_spill] sm:$0xff]  ;;  %v5989_v21 = vld [vmem:[#allocation82_spill] sm:$0xff]  ;;  %v5997_v13 = vld [vmem:[#allocation36_spill] sm:$0xff] }
 0x5e8   :  { %v2493_v62 = vadd.f32 %v5983_v23, %v2483_v56  ;;  %v2628_v33 = vadd.f32 %v5984_v25, %v2618_v55  ;;  %v4429_v28 = vadd.f32 %v5985_v52, %v1682_v24  ;;  %v4432_v41 = vadd.f32 %v5986_v29, %v1818_v36  ;;  %v5998_v60 = vld [vmem:[#allocation37_spill] sm:$0xff]  ;;  %v5999_v55 = vld [vmem:[#allocation38_spill] sm:$0xff]  ;;  %v6000_v36 = vld [vmem:[#allocation39_spill] sm:$0xff] }
 0x5e9   :  { %v4435_v35 = vadd.f32 %v5987_v59, %v1953_v39  ;;  %v4438_v40 = vadd.f32 %v5988_v22, %v2088_v48  ;;  %v4441_v5 = vadd.f32 %v5989_v21, %v2223_v51  ;;  %v4444_v46 = vadd.f32 %v5991_v38, %v2358_v43  ;;  %v6001_v48 = vld [vmem:[#allocation40_spill] sm:$0xff]  ;;  %v6002_v51 = vld [vmem:[#allocation41_spill] sm:$0xff]  ;;  %v6003_v43 = vld [vmem:[#allocation42_spill] sm:$0xff] }
 0x5ea   :  { %v4447_v27 = vadd.f32 %v5993_v57, %v2493_v62  ;;  %v4450_v9 = vadd.f32 %v5995_v31, %v2628_v33  ;;  %v1671_v10 = vmul.f32 %v3169_v44, %v4303_v7  ;;  %v1807_v11 = vmul.f32 %v3169_v44, %v4306_v4  ;;  %v6004_v62 = vld [vmem:[#allocation43_spill] sm:$0xff]  ;;  %v6007_v59 = vld [vmem:[#allocation64_spill] sm:$0xff]  ;;  %v6008_v21 = vld [vmem:[#allocation65_spill] sm:$0xff] }
 0x5eb   :  { %5990 = vst [vmem:[#allocation23_spill] sm:$0xff] %v4441_v5  ;;  %5992 = vst [vmem:[#allocation25_spill] sm:$0xff] %v4444_v46  ;;  %v1942_v45 = vmul.f32 %v3169_v44, %v4309_v6  ;;  %v2077_v12 = vmul.f32 %v3169_v44, %v4312_v30  ;;  %v2212_v2 = vmul.f32 %v3169_v44, %v4315_v58  ;;  %v6005_v33 = vld [vmem:[#allocation27_spill] sm:$0xff]  ;;  %v6009_v57 = vld [vmem:[#allocation74_spill] sm:$0xff]  ;;  %v1883_v5 = vstv %s4820_s18  ;;  %s5152_s18 = sld [smem:[#allocation2 + $0x5f]] }
 0x5ec   :  { %5994 = vst [vmem:[#allocation61_spill] sm:$0xff] %v4447_v27  ;;  %5996 = vst [vmem:[#allocation62_spill] sm:$0xff] %v4450_v9  ;;  %v2347_v1 = vmul.f32 %v3169_v44, %v4318_v26  ;;  %v2482_v53 = vmul.f32 %v3169_v44, %v4321_v8  ;;  %v2617_v20 = vmul.f32 %v3169_v44, %v4324_v3  ;;  %v6006_v29 = vld [vmem:[#allocation63_spill] sm:$0xff]  ;;  %v2008_v27 = vstv %s4598_s4  ;;  %s5054_s4 = sld [smem:[#allocation2 + $0x41]] }
 0x5ed   :  { %v1675_v63 = vadd.f32 %v1671_v10, %v5997_v13  ;;  %v1811_v56 = vadd.f32 %v1807_v11, %v5998_v60  ;;  %v1946_v24 = vadd.f32 %v1942_v45, %v5999_v55  ;;  %v2081_v39 = vadd.f32 %v2077_v12, %v6000_v36  ;;  %v6010_v10 = vld [vmem:[#allocation75_spill] sm:$0xff]  ;;  %v6011_v45 = vld [vmem:[#allocation76_spill] sm:$0xff]  ;;  %v6013_v13 = vld [vmem:[#allocation86_spill] sm:$0xff] }
 0x5ee   :  { %v2216_v37 = vadd.f32 %v2212_v2, %v6001_v48  ;;  %v2351_v15 = vadd.f32 %v2347_v1, %v6002_v51  ;;  %v2486_v23 = vadd.f32 %v2482_v53, %v6003_v43  ;;  %v2621_v25 = vadd.f32 %v2617_v20, %v6004_v62  ;;  %v6012_v2 = vld [vmem:[#allocation77_spill] sm:$0xff]  ;;  %v6014_v20 = vld [vmem:[#allocation87_spill] sm:$0xff]  ;;  %v6018_v36 = vld [vmem:[#allocation90_spill] sm:$0xff] }
 0x5ef   :  { %v1685_v52 = vadd.f32 %v6005_v33, %v1675_v63  ;;  %v1821_v44 = vadd.f32 %v6006_v29, %v1811_v56  ;;  %v1956_v22 = vadd.f32 %v6007_v59, %v1946_v24  ;;  %v2091_v38 = vadd.f32 %v6008_v21, %v2081_v39  ;;  %v6015_v63 = vld [vmem:[#allocation88_spill] sm:$0xff]  ;;  %v6016_v55 = vld [vmem:[#allocation89_spill] sm:$0xff]  ;;  %v6020_v48 = vld [vmem:[#allocation91_spill] sm:$0xff] }
 0x5f0   :  { %v2226_v31 = vadd.f32 %v6009_v57, %v2216_v37  ;;  %v2361_v11 = vadd.f32 %v6010_v10, %v2351_v15  ;;  %v2496_v12 = vadd.f32 %v6011_v45, %v2486_v23  ;;  %v2631_v1 = vadd.f32 %v6012_v2, %v2621_v25  ;;  %v6022_v51 = vld [vmem:[#allocation92_spill] sm:$0xff]  ;;  %v6024_v43 = vld [vmem:[#allocation93_spill] sm:$0xff]  ;;  %v6033_v2 = vld [vmem:[#allocation51_spill] sm:$0xff] }
 0x5f1   :  { %v4477_v53 = vadd.f32 %v6013_v13, %v1685_v52  ;;  %v4480_v60 = vadd.f32 %v6014_v20, %v1821_v44  ;;  %v4483_v56 = vadd.f32 %v6015_v63, %v1956_v22  ;;  %v4486_v24 = vadd.f32 %v6016_v55, %v2091_v38  ;;  %v6026_v22 = vld [vmem:[#allocation44_spill] sm:$0xff]  ;;  %v6027_v21 = vld [vmem:[#allocation45_spill] sm:$0xff]  ;;  %v6036_v13 = vld [vmem:[#allocation10_spill] sm:$0xff] }
 0x5f2   :  { %v4489_v39 = vadd.f32 %v6018_v36, %v2226_v31  ;;  %v4492_v37 = vadd.f32 %v6020_v48, %v2361_v11  ;;  %v4495_v15 = vadd.f32 %v6022_v51, %v2496_v12  ;;  %v4498_v23 = vadd.f32 %v6024_v43, %v2631_v1  ;;  %v6029_v31 = vld [vmem:[#allocation47_spill] sm:$0xff]  ;;  %v6030_v10 = vld [vmem:[#allocation48_spill] sm:$0xff]  ;;  %v6032_v12 = vld [vmem:[#allocation50_spill] sm:$0xff] }
 0x5f3   :  { %6017 = vst [vmem:[#allocation78_spill] sm:$0xff] %v4486_v24  ;;  %v1670_v62 = vmul.f32 %v4303_v7, %v4366_v19  ;;  %v1806_v25 = vmul.f32 %v4306_v4, %v4366_v19  ;;  %v1941_v33 = vmul.f32 %v4309_v6, %v4366_v19  ;;  %v2076_v52 = vmul.f32 %v4312_v30, %v4366_v19  ;;  %v6028_v6 = vld [vmem:[#allocation46_spill] sm:$0xff]  ;;  %v6037_v63 = vld [vmem:[#allocation11_spill] sm:$0xff]  ;;  %v6039_v36 = vld [vmem:[#allocation56_spill] sm:$0xff] }
 0x5f4   :  { %6019 = vst [vmem:[#allocation79_spill] sm:$0xff] %v4489_v39  ;;  %6021 = vst [vmem:[#allocation80_spill] sm:$0xff] %v4492_v37  ;;  %v2211_v29 = vmul.f32 %v4315_v58, %v4366_v19  ;;  %v2346_v44 = vmul.f32 %v4318_v26, %v4366_v19  ;;  %v2481_v59 = vmul.f32 %v4321_v8, %v4366_v19  ;;  %v6031_v58 = vld [vmem:[#allocation49_spill] sm:$0xff]  ;;  %v6141_v39 = vld [vmem:[#allocation35_spill] sm:$0xff] }
 0x5f5   :  { %6023 = vst [vmem:[#allocation81_spill] sm:$0xff] %v4495_v15  ;;  %6025 = vst [vmem:[#allocation82_spill] sm:$0xff] %v4498_v23  ;;  %v2616_v7 = vmul.f32 %v4324_v3, %v4366_v19  ;;  %v1674_v4 = vadd.f32 %v1670_v62, %v6026_v22  ;;  %v1810_v38 = vadd.f32 %v1806_v25, %v6027_v21  ;;  %v6035_v19 = vld [vmem:[#allocation29_spill] sm:$0xff]  ;;  %v6041_v62 = vld [vmem:[#allocation58_spill] sm:$0xff] }
 0x5f6   :  { %v1945_v57 = vadd.f32 %v1941_v33, %v6028_v6  ;;  %v2080_v30 = vadd.f32 %v2076_v52, %v6029_v31  ;;  %v2215_v11 = vadd.f32 %v2211_v29, %v6030_v10  ;;  %v2350_v45 = vadd.f32 %v2346_v44, %v6031_v58  ;;  %v6040_v51 = vld [vmem:[#allocation57_spill] sm:$0xff]  ;;  %v6042_v33 = vld [vmem:[#allocation59_spill] sm:$0xff]  ;;  %v6043_v29 = vld [vmem:[#allocation60_spill] sm:$0xff] }
 0x5f7   :  { %v2485_v26 = vadd.f32 %v2481_v59, %v6032_v12  ;;  %v2620_v1 = vadd.f32 %v2616_v7, %v6033_v2  ;;  %v3303_v8 = vpack.c.bf16 %v4400_v61, %v4406_v32  ;;  %v1680_v20 = vmul.f32 %v6036_v13, %v6035_v19  ;;  %v6038_v61 = vld [vmem:[#allocation55_spill] sm:$0xff]  ;;  %v6044_v59 = vld [vmem:[#allocation12_spill] sm:$0xff]  ;;  %v6047_v21 = vld [vmem:[#allocation66_spill] sm:$0xff] }
 0x5f8   :  { %v1816_v55 = vmul.f32 %v6037_v63, %v6035_v19  ;;  %v1951_v32 = vmul.f32 %v6038_v61, %v6035_v19  ;;  %v2086_v48 = vmul.f32 %v6039_v36, %v6035_v19  ;;  %v2221_v43 = vmul.f32 %v6040_v51, %v6035_v19  ;;  %v6045_v7 = vld [vmem:[#allocation16_spill] sm:$0xff]  ;;  %v6048_v31 = vld [vmem:[#allocation67_spill] sm:$0xff]  ;;  %v6050_v2 = vld [vmem:[#allocation13_spill] sm:$0xff] }
 0x5f9   :  { %3305 = vmatprep.subr.msk.bf16.mxu0 %vm3431_vm10, %v3303_v8  ;;  %3311 = vmatprep.subr.msk.bf16.mxu1 %vm3431_vm10, %v3303_v8  ;;  %v2356_v25 = vmul.f32 %v6041_v62, %v6035_v19  ;;  %v2491_v52 = vmul.f32 %v6042_v33, %v6035_v19  ;;  %v2626_v44 = vmul.f32 %v6043_v29, %v6035_v19  ;;  %v6046_v22 = vld [vmem:[#allocation52_spill] sm:$0xff]  ;;  %v6052_v3 = vld [vmem:[#allocation69_spill] sm:$0xff]  ;;  %v6053_v13 = vld [vmem:[#allocation70_spill] sm:$0xff] }
 0x5fa   :  { %3308 = vmatpush3.bf16.msk.msra.mxu0 %vm3431_vm10, %v3303_v8  ;;  %3314 = vmatpush3.bf16.msk.msra.mxu1 %vm3431_vm10, %v3303_v8  ;;  %v1690_v6 = vmul.f32 %v6047_v21, %v6046_v22  ;;  %v1826_v10 = vmul.f32 %v6048_v31, %v6046_v22  ;;  %v6049_v58 = vld [vmem:[#allocation68_spill] sm:$0xff]  ;;  %v6051_v8 = vld [vmem:[#allocation17_spill] sm:$0xff]  ;;  %v2096_v19 = vmul.f32 %v6052_v3, %v6046_v22  ;;  %v6054_v61 = vld [vmem:[#allocation71_spill] sm:$0xff] }
 0x5fb   :  { %v1961_v12 = vmul.f32 %v6049_v58, %v6046_v22  ;;  %v2231_v63 = vmul.f32 %v6053_v13, %v6046_v22  ;;  %v2366_v36 = vmul.f32 %v6054_v61, %v6046_v22  ;;  %v6055_v51 = vld [vmem:[#allocation72_spill] sm:$0xff]  ;;  %v6056_v33 = vld [vmem:[#allocation73_spill] sm:$0xff]  ;;  %v1955_v21 = vadd.f32 %v1951_v32, %v1945_v57  ;;  %v6057_v31 = vld [vmem:[#allocation14_spill] sm:$0xff] }
 0x5fc   :  { %v2501_v62 = vmul.f32 %v6055_v51, %v6046_v22  ;;  %v2636_v29 = vmul.f32 %v6056_v33, %v6046_v22  ;;  %v6058_v58 = vld [vmem:[#allocation18_spill] sm:$0xff]  ;;  %v2360_v3 = vadd.f32 %v2356_v25, %v2350_v45  ;;  %v2495_v23 = vadd.f32 %v2491_v52, %v2485_v26 }
 0x5fd   :  { %3192 = vmatmul.mubr.msk.f32.vlgmr.msra.gmra.mrb[26].mxu0 %vm88_vm5, %v6044_v59  ;;  %3202 = vmatmul.mubr.msk.f32.vlgmr.msra.gmra.mrb[26].mxu1 %vm88_vm5, %v6045_v7  ;;  %v1684_v59 = vadd.f32 %v1680_v20, %v1674_v4  ;;  %v1820_v7 = vadd.f32 %v1816_v55, %v1810_v38  ;;  %v4582_v51 = vadd.f32 %v1961_v12, %v1955_v21  ;;  %v1978_v45 = vstv %s2854_s23  ;;  %s4938_s23 = sld [smem:[#allocation2 + $0x42]] }
 0x5fe   :  { %3194 = vmatprep.mubr.msk.f32.mxu0 %vm88_vm5, %v6050_v2  ;;  %3204 = vmatprep.mubr.msk.f32.mxu1 %vm88_vm5, %v6051_v8  ;;  %v2090_v2 = vadd.f32 %v2086_v48, %v2080_v30  ;;  %v2225_v8 = vadd.f32 %v2221_v43, %v2215_v11  ;;  %v4588_v38 = vadd.f32 %v2366_v36, %v2360_v3  ;;  %v1707_v30 = vstv %s2824_s21  ;;  %v6064_v43 = vld [vmem:[#allocation19_spill] sm:$0xff]  ;;  %v6069_v36 = vld [vmem:[#allocation20_spill] sm:$0xff]  ;;  %s4858_s21 = sld [smem:[#allocation2 + $0x3b]] }
 0x5ff   :  { %v4578_v13 = vadd.f32 %v1690_v6, %v1684_v59  ;;  %v4580_v61 = vadd.f32 %v1826_v10, %v1820_v7  ;;  %v2630_v57 = vadd.f32 %v2626_v44, %v2620_v1  ;;  %v4590_v20 = vadd.f32 %v2501_v62, %v2495_v23 }
 0x600   :  { %v4584_v22 = vadd.f32 %v2096_v19, %v2090_v2  ;;  %v4586_v4 = vadd.f32 %v2231_v63, %v2225_v8  ;;  %6061 = vst [vmem:[#allocation85_spill] sm:$0xff] %v4588_v38  ;;  %v1843_v11 = vstv %s2837_s22  ;;  %v2113_v26 = vstv %s2871_s24  ;;  %v6074_v2 = vld [vmem:[#allocation21_spill] sm:$0xff]  ;;  %s4860_s22 = sld [smem:[#allocation2 + $0x3f]]  ;;  %s4940_s24 = sld [smem:[#allocation2 + $0x46]] }
 0x601   :  { %3195 = vmatmul.mubr.msk.f32.gmra.mrb[28].mxu0 %vm88_vm5, %v6057_v31  ;;  %3205 = vmatmul.mubr.msk.f32.gmra.mrb[28].mxu1 %vm88_vm5, %v6058_v58  ;;  %6062 = vst [vmem:[#allocation36_spill] sm:$0xff] %v4590_v20  ;;  %v4592_v55 = vadd.f32 %v2636_v29, %v2630_v57  ;;  %v2248_v23 = vstv %s2888_s25  ;;  %v2383_v1 = vstv %s2905_s26  ;;  %v2518_v32 = vstv %s2922_s27  ;;  %s4946_s25 = sld [smem:[#allocation2 + $0x4a]]  ;;  %s4948_s26 = sld [smem:[#allocation2 + $0x4e]] }
 0x602   :  { %6059 = vst [vmem:[#allocation83_spill] sm:$0xff] %v4584_v22  ;;  %6060 = vst [vmem:[#allocation84_spill] sm:$0xff] %v4586_v4  ;;  %v2653_v48 = vstv %s2939_s28  ;;  %v4607_v25 = vmul.f32 %v6064_v43, %v1707_v30  ;;  %v4610_v52 = vmul.f32 %v6064_v43, %v1843_v11  ;;  %v4613_v44 = vmul.f32 %v6064_v43, %v1978_v45  ;;  %s4962_s27 = sld [smem:[#allocation2 + $0x52]]  ;;  %s4964_s28 = sld [smem:[#allocation2 + $0x56]] }
 0x603   :  { %6063 = vst [vmem:[#allocation37_spill] sm:$0xff] %v4592_v55  ;;  %v4616_v6 = vmul.f32 %v6064_v43, %v2113_v26  ;;  %v4623_v10 = vmul.f32 %v6064_v43, %v2248_v23  ;;  %v4626_v12 = vmul.f32 %v6064_v43, %v2383_v1  ;;  %v4629_v19 = vmul.f32 %v6064_v43, %v2518_v32 }
 0x604   :  { %v4632_v63 = vmul.f32 %v6064_v43, %v2653_v48  ;;  %v4635_v62 = vmul.f32 %v1707_v30, %v6069_v36  ;;  %v4638_v33 = vmul.f32 %v1843_v11, %v6069_v36  ;;  %v4641_v29 = vmul.f32 %v1978_v45, %v6069_v36 }
 0x605   :  { %6065 = vst [vmem:[#allocation38_spill] sm:$0xff] %v4623_v10  ;;  %6066 = vst [vmem:[#allocation39_spill] sm:$0xff] %v4626_v12  ;;  %v4644_v59 = vmul.f32 %v2113_v26, %v6069_v36  ;;  %v4647_v7 = vmul.f32 %v2248_v23, %v6069_v36  ;;  %v4650_v21 = vmul.f32 %v2383_v1, %v6069_v36  ;;  %v1737_v20 = vstv %s4594_s29  ;;  %s4978_s29 = sld [smem:[#allocation2 + $0x5a]] }
 0x606   :  { %6067 = vst [vmem:[#allocation40_spill] sm:$0xff] %v4629_v19  ;;  %6068 = vst [vmem:[#allocation41_spill] sm:$0xff] %v4632_v63  ;;  %v4653_v31 = vmul.f32 %v2518_v32, %v6069_v36  ;;  %v4656_v58 = vmul.f32 %v2653_v48, %v6069_v36  ;;  %v4659_v8 = vmul.f32 %v6074_v2, %v1707_v30 }
 0x607   :  { %6070 = vst [vmem:[#allocation42_spill] sm:$0xff] %v4647_v7  ;;  %6071 = vst [vmem:[#allocation43_spill] sm:$0xff] %v4650_v21  ;;  %v4662_v3 = vmul.f32 %v6074_v2, %v1843_v11  ;;  %v4665_v57 = vmul.f32 %v6074_v2, %v1978_v45  ;;  %v4668_v43 = vmul.f32 %v6074_v2, %v2113_v26  ;;  %v6086_v21 = vld [vmem:[#allocation24_spill] sm:$0xff] }
 0x608   :  { %6072 = vst [vmem:[#allocation27_spill] sm:$0xff] %v4653_v31  ;;  %6073 = vst [vmem:[#allocation63_spill] sm:$0xff] %v4656_v58  ;;  %v4671_v63 = vmul.f32 %v6074_v2, %v2248_v23  ;;  %v4674_v36 = vmul.f32 %v6074_v2, %v2383_v1  ;;  %v4677_v58 = vmul.f32 %v6074_v2, %v2518_v32 }
 0x609   :  { %6075 = vst [vmem:[#allocation64_spill] sm:$0xff] %v4668_v43  ;;  %v4680_v55 = vmul.f32 %v6074_v2, %v2653_v48  ;;  %v4683_v9 = vmul.f32 %v1707_v30, %v6080_v18  ;;  %v4686_v19 = vmul.f32 %v1843_v11, %v6080_v18  ;;  %v4689_v31 = vmul.f32 %v1978_v45, %v6080_v18 }
 0x60a   :  { %6076 = vst [vmem:[#allocation65_spill] sm:$0xff] %v4671_v63  ;;  %6077 = vst [vmem:[#allocation74_spill] sm:$0xff] %v4674_v36  ;;  %v4692_v15 = vmul.f32 %v2113_v26, %v6080_v18  ;;  %v2143_v36 = vstv %s4600_s5  ;;  %v2278_v2 = vstv %s4602_s2  ;;  %v2413_v30 = vstv %s4604_s6  ;;  %v6134_v63 = vld [vmem:[#allocation34_spill] sm:$0xff]  ;;  %s5056_s5 = sld [smem:[#allocation2 + $0x45]]  ;;  %s5062_s2 = sld [smem:[#allocation2 + $0x49]] }
 0x60b   :  { %6078 = vst [vmem:[#allocation75_spill] sm:$0xff] %v4677_v58  ;;  %6079 = vst [vmem:[#allocation76_spill] sm:$0xff] %v4680_v55  ;;  %v2548_v55 = vstv %s4618_s7  ;;  %v2683_v58 = vstv %s4620_s8  ;;  %v4711_v11 = vmul.f32 %v2248_v23, %v6080_v18  ;;  %v4714_v45 = vmul.f32 %v2383_v1, %v6080_v18  ;;  %s5064_s6 = sld [smem:[#allocation2 + $0x4d]]  ;;  %s5070_s7 = sld [smem:[#allocation2 + $0x51]] }
 0x60c   :  { %6081 = vst [vmem:[#allocation77_spill] sm:$0xff] %v4692_v15  ;;  %v4717_v26 = vmul.f32 %v2518_v32, %v6080_v18  ;;  %v4720_v12 = vmul.f32 %v2653_v48, %v6080_v18  ;;  %v4727_v37 = vmul.f32 %v6086_v21, %v1737_v20  ;;  %v4730_v38 = vmul.f32 %v6086_v21, %v1873_v34  ;;  %s5072_s8 = sld [smem:[#allocation2 + $0x55]] }
 0x60d   :  { %6082 = vst [vmem:[#allocation86_spill] sm:$0xff] %v4711_v11  ;;  %6083 = vst [vmem:[#allocation87_spill] sm:$0xff] %v4714_v45  ;;  %v4733_v23 = vmul.f32 %v6086_v21, %v2008_v27  ;;  %v4736_v1 = vmul.f32 %v6086_v21, %v2143_v36  ;;  %v4743_v18 = vmul.f32 %v6086_v21, %v2278_v2  ;;  %v1988_v45 = vstv %s4706_s11  ;;  %s5102_s11 = sld [smem:[#allocation2 + $0x43]] }
 0x60e   :  { %6084 = vst [vmem:[#allocation88_spill] sm:$0xff] %v4717_v26  ;;  %6085 = vst [vmem:[#allocation89_spill] sm:$0xff] %v4720_v12  ;;  %v4746_v32 = vmul.f32 %v6086_v21, %v2413_v30  ;;  %v4749_v48 = vmul.f32 %v6086_v21, %v2548_v55  ;;  %v1853_v26 = vstv %s4700_s10  ;;  %v4929_v42 = vmul.f32 %v1988_v45, %v6141_v39  ;;  %s5088_s10 = sld [smem:[#allocation2 + $0x5d]] }
 0x60f   :  { %6087 = vst [vmem:[#allocation90_spill] sm:$0xff] %v4727_v37  ;;  %6088 = vst [vmem:[#allocation91_spill] sm:$0xff] %v4730_v38  ;;  %v4752_v38 = vmul.f32 %v6086_v21, %v2683_v58  ;;  %v4902_v10 = vmul.f32 %v6134_v63, %v1853_v26  ;;  %v2018_v43 = vstv %s4826_s19  ;;  %v2153_v15 = vstv %s4828_s20 }
 0x610   :  { %6089 = vst [vmem:[#allocation92_spill] sm:$0xff] %v4733_v23  ;;  %6090 = vst [vmem:[#allocation93_spill] sm:$0xff] %v4736_v1  ;;  %v6095_v23 = vld [vmem:[#allocation26_spill] sm:$0xff] }
 0x611   :  { %6091 = vst [vmem:[#allocation44_spill] sm:$0xff] %v4743_v18  ;;  %6092 = vst [vmem:[#allocation45_spill] sm:$0xff] %v4746_v32  ;;  %v4755_v37 = vmul.f32 %v1737_v20, %v6095_v23  ;;  %v4758_v1 = vmul.f32 %v1873_v34, %v6095_v23  ;;  %v4761_v12 = vmul.f32 %v2008_v27, %v6095_v23 }
 0x612   :  { %6093 = vst [vmem:[#allocation46_spill] sm:$0xff] %v4749_v48  ;;  %6094 = vst [vmem:[#allocation47_spill] sm:$0xff] %v4752_v38  ;;  %v4764_v18 = vmul.f32 %v2143_v36, %v6095_v23  ;;  %v4767_v32 = vmul.f32 %v2278_v2, %v6095_v23  ;;  %v4770_v48 = vmul.f32 %v2413_v30, %v6095_v23 }
 0x613   :  { %6096 = vst [vmem:[#allocation48_spill] sm:$0xff] %v4755_v37  ;;  %6097 = vst [vmem:[#allocation49_spill] sm:$0xff] %v4758_v1  ;;  %v4773_v21 = vmul.f32 %v2548_v55, %v6095_v23  ;;  %v4776_v38 = vmul.f32 %v2683_v58, %v6095_v23  ;;  %v6104_v1 = vld [vmem:[#allocation28_spill] sm:$0xff] }
 0x614   :  { %6098 = vst [vmem:[#allocation50_spill] sm:$0xff] %v4761_v12  ;;  %6099 = vst [vmem:[#allocation51_spill] sm:$0xff] %v4764_v18  ;;  %v4779_v12 = vmul.f32 %v6104_v1, %v1737_v20  ;;  %v4782_v18 = vmul.f32 %v6104_v1, %v1873_v34  ;;  %v4794_v23 = vmul.f32 %v6104_v1, %v2413_v30 }
 0x615   :  { %6100 = vst [vmem:[#allocation9_spill] sm:$0xff] %v4767_v32  ;;  %6101 = vst [vmem:[#allocation29_spill] sm:$0xff] %v4770_v48  ;;  %v4785_v32 = vmul.f32 %v6104_v1, %v2008_v27  ;;  %v4788_v48 = vmul.f32 %v6104_v1, %v2143_v36 }
 0x616   :  { %6102 = vst [vmem:[#allocation10_spill] sm:$0xff] %v4773_v21  ;;  %6103 = vst [vmem:[#allocation11_spill] sm:$0xff] %v4776_v38  ;;  %v4791_v21 = vmul.f32 %v6104_v1, %v2278_v2  ;;  %v4797_v38 = vmul.f32 %v6104_v1, %v2548_v55 }
 0x617   :  { %6105 = vst [vmem:[#allocation55_spill] sm:$0xff] %v4779_v12  ;;  %6106 = vst [vmem:[#allocation56_spill] sm:$0xff] %v4782_v18  ;;  %v4800_v18 = vmul.f32 %v6104_v1, %v2683_v58  ;;  %v2258_v1 = vstv %s4722_s13  ;;  %s5118_s13 = sld [smem:[#allocation2 + $0x4b]] }
 0x618   :  { %6107 = vst [vmem:[#allocation57_spill] sm:$0xff] %v4785_v32  ;;  %6108 = vst [vmem:[#allocation58_spill] sm:$0xff] %v4788_v48  ;;  %v6113_v32 = vld [vmem:[#allocation30_spill] sm:$0xff] }
 0x619   :  { %6109 = vst [vmem:[#allocation59_spill] sm:$0xff] %v4791_v21  ;;  %6110 = vst [vmem:[#allocation60_spill] sm:$0xff] %v4794_v23  ;;  %v4803_v12 = vmul.f32 %v1737_v20, %v6113_v32  ;;  %v4806_v48 = vmul.f32 %v1873_v34, %v6113_v32  ;;  %v4809_v37 = vmul.f32 %v2008_v27, %v6113_v32  ;;  %v1717_v23 = vstv %s4698_s9  ;;  %s5086_s9 = sld [smem:[#allocation2 + $0x59]] }
 0x61a   :  { %6111 = vst [vmem:[#allocation12_spill] sm:$0xff] %v4797_v38  ;;  %6112 = vst [vmem:[#allocation16_spill] sm:$0xff] %v4800_v18  ;;  %v4812_v21 = vmul.f32 %v2143_v36, %v6113_v32  ;;  %v2393_v20 = vstv %s4724_s14  ;;  %v2528_v18 = vstv %s4738_s15  ;;  %v2663_v38 = vstv %s4740_s16  ;;  %s5120_s14 = sld [smem:[#allocation2 + $0x4f]]  ;;  %s5134_s15 = sld [smem:[#allocation2 + $0x53]] }
 0x61b   :  { %6114 = vst [vmem:[#allocation52_spill] sm:$0xff] %v4803_v12  ;;  %6115 = vst [vmem:[#allocation66_spill] sm:$0xff] %v4806_v48  ;;  %v4831_v34 = vmul.f32 %v2278_v2, %v6113_v32  ;;  %v4834_v27 = vmul.f32 %v2413_v30, %v6113_v32  ;;  %v4837_v36 = vmul.f32 %v2548_v55, %v6113_v32  ;;  %s5136_s16 = sld [smem:[#allocation2 + $0x57]] }
 0x61c   :  { %6116 = vst [vmem:[#allocation67_spill] sm:$0xff] %v4809_v37  ;;  %6117 = vst [vmem:[#allocation68_spill] sm:$0xff] %v4812_v21  ;;  %v4840_v21 = vmul.f32 %v2683_v58, %v6113_v32  ;;  %v6122_v37 = vld [vmem:[#allocation31_spill] sm:$0xff]  ;;  %v4899_v11 = vmul.f32 %v6134_v63, %v1717_v23  ;;  %v4920_v7 = vmul.f32 %v6134_v63, %v2663_v38 }
 0x61d   :  { %6118 = vst [vmem:[#allocation13_spill] sm:$0xff] %v4831_v34  ;;  %6119 = vst [vmem:[#allocation17_spill] sm:$0xff] %v4834_v27  ;;  %v4847_v48 = vmul.f32 %v6122_v37, %v1717_v23  ;;  %v4850_v12 = vmul.f32 %v6122_v37, %v1853_v26  ;;  %v4853_v2 = vmul.f32 %v6122_v37, %v1988_v45 }
 0x61e   :  { %6120 = vst [vmem:[#allocation69_spill] sm:$0xff] %v4837_v36  ;;  %6121 = vst [vmem:[#allocation70_spill] sm:$0xff] %v4840_v21  ;;  %v4856_v30 = vmul.f32 %v6122_v37, %v2123_v14  ;;  %v4863_v55 = vmul.f32 %v6122_v37, %v2258_v1  ;;  %v4866_v58 = vmul.f32 %v6122_v37, %v2393_v20  ;;  %v6128_v36 = vld [vmem:[#allocation32_spill] sm:$0xff] }
 0x61f   :  { %v4869_v32 = vmul.f32 %v6122_v37, %v2528_v18  ;;  %v4872_v21 = vmul.f32 %v6122_v37, %v2663_v38  ;;  %v4875_v27 = vmul.f32 %v1717_v23, %v6128_v36  ;;  %v4878_v34 = vmul.f32 %v1853_v26, %v6128_v36  ;;  %6140 = vst [vmem:[#allocation34_spill] sm:$0xff] %v4920_v7 }
 0x620   :  { %6123 = vst [vmem:[#allocation71_spill] sm:$0xff] %v4856_v30  ;;  %6124 = vst [vmem:[#allocation72_spill] sm:$0xff] %v4863_v55  ;;  %v4881_v46 = vmul.f32 %v1988_v45, %v6128_v36  ;;  %v4884_v55 = vmul.f32 %v2123_v14, %v6128_v36  ;;  %v4893_v37 = vmul.f32 %v2528_v18, %v6128_v36  ;;  %v2558_v7 = vstv %s4858_s21  ;;  %v6148_v30 = vld [vmem:[#allocation8_spill] sm:$0xff] }
 0x621   :  { %6125 = vst [vmem:[#allocation73_spill] sm:$0xff] %v4866_v58  ;;  %6126 = vst [vmem:[#allocation14_spill] sm:$0xff] %v4869_v32  ;;  %v4887_v58 = vmul.f32 %v2258_v1, %v6128_v36  ;;  %v4890_v32 = vmul.f32 %v2393_v20, %v6128_v36  ;;  %v4923_v4 = vmul.f32 %v1717_v23, %v6141_v39  ;;  %v2423_v23 = vstv %s4844_s1 }
 0x622   :  { %6127 = vst [vmem:[#allocation18_spill] sm:$0xff] %v4872_v21  ;;  %6129 = vst [vmem:[#allocation19_spill] sm:$0xff] %v4884_v55  ;;  %v4896_v21 = vmul.f32 %v2663_v38, %v6128_v36  ;;  %v4914_v36 = vmul.f32 %v6134_v63, %v2393_v20  ;;  %v4970_v24 = vmul.f32 %v6148_v30, %v1883_v5 }
 0x623   :  { %6130 = vst [vmem:[#allocation20_spill] sm:$0xff] %v4887_v58  ;;  %6131 = vst [vmem:[#allocation21_spill] sm:$0xff] %v4890_v32  ;;  %v4905_v58 = vmul.f32 %v6134_v63, %v1988_v45  ;;  %v4908_v32 = vmul.f32 %v6134_v63, %v2123_v14  ;;  %v4951_v45 = vmul.f32 %v2258_v1, %v6141_v39 }
 0x624   :  { %6132 = vst [vmem:[#allocation22_spill] sm:$0xff] %v4893_v37  ;;  %6133 = vst [vmem:[#allocation24_spill] sm:$0xff] %v4896_v21  ;;  %v4911_v37 = vmul.f32 %v6134_v63, %v2258_v1  ;;  %v4917_v21 = vmul.f32 %v6134_v63, %v2528_v18  ;;  %v2288_v63 = vstv %s4842_s0  ;;  %v4973_v1 = vmul.f32 %v6148_v30, %v2018_v43 }
 0x625   :  { %6135 = vst [vmem:[#allocation26_spill] sm:$0xff] %v4905_v58  ;;  %6136 = vst [vmem:[#allocation28_spill] sm:$0xff] %v4908_v32  ;;  %v4926_v32 = vmul.f32 %v1853_v26, %v6141_v39  ;;  %v4957_v26 = vmul.f32 %v2528_v18, %v6141_v39  ;;  %v4989_v18 = vmul.f32 %v6148_v30, %v2558_v7 }
 0x626   :  { %6137 = vst [vmem:[#allocation30_spill] sm:$0xff] %v4911_v37  ;;  %6138 = vst [vmem:[#allocation31_spill] sm:$0xff] %v4914_v36  ;;  %v4932_v37 = vmul.f32 %v2123_v14, %v6141_v39  ;;  %v1747_v36 = vstv %s4818_s17  ;;  %v4954_v14 = vmul.f32 %v2393_v20, %v6141_v39  ;;  %v4976_v20 = vmul.f32 %v6148_v30, %v2153_v15  ;;  %s5150_s17 = sld [smem:[#allocation2 + $0x5b]] }
 0x627   :  { %6139 = vst [vmem:[#allocation32_spill] sm:$0xff] %v4917_v21  ;;  %6142 = vst [vmem:[#allocation35_spill] sm:$0xff] %v4929_v42  ;;  %v2693_v21 = vstv %s4860_s22  ;;  %v4967_v55 = vmul.f32 %v6148_v30, %v1747_v36 }
 0x628   :  { %6143 = vst [vmem:[#allocation98_spill] sm:$0xff] %v4932_v37  ;;  %6144 = vst [vmem:[#allocation99_spill] sm:$0xff] %v4951_v45  ;;  %v4960_v37 = vmul.f32 %v2663_v38, %v6141_v39  ;;  %v4983_v39 = vmul.f32 %v6148_v30, %v2288_v63  ;;  %v4986_v38 = vmul.f32 %v6148_v30, %v2423_v23 }
 0x629   :  { %6145 = vst [vmem:[#allocation100_spill] sm:$0xff] %v4954_v14  ;;  %6146 = vst [vmem:[#allocation101_spill] sm:$0xff] %v4957_v26  ;;  %v6184_v26 = vld [vmem:[#allocation94_spill] sm:$0xff] }
 0x62a   :  { %6147 = vst [vmem:[#allocation102_spill] sm:$0xff] %v4960_v37  ;;  %6149 = vst [vmem:[#allocation8_spill] sm:$0xff] %v4967_v55 }
 0x62b   :  { %6150 = vst [vmem:[#allocation103_spill] sm:$0xff] %v4970_v24  ;;  %6151 = vst [vmem:[#allocation104_spill] sm:$0xff] %v4973_v1  ;;  %v4992_v24 = vmul.f32 %v6148_v30, %v2693_v21  ;;  %v6157_v1 = vld [vmem:[#allocation15_spill] sm:$0xff] }
 0x62c   :  { %6152 = vst [vmem:[#allocation105_spill] sm:$0xff] %v4976_v20  ;;  %6153 = vst [vmem:[#allocation106_spill] sm:$0xff] %v4983_v39  ;;  %v4995_v55 = vmul.f32 %v1747_v36, %v6157_v1  ;;  %v4998_v20 = vmul.f32 %v1883_v5, %v6157_v1  ;;  %v5001_v37 = vmul.f32 %v2018_v43, %v6157_v1 }
 0x62d   :  { %6154 = vst [vmem:[#allocation107_spill] sm:$0xff] %v4986_v38  ;;  %6155 = vst [vmem:[#allocation108_spill] sm:$0xff] %v4989_v18  ;;  %v5004_v39 = vmul.f32 %v2153_v15, %v6157_v1  ;;  %v5007_v38 = vmul.f32 %v2288_v63, %v6157_v1  ;;  %v5010_v18 = vmul.f32 %v2423_v23, %v6157_v1 }
 0x62e   :  { %6156 = vst [vmem:[#allocation109_spill] sm:$0xff] %v4992_v24  ;;  %6158 = vst [vmem:[#allocation15_spill] sm:$0xff] %v4995_v55  ;;  %v5013_v30 = vmul.f32 %v2558_v7, %v6157_v1  ;;  %v5016_v24 = vmul.f32 %v2693_v21, %v6157_v1 }
 0x62f   :  { %6159 = vst [vmem:[#allocation110_spill] sm:$0xff] %v4998_v20  ;;  %6160 = vst [vmem:[#allocation111_spill] sm:$0xff] %v5001_v37  ;;  %v6166_v20 = vld [vmem:[#allocation53_spill] sm:$0xff] }
 0x630   :  { %6161 = vst [vmem:[#allocation112_spill] sm:$0xff] %v5004_v39  ;;  %6162 = vst [vmem:[#allocation113_spill] sm:$0xff] %v5007_v38  ;;  %v5019_v55 = vmul.f32 %v6166_v20, %v1747_v36  ;;  %v5022_v39 = vmul.f32 %v6166_v20, %v1883_v5  ;;  %v5025_v38 = vmul.f32 %v6166_v20, %v2018_v43 }
 0x631   :  { %6163 = vst [vmem:[#allocation114_spill] sm:$0xff] %v5010_v18  ;;  %6164 = vst [vmem:[#allocation115_spill] sm:$0xff] %v5013_v30  ;;  %v5028_v18 = vmul.f32 %v6166_v20, %v2153_v15  ;;  %v5031_v30 = vmul.f32 %v6166_v20, %v2288_v63  ;;  %v5034_v1 = vmul.f32 %v6166_v20, %v2423_v23 }
 0x632   :  { %6165 = vst [vmem:[#allocation116_spill] sm:$0xff] %v5016_v24  ;;  %6167 = vst [vmem:[#allocation53_spill] sm:$0xff] %v5019_v55  ;;  %v5037_v24 = vmul.f32 %v6166_v20, %v2558_v7  ;;  %v5040_v37 = vmul.f32 %v6166_v20, %v2693_v21  ;;  %v1863_v20 = vstv %s4940_s24  ;;  %v2133_v55 = vstv %s4948_s26 }
 0x633   :  { %6168 = vst [vmem:[#allocation117_spill] sm:$0xff] %v5022_v39  ;;  %6169 = vst [vmem:[#allocation118_spill] sm:$0xff] %v5025_v38  ;;  %v6175_v39 = vld [vmem:[#allocation54_spill] sm:$0xff]  ;;  %v5094_v45 = vmul.f32 %v6184_v26, %v1863_v20 }
 0x634   :  { %6170 = vst [vmem:[#allocation119_spill] sm:$0xff] %v5028_v18  ;;  %6171 = vst [vmem:[#allocation120_spill] sm:$0xff] %v5031_v30  ;;  %v5043_v38 = vmul.f32 %v1747_v36, %v6175_v39  ;;  %v5046_v18 = vmul.f32 %v1883_v5, %v6175_v39  ;;  %v5049_v30 = vmul.f32 %v2018_v43, %v6175_v39  ;;  %v2268_v5 = vstv %s4962_s27 }
 0x635   :  { %6172 = vst [vmem:[#allocation121_spill] sm:$0xff] %v5034_v1  ;;  %6173 = vst [vmem:[#allocation122_spill] sm:$0xff] %v5037_v24  ;;  %v5052_v1 = vmul.f32 %v2153_v15, %v6175_v39  ;;  %v1727_v24 = vstv %s4938_s23  ;;  %v2403_v36 = vstv %s4964_s28  ;;  %v2673_v43 = vstv %s4980_s30 }
 0x636   :  { %6174 = vst [vmem:[#allocation123_spill] sm:$0xff] %v5040_v37  ;;  %6176 = vst [vmem:[#allocation54_spill] sm:$0xff] %v5043_v38  ;;  %v1998_v37 = vstv %s4946_s25  ;;  %v5075_v15 = vmul.f32 %v2288_v63, %v6175_v39  ;;  %v5084_v38 = vmul.f32 %v2693_v21, %v6175_v39  ;;  %v5091_v14 = vmul.f32 %v6184_v26, %v1727_v24 }
 0x637   :  { %6177 = vst [vmem:[#allocation124_spill] sm:$0xff] %v5046_v18  ;;  %6178 = vst [vmem:[#allocation125_spill] sm:$0xff] %v5049_v30  ;;  %v2538_v18 = vstv %s4978_s29  ;;  %v5081_v30 = vmul.f32 %v2558_v7, %v6175_v39  ;;  %v5097_v63 = vmul.f32 %v6184_v26, %v1998_v37  ;;  %v5107_v7 = vmul.f32 %v6184_v26, %v2268_v5 }
 0x638   :  { %6179 = vst [vmem:[#allocation126_spill] sm:$0xff] %v5052_v1  ;;  %6180 = vst [vmem:[#allocation127_spill] sm:$0xff] %v5075_v15  ;;  %v5078_v1 = vmul.f32 %v2423_v23, %v6175_v39  ;;  %v5100_v23 = vmul.f32 %v6184_v26, %v2133_v55  ;;  %v5110_v21 = vmul.f32 %v6184_v26, %v2403_v36 }
 0x639   :  { %6182 = vst [vmem:[#allocation129_spill] sm:$0xff] %v5081_v30  ;;  %6183 = vst [vmem:[#allocation130_spill] sm:$0xff] %v5084_v38  ;;  %v5113_v39 = vmul.f32 %v6184_v26, %v2538_v18  ;;  %v5116_v38 = vmul.f32 %v6184_v26, %v2673_v43  ;;  %v5123_v30 = vmul.f32 %v1727_v24, %v4356_v0 }
 0x63a   :  { %6181 = vst [vmem:[#allocation128_spill] sm:$0xff] %v5078_v1  ;;  %6185 = vst [vmem:[#allocation94_spill] sm:$0xff] %v5091_v14  ;;  %v5126_v1 = vmul.f32 %v1863_v20, %v4356_v0  ;;  %v5129_v15 = vmul.f32 %v1998_v37, %v4356_v0  ;;  %v5139_v26 = vmul.f32 %v2268_v5, %v4356_v0 }
 0x63b   :  { %6186 = vst [vmem:[#allocation131_spill] sm:$0xff] %v5094_v45  ;;  %6187 = vst [vmem:[#allocation132_spill] sm:$0xff] %v5097_v63  ;;  %v5176_v63 = vmul.f32 %v4372_v49, %v2673_v43  ;;  %v5246_v45 = vstv %s5152_s18 }
 0x63c   :  { %6188 = vst [vmem:[#allocation133_spill] sm:$0xff] %v5100_v23  ;;  %6189 = vst [vmem:[#allocation134_spill] sm:$0xff] %v5107_v7  ;;  %v5148_v7 = vmul.f32 %v2673_v43, %v4356_v0  ;;  %v5155_v23 = vmul.f32 %v4372_v49, %v1727_v24 }
 0x63d   :  { %6190 = vst [vmem:[#allocation135_spill] sm:$0xff] %v5110_v21  ;;  %6191 = vst [vmem:[#allocation136_spill] sm:$0xff] %v5113_v39  ;;  %v5132_v21 = vmul.f32 %v2133_v55, %v4356_v0  ;;  %v5145_v39 = vmul.f32 %v2538_v18, %v4356_v0 }
 0x63e   :  { %6192 = vst [vmem:[#allocation137_spill] sm:$0xff] %v5116_v38  ;;  %6193 = vst [vmem:[#allocation138_spill] sm:$0xff] %v5123_v30  ;;  %v5142_v38 = vmul.f32 %v2403_v36, %v4356_v0  ;;  %v5167_v0 = vmul.f32 %v4372_v49, %v2268_v5 }
 0x63f   :  { %6194 = vst [vmem:[#allocation139_spill] sm:$0xff] %v5126_v1  ;;  %6195 = vst [vmem:[#allocation140_spill] sm:$0xff] %v5129_v15  ;;  %v5237_v15 = vstv %s5134_s15 }
 0x640   :  { %6196 = vst [vmem:[#allocation141_spill] sm:$0xff] %v5132_v21  ;;  %6197 = vst [vmem:[#allocation142_spill] sm:$0xff] %v5139_v26  ;;  %v5158_v21 = vmul.f32 %v4372_v49, %v1863_v20  ;;  %v5173_v26 = vmul.f32 %v4372_v49, %v2538_v18 }
 0x641   :  { %6198 = vst [vmem:[#allocation143_spill] sm:$0xff] %v5142_v38  ;;  %6199 = vst [vmem:[#allocation144_spill] sm:$0xff] %v5145_v39  ;;  %v5161_v38 = vmul.f32 %v4372_v49, %v1998_v37  ;;  %v5164_v39 = vmul.f32 %v4372_v49, %v2133_v55 }
 0x642   :  { %6200 = vst [vmem:[#allocation145_spill] sm:$0xff] %v5148_v7  ;;  %6201 = vst [vmem:[#allocation146_spill] sm:$0xff] %v5155_v23  ;;  %v5170_v7 = vmul.f32 %v4372_v49, %v2403_v36  ;;  %v5191_v49 = vmul.f32 %v2268_v5, %v4386_v16  ;;  %v5209_v5 = vstv %s5070_s7 }
 0x643   :  { %6202 = vst [vmem:[#allocation147_spill] sm:$0xff] %v5158_v21  ;;  %6203 = vst [vmem:[#allocation148_spill] sm:$0xff] %v5161_v38  ;;  %v5179_v38 = vmul.f32 %v1727_v24, %v4386_v16  ;;  %v5197_v24 = vmul.f32 %v2538_v18, %v4386_v16  ;;  %v5218_v18 = vstv %s5088_s10  ;;  %v5240_v21 = vstv %s5136_s16 }
 0x644   :  { %6204 = vst [vmem:[#allocation149_spill] sm:$0xff] %v5164_v39  ;;  %6205 = vst [vmem:[#allocation150_spill] sm:$0xff] %v5167_v0  ;;  %v5182_v39 = vmul.f32 %v1863_v20, %v4386_v16  ;;  %v5185_v0 = vmul.f32 %v1998_v37, %v4386_v16  ;;  %v5200_v20 = vmul.f32 %v2673_v43, %v4386_v16  ;;  %v1697_v37 = vstv %s5054_s4 }
 0x645   :  { %6206 = vst [vmem:[#allocation151_spill] sm:$0xff] %v5170_v7  ;;  %6207 = vst [vmem:[#allocation152_spill] sm:$0xff] %v5173_v26  ;;  %v5188_v7 = vmul.f32 %v2133_v55, %v4386_v16  ;;  %v1833_v26 = vstv %s5056_s5  ;;  %v1968_v55 = vstv %s5062_s2  ;;  %v5227_v43 = vstv %s5118_s13 }
 0x646   :  { %6208 = vst [vmem:[#allocation153_spill] sm:$0xff] %v5176_v63  ;;  %6209 = vst [vmem:[#allocation154_spill] sm:$0xff] %v5179_v38  ;;  %v5194_v63 = vmul.f32 %v2403_v36, %v4386_v16  ;;  %v5215_v36 = vstv %s5086_s9  ;;  %v5224_v16 = vstv %s5104_s12 }
 0x647   :  { %6210 = vst [vmem:[#allocation155_spill] sm:$0xff] %v5182_v39  ;;  %6211 = vst [vmem:[#allocation156_spill] sm:$0xff] %v5185_v0  ;;  %v5243_v39 = vstv %s5150_s17 }
 0x648   :  { %6212 = vst [vmem:[#allocation157_spill] sm:$0xff] %v5188_v7  ;;  %6213 = vst [vmem:[#allocation158_spill] sm:$0xff] %v5191_v49  ;;  %v5206_v7 = vstv %s5064_s6  ;;  %v5212_v49 = vstv %s5072_s8 }
 0x649   :  { %6214 = vst [vmem:[#allocation159_spill] sm:$0xff] %v5194_v63  ;;  %6215 = vst [vmem:[#allocation160_spill] sm:$0xff] %v5197_v24  ;;  %v5221_v24 = vstv %s5102_s11 }
 0x64a   :  { %6216 = vst [vmem:[#allocation161_spill] sm:$0xff] %v5200_v20  ;;  %6217 = vst [vmem:[#allocation162_spill] sm:$0xff] %v5212_v49  ;;  %v5230_v20 = vstv %s5120_s14 }
 0x64b   :  { %6218 = vst [vmem:[#allocation163_spill] sm:$0xff] %v5215_v36  ;;  %6219 = vst [vmem:[#allocation164_spill] sm:$0xff] %v5218_v18 }
 0x64c   :  { %6220 = vst [vmem:[#allocation165_spill] sm:$0xff] %v5221_v24  ;;  %6221 = vst [vmem:[#allocation166_spill] sm:$0xff] %v5224_v16 }
 0x64d   :  { %6222 = vst [vmem:[#allocation167_spill] sm:$0xff] %v5227_v43  ;;  %6223 = vst [vmem:[#allocation168_spill] sm:$0xff] %v5230_v20 }
 0x64e   :  { %6225 = vst [vmem:[#allocation170_spill] sm:$0xff] %v5237_v15  ;;  %6226 = vst [vmem:[#allocation171_spill] sm:$0xff] %v5240_v21 }
 0x64f   :  { %6227 = vst [vmem:[#allocation172_spill] sm:$0xff] %v5243_v39  ;;  %6228 = vst [vmem:[#allocation173_spill] sm:$0xff] %v5246_v45 }
 0x6d0   :  { %v5232_v63 = vpop.f32.mrb[26].mxu0  ;;  %v5234_v0 = vpop.f32.mrb[26].mxu1 }
 0x6d1   :  { %6224 = vst [vmem:[#allocation169_spill] sm:$0xff] %v5234_v0  ;;  %v5248_v1 = vpop.f32.mrb[27].mxu0  ;;  %v1699_v16 = vmul.f32 %v5232_v63, %v1697_v37  ;;  %v1835_v43 = vmul.f32 %v5232_v63, %v1833_v26  ;;  %v1970_v20 = vmul.f32 %v5232_v63, %v1968_v55  ;;  %v2105_v24 = vmul.f32 %v5232_v63, %v5206_v7  ;;  %v5255_v0 = vpop.f32.mrb[27].mxu1 }
 0x6d2   :  { %6229 = vst [vmem:[#allocation174_spill] sm:$0xff] %v5255_v0  ;;  %v1698_v15 = vmul.f32 %v1697_v37, %v5248_v1  ;;  %v1834_v21 = vmul.f32 %v1833_v26, %v5248_v1  ;;  %v1969_v39 = vmul.f32 %v1968_v55, %v5248_v1  ;;  %v2104_v45 = vmul.f32 %v5206_v7, %v5248_v1 }
 0x6d3   :  { %v1703_v23 = vadd.f32 %v1699_v16, %v4375_v50  ;;  %v1839_v38 = vadd.f32 %v1835_v43, %v4378_v54  ;;  %v1974_v14 = vadd.f32 %v1970_v20, %v4381_v17  ;;  %v2109_v30 = vadd.f32 %v2105_v24, %v4384_v47  ;;  %v6233_v20 = vld [vmem:[#allocation78_spill] sm:$0xff]  ;;  %v6237_v43 = vld [vmem:[#allocation64_spill] sm:$0xff] }
 0x6d4   :  { %v5266_v18 = vpop.f32.mrb[28].mxu0  ;;  %v1702_v0 = vadd.f32 %v1698_v15, %v4429_v28  ;;  %v1838_v36 = vadd.f32 %v1834_v21, %v4432_v41  ;;  %v1973_v49 = vadd.f32 %v1969_v39, %v4435_v35  ;;  %v2108_v22 = vadd.f32 %v2104_v45, %v4438_v40  ;;  %v5272_v58 = vpop.f32.mrb[28].mxu1 }
 0x6d5   :  { %v5274_v42 = vpop.f32.mrb[29].mxu0  ;;  %v1701_v50 = vmul.f32 %v5266_v18, %v1697_v37  ;;  %v1713_v54 = vadd.f32 %v4607_v25, %v1703_v23  ;;  %v1837_v17 = vmul.f32 %v5266_v18, %v1833_v26  ;;  %v1849_v47 = vadd.f32 %v4610_v52, %v1839_v38  ;;  %v5280_v24 = vpop.f32.mrb[29].mxu1 }
 0x6d6   :  { %v1700_v28 = vmul.f32 %v1697_v37, %v5274_v42  ;;  %v1712_v41 = vadd.f32 %v4635_v62, %v1702_v0  ;;  %v1836_v35 = vmul.f32 %v1833_v26, %v5274_v42  ;;  %v1848_v40 = vadd.f32 %v4638_v33, %v1838_v36  ;;  %v6232_v0 = vld [vmem:[#allocation83_spill] sm:$0xff]  ;;  %v6236_v36 = vld [vmem:[#allocation77_spill] sm:$0xff] }
 0x6d7   :  { %v1705_v45 = vadd.f32 %v1701_v50, %v4477_v53  ;;  %v5288_v15 = vadd.f32 %v4847_v48, %v1713_v54  ;;  %v1841_v25 = vadd.f32 %v1837_v17, %v4480_v60  ;;  %v5292_v23 = vadd.f32 %v4850_v12, %v1849_v47  ;;  %v6234_v37 = vld [vmem:[#allocation19_spill] sm:$0xff]  ;;  %v6239_v47 = vld [vmem:[#allocation33_spill] sm:$0xff] }
 0x6d8   :  { %v1704_v52 = vadd.f32 %v1700_v28, %v4578_v13  ;;  %v5296_v38 = vadd.f32 %v4875_v27, %v1712_v41  ;;  %v1840_v62 = vadd.f32 %v1836_v35, %v4580_v61  ;;  %v5300_v21 = vadd.f32 %v4878_v34, %v1848_v40  ;;  %v6238_v54 = vld [vmem:[#allocation23_spill] sm:$0xff]  ;;  %v6240_v41 = vld [vmem:[#allocation84_spill] sm:$0xff] }
 0x6d9   :  { %v1715_v53 = vadd.f32 %v4659_v8, %v1705_v45  ;;  %v1851_v33 = vadd.f32 %v4662_v3, %v1841_v25  ;;  %v1971_v48 = vmul.f32 %v1968_v55, %v5274_v42  ;;  %v1972_v60 = vmul.f32 %v5266_v18, %v1968_v55  ;;  %v6241_v40 = vld [vmem:[#allocation79_spill] sm:$0xff]  ;;  %v6242_v25 = vld [vmem:[#allocation162_spill] sm:$0xff] }
 0x6da   :  { %v1714_v12 = vadd.f32 %v4683_v9, %v1704_v52  ;;  %v1850_v13 = vadd.f32 %v4686_v19, %v1840_v62  ;;  %v1983_v27 = vadd.f32 %v4641_v29, %v1973_v49  ;;  %v1984_v39 = vadd.f32 %v4613_v44, %v1974_v14 }
 0x6db   :  { %v5311_v61 = vadd.f32 %v4899_v11, %v1715_v53  ;;  %v5314_v34 = vadd.f32 %v4902_v10, %v1851_v33  ;;  %v1975_v8 = vadd.f32 %v1971_v48, %v4582_v51  ;;  %v1976_v3 = vadd.f32 %v1972_v60, %v4483_v56  ;;  %v6243_v53 = vld [vmem:[#allocation98_spill] sm:$0xff]  ;;  %v6244_v33 = vld [vmem:[#allocation28_spill] sm:$0xff] }
 0x6dc   :  { %v5319_v26 = vadd.f32 %v4923_v4, %v1714_v12  ;;  %v5322_v9 = vadd.f32 %v4926_v32, %v1850_v13  ;;  %v5325_v19 = vadd.f32 %v4881_v46, %v1983_v27  ;;  %v5328_v44 = vadd.f32 %v4853_v2, %v1984_v39  ;;  %v6230_v32 = vld [vmem:[#allocation35_spill] sm:$0xff]  ;;  %v6245_v60 = vld [vmem:[#allocation42_spill] sm:$0xff] }
 0x6dd   :  { %v1985_v29 = vadd.f32 %v4689_v31, %v1975_v8  ;;  %v1986_v10 = vadd.f32 %v4665_v57, %v1976_v3  ;;  %v2106_v51 = vmul.f32 %v5206_v7, %v5274_v42  ;;  %v2107_v56 = vmul.f32 %v5266_v18, %v5206_v7  ;;  %v6231_v57 = vld [vmem:[#allocation26_spill] sm:$0xff]  ;;  %v6248_v3 = vld [vmem:[#allocation65_spill] sm:$0xff] }
 0x6de   :  { %v2118_v4 = vadd.f32 %v4644_v59, %v2108_v22  ;;  %v2119_v11 = vadd.f32 %v4616_v6, %v2109_v30  ;;  %v2239_v46 = vmul.f32 %v5209_v5, %v5248_v1  ;;  %v2240_v2 = vmul.f32 %v5232_v63, %v5209_v5  ;;  %v6235_v6 = vld [vmem:[#allocation71_spill] sm:$0xff]  ;;  %v6246_v13 = vld [vmem:[#allocation38_spill] sm:$0xff] }
 0x6df   :  { %v5343_v31 = vadd.f32 %v6230_v32, %v1985_v29  ;;  %v5346_v14 = vadd.f32 %v6231_v57, %v1986_v10  ;;  %v2110_v49 = vadd.f32 %v2106_v51, %v6232_v0  ;;  %v2111_v7 = vadd.f32 %v2107_v56, %v6233_v20  ;;  %v6247_v39 = vld [vmem:[#allocation86_spill] sm:$0xff]  ;;  %v6249_v56 = vld [vmem:[#allocation20_spill] sm:$0xff]  ;;  %v6252_v57 = vld [vmem:[#allocation95_spill] sm:$0xff] }
 0x6e0   :  { %v5351_v22 = vadd.f32 %v6234_v37, %v2118_v4  ;;  %v5354_v59 = vadd.f32 %v6235_v6, %v2119_v11  ;;  %v2241_v30 = vmul.f32 %v5209_v5, %v5274_v42  ;;  %v2242_v55 = vmul.f32 %v5266_v18, %v5209_v5  ;;  %v6250_v11 = vld [vmem:[#allocation72_spill] sm:$0xff]  ;;  %v6255_v6 = vld [vmem:[#allocation85_spill] sm:$0xff] }
 0x6e1   :  { %v2120_v16 = vadd.f32 %v6236_v36, %v2110_v49  ;;  %v2121_v50 = vadd.f32 %v6237_v43, %v2111_v7  ;;  %v2243_v17 = vadd.f32 %v2239_v46, %v6238_v54  ;;  %v2244_v28 = vadd.f32 %v2240_v2, %v6239_v47  ;;  %v6251_v2 = vld [vmem:[#allocation25_spill] sm:$0xff]  ;;  %v6253_v49 = vld [vmem:[#allocation99_spill] sm:$0xff]  ;;  %v6254_v7 = vld [vmem:[#allocation30_spill] sm:$0xff] }
 0x6e2   :  { %v2245_v35 = vadd.f32 %v2241_v30, %v6240_v41  ;;  %v2246_v45 = vadd.f32 %v2242_v55, %v6241_v40  ;;  %v2374_v52 = vmul.f32 %v6242_v25, %v5248_v1  ;;  %v2375_v62 = vmul.f32 %v5232_v63, %v6242_v25  ;;  %v6256_v55 = vld [vmem:[#allocation80_spill] sm:$0xff]  ;;  %v6260_v41 = vld [vmem:[#allocation87_spill] sm:$0xff]  ;;  %v6261_v40 = vld [vmem:[#allocation74_spill] sm:$0xff] }
 0x6e3   :  { %v5371_v5 = vadd.f32 %v6243_v53, %v2120_v16  ;;  %v5374_v48 = vadd.f32 %v6244_v33, %v2121_v50  ;;  %v2253_v12 = vadd.f32 %v6245_v60, %v2243_v17  ;;  %v2254_v27 = vadd.f32 %v6246_v13, %v2244_v28  ;;  %v6257_v16 = vld [vmem:[#allocation43_spill] sm:$0xff]  ;;  %v6263_v33 = vld [vmem:[#allocation73_spill] sm:$0xff] }
 0x6e4   :  { %v2255_v8 = vadd.f32 %v6247_v39, %v2245_v35  ;;  %v2256_v29 = vadd.f32 %v6248_v3, %v2246_v45  ;;  %v2376_v10 = vmul.f32 %v6242_v25, %v5274_v42  ;;  %v2377_v51 = vmul.f32 %v5266_v18, %v6242_v25  ;;  %v6258_v50 = vld [vmem:[#allocation39_spill] sm:$0xff] }
 0x6e5   :  { %v5385_v4 = vadd.f32 %v6249_v56, %v2253_v12  ;;  %v5388_v46 = vadd.f32 %v6250_v11, %v2254_v27  ;;  %v2378_v32 = vadd.f32 %v2374_v52, %v6251_v2  ;;  %v2379_v0 = vadd.f32 %v2375_v62, %v6252_v57  ;;  %v6259_v17 = vld [vmem:[#allocation163_spill] sm:$0xff]  ;;  %v6262_v62 = vld [vmem:[#allocation21_spill] sm:$0xff]  ;;  %v6265_v27 = vld [vmem:[#allocation96_spill] sm:$0xff] }
 0x6e6   :  { %v5393_v20 = vadd.f32 %v6253_v49, %v2255_v8  ;;  %v5396_v37 = vadd.f32 %v6254_v7, %v2256_v29  ;;  %v2380_v30 = vadd.f32 %v2376_v10, %v6255_v6  ;;  %v2381_v36 = vadd.f32 %v2377_v51, %v6256_v55  ;;  %v6264_v12 = vld [vmem:[#allocation61_spill] sm:$0xff]  ;;  %v6266_v8 = vld [vmem:[#allocation100_spill] sm:$0xff]  ;;  %v6267_v29 = vld [vmem:[#allocation31_spill] sm:$0xff] }
 0x6e7   :  { %v2388_v43 = vadd.f32 %v6257_v16, %v2378_v32  ;;  %v2389_v54 = vadd.f32 %v6258_v50, %v2379_v0  ;;  %v2509_v47 = vmul.f32 %v6259_v17, %v5248_v1  ;;  %v2510_v28 = vmul.f32 %v5232_v63, %v6259_v17  ;;  %v6268_v51 = vld [vmem:[#allocation36_spill] sm:$0xff]  ;;  %v6269_v11 = vld [vmem:[#allocation81_spill] sm:$0xff]  ;;  %v6270_v32 = vld [vmem:[#allocation27_spill] sm:$0xff] }
 0x6e8   :  { %v2390_v35 = vadd.f32 %v6260_v41, %v2380_v30  ;;  %v2391_v45 = vadd.f32 %v6261_v40, %v2381_v36  ;;  %v2511_v25 = vmul.f32 %v6259_v17, %v5274_v42  ;;  %v2512_v52 = vmul.f32 %v5266_v18, %v6259_v17  ;;  %v6271_v0 = vld [vmem:[#allocation40_spill] sm:$0xff]  ;;  %v6274_v16 = vld [vmem:[#allocation75_spill] sm:$0xff]  ;;  %v6275_v17 = vld [vmem:[#allocation22_spill] sm:$0xff] }
 0x6e9   :  { %v5413_v53 = vadd.f32 %v6262_v62, %v2388_v43  ;;  %v5416_v60 = vadd.f32 %v6263_v33, %v2389_v54  ;;  %v2513_v13 = vadd.f32 %v2509_v47, %v6264_v12  ;;  %v2514_v39 = vadd.f32 %v2510_v28, %v6265_v27  ;;  %v6272_v7 = vld [vmem:[#allocation164_spill] sm:$0xff]  ;;  %v6276_v28 = vld [vmem:[#allocation14_spill] sm:$0xff]  ;;  %v6278_v40 = vld [vmem:[#allocation97_spill] sm:$0xff] }
 0x6ea   :  { %v5421_v3 = vadd.f32 %v6266_v8, %v2390_v35  ;;  %v5424_v10 = vadd.f32 %v6267_v29, %v2391_v45  ;;  %v2515_v56 = vadd.f32 %v2511_v25, %v6268_v51  ;;  %v2516_v2 = vadd.f32 %v2512_v52, %v6269_v11  ;;  %v6273_v55 = vld [vmem:[#allocation88_spill] sm:$0xff]  ;;  %v6279_v45 = vld [vmem:[#allocation101_spill] sm:$0xff]  ;;  %v6282_v12 = vld [vmem:[#allocation82_spill] sm:$0xff] }
 0x6eb   :  { %v2523_v57 = vadd.f32 %v6270_v32, %v2513_v13  ;;  %v2524_v49 = vadd.f32 %v6271_v0, %v2514_v39  ;;  %v2644_v6 = vmul.f32 %v6272_v7, %v5248_v1  ;;  %v2645_v30 = vmul.f32 %v5232_v63, %v6272_v7  ;;  %v6277_v1 = vld [vmem:[#allocation62_spill] sm:$0xff]  ;;  %v6280_v52 = vld [vmem:[#allocation32_spill] sm:$0xff]  ;;  %v6283_v13 = vld [vmem:[#allocation63_spill] sm:$0xff] }
 0x6ec   :  { %v2525_v36 = vadd.f32 %v6273_v55, %v2515_v56  ;;  %v2526_v43 = vadd.f32 %v6274_v16, %v2516_v2  ;;  %v2646_v50 = vmul.f32 %v6272_v7, %v5274_v42  ;;  %v2647_v54 = vmul.f32 %v5266_v18, %v6272_v7  ;;  %v6281_v42 = vld [vmem:[#allocation37_spill] sm:$0xff]  ;;  %v6285_v29 = vld [vmem:[#allocation138_spill] sm:$0xff]  ;;  %v6291_v55 = vld [vmem:[#allocation24_spill] sm:$0xff] }
 0x6ed   :  { %v5441_v47 = vadd.f32 %v6275_v17, %v2523_v57  ;;  %v5444_v41 = vadd.f32 %v6276_v28, %v2524_v49  ;;  %v2648_v35 = vadd.f32 %v2644_v6, %v6277_v1  ;;  %v2649_v63 = vadd.f32 %v2645_v30, %v6278_v40  ;;  %v6284_v39 = vld [vmem:[#allocation41_spill] sm:$0xff]  ;;  %v6286_v56 = vld [vmem:[#allocation94_spill] sm:$0xff]  ;;  %v6288_v57 = vld [vmem:[#allocation76_spill] sm:$0xff] }
 0x6ee   :  { %v5449_v25 = vadd.f32 %v6279_v45, %v2525_v36  ;;  %v5452_v62 = vadd.f32 %v6280_v52, %v2526_v43  ;;  %v2650_v33 = vadd.f32 %v2646_v50, %v6281_v42  ;;  %v2651_v18 = vadd.f32 %v2647_v54, %v6282_v12  ;;  %v6287_v2 = vld [vmem:[#allocation89_spill] sm:$0xff]  ;;  %v6289_v49 = vld [vmem:[#allocation154_spill] sm:$0xff]  ;;  %v6298_v40 = vld [vmem:[#allocation55_spill] sm:$0xff] }
 0x6ef   :  { %v2658_v27 = vadd.f32 %v6283_v13, %v2648_v35  ;;  %v2659_v8 = vadd.f32 %v6284_v39, %v2649_v63  ;;  %v1732_v51 = vadd.f32 %v6285_v29, %v5296_v38  ;;  %v1733_v11 = vadd.f32 %v6286_v56, %v5288_v15  ;;  %v6290_v6 = vld [vmem:[#allocation146_spill] sm:$0xff]  ;;  %v6293_v38 = vld [vmem:[#allocation48_spill] sm:$0xff]  ;;  %v6299_v45 = vld [vmem:[#allocation15_spill] sm:$0xff] }
 0x6f0   :  { %v2660_v32 = vadd.f32 %v6287_v2, %v2650_v33  ;;  %v2661_v0 = vadd.f32 %v6288_v57, %v2651_v18  ;;  %v1734_v7 = vadd.f32 %v6289_v49, %v5319_v26  ;;  %v1735_v30 = vadd.f32 %v6290_v6, %v5311_v61  ;;  %v6292_v16 = vld [vmem:[#allocation18_spill] sm:$0xff]  ;;  %v6297_v35 = vld [vmem:[#allocation52_spill] sm:$0xff]  ;;  %v6302_v18 = vld [vmem:[#allocation165_spill] sm:$0xff] }
 0x6f1   :  { %v5469_v36 = vadd.f32 %v6291_v55, %v2658_v27  ;;  %v5472_v43 = vadd.f32 %v6292_v16, %v2659_v8  ;;  %v1742_v50 = vadd.f32 %v6293_v38, %v1732_v51  ;;  %v6294_v15 = vld [vmem:[#allocation90_spill] sm:$0xff]  ;;  %v6300_v42 = vld [vmem:[#allocation8_spill] sm:$0xff]  ;;  %v6303_v27 = vld [vmem:[#allocation169_spill] sm:$0xff]  ;;  %v1761_v2 = vmul.f32 %v5272_v58, %v6302_v18 }
 0x6f2   :  { %v1743_v54 = vadd.f32 %v6294_v15, %v1733_v11  ;;  %v6295_v17 = vld [vmem:[#allocation102_spill] sm:$0xff]  ;;  %v1744_v61 = vadd.f32 %v6297_v35, %v1734_v7  ;;  %v1745_v63 = vadd.f32 %v6298_v40, %v1735_v30  ;;  %v1759_v39 = vmul.f32 %v6303_v27, %v6302_v18  ;;  %v6305_v51 = vld [vmem:[#allocation53_spill] sm:$0xff]  ;;  %v6307_v7 = vld [vmem:[#allocation131_spill] sm:$0xff] }
 0x6f3   :  { %v5477_v28 = vadd.f32 %v6295_v17, %v2660_v32  ;;  %v6296_v1 = vld [vmem:[#allocation34_spill] sm:$0xff]  ;;  %v1752_v52 = vadd.f32 %v6299_v45, %v1742_v50  ;;  %v1760_v11 = vmul.f32 %v6302_v18, %v5280_v24  ;;  %v1869_v6 = vadd.f32 %v6307_v7, %v5292_v23  ;;  %v6308_v16 = vld [vmem:[#allocation155_spill] sm:$0xff] }
 0x6f4   :  { %v5480_v26 = vadd.f32 %v6296_v1, %v2661_v0  ;;  %v1753_v33 = vadd.f32 %v6300_v42, %v1743_v54  ;;  %v6301_v12 = vld [vmem:[#allocation174_spill] sm:$0xff]  ;;  %v1755_v56 = vadd.f32 %v6305_v51, %v1745_v63  ;;  %v6306_v0 = vld [vmem:[#allocation139_spill] sm:$0xff]  ;;  %v1870_v38 = vadd.f32 %v6308_v16, %v5322_v9  ;;  %v6310_v1 = vld [vmem:[#allocation49_spill] sm:$0xff] }
 0x6f5   :  { %v1758_v13 = vmul.f32 %v6302_v18, %v6301_v12  ;;  %v6304_v8 = vld [vmem:[#allocation54_spill] sm:$0xff]  ;;  %v1868_v49 = vadd.f32 %v6306_v0, %v5300_v21  ;;  %v6309_v50 = vld [vmem:[#allocation147_spill] sm:$0xff]  ;;  %v6313_v42 = vld [vmem:[#allocation56_spill] sm:$0xff] }
 0x6f6   :  { %v1754_v29 = vadd.f32 %v6304_v8, %v1744_v61  ;;  %v1763_v57 = vadd.f32 %v1759_v39, %v1753_v33  ;;  %v1765_v55 = vadd.f32 %v1761_v2, %v1755_v56  ;;  %v1871_v15 = vadd.f32 %v6309_v50, %v5314_v34  ;;  %v6311_v61 = vld [vmem:[#allocation91_spill] sm:$0xff]  ;;  %v6312_v21 = vld [vmem:[#allocation66_spill] sm:$0xff]  ;;  %v6316_v51 = vld [vmem:[#allocation124_spill] sm:$0xff] }
 0x6f7   :  { %v1762_v32 = vadd.f32 %v1758_v13, %v1752_v52  ;;  %v1878_v35 = vadd.f32 %v6310_v1, %v1868_v49  ;;  %v1879_v40 = vadd.f32 %v6311_v61, %v1869_v6  ;;  %v1880_v52 = vadd.f32 %v6312_v21, %v1870_v38  ;;  %v6314_v13 = vld [vmem:[#allocation110_spill] sm:$0xff]  ;;  %v6315_v9 = vld [vmem:[#allocation103_spill] sm:$0xff]  ;;  %v6319_v6 = vld [vmem:[#allocation140_spill] sm:$0xff] }
 0x6f8   :  { %v1764_v30 = vadd.f32 %v1760_v11, %v1754_v29  ;;  %v1767_v17 = vmin.f32 %v1763_v57, 4.048737  ;;  %v1769_v45 = vmin.f32 %v1765_v55, 4.048737  ;;  %v1881_v23 = vadd.f32 %v6313_v42, %v1871_v15  ;;  %v6317_v11 = vld [vmem:[#allocation117_spill] sm:$0xff]  ;;  %v6320_v55 = vld [vmem:[#allocation132_spill] sm:$0xff] }
 0x6f9   :  { %v1766_v54 = vmin.f32 %v1762_v32, 4.048737  ;;  %v1888_v39 = vadd.f32 %v6314_v13, %v1878_v35  ;;  %v1889_v8 = vadd.f32 %v6315_v9, %v1879_v40  ;;  %v1890_v56 = vadd.f32 %v6316_v51, %v1880_v52  ;;  %v6318_v32 = vld [vmem:[#allocation166_spill] sm:$0xff]  ;;  %v6321_v38 = vld [vmem:[#allocation156_spill] sm:$0xff]  ;;  %v6325_v52 = vld [vmem:[#allocation67_spill] sm:$0xff] }
 0x6fa   :  { %v1768_v63 = vmin.f32 %v1764_v30, 4.048737  ;;  %v1771_v18 = vmax.f32 %v1767_v17, -4.042531  ;;  %v1773_v34 = vmax.f32 %v1769_v45, -4.042531  ;;  %v1891_v2 = vadd.f32 %v6317_v11, %v1881_v23 }
 0x6fb   :  { %v1770_v33 = vmax.f32 %v1766_v54, -4.042531  ;;  %v1894_v57 = vmul.f32 %v6318_v32, %v6301_v12  ;;  %v1895_v0 = vmul.f32 %v6303_v27, %v6318_v32  ;;  %v1896_v49 = vmul.f32 %v6318_v32, %v5280_v24  ;;  %v6322_v15 = vld [vmem:[#allocation148_spill] sm:$0xff]  ;;  %v6323_v40 = vld [vmem:[#allocation50_spill] sm:$0xff] }
 0x6fc   :  { %v1772_v29 = vmax.f32 %v1768_v63, -4.042531  ;;  %1776 = vst.msk [vmem:[%s5795_s3 + $0x8] sm:$0xff] %vm1774_vm0, %v1771_v18  ;;  %v1897_v7 = vmul.f32 %v5272_v58, %v6318_v32  ;;  %v2003_v30 = vadd.f32 %v6319_v6, %v5325_v19  ;;  %v2004_v16 = vadd.f32 %v6320_v55, %v5328_v44  ;;  %v6324_v45 = vld [vmem:[#allocation92_spill] sm:$0xff]  ;;  %v6326_v19 = vld [vmem:[#allocation57_spill] sm:$0xff]  ;;  %v6331_v32 = vld [vmem:[#allocation118_spill] sm:$0xff] }
 0x6fd   :  { %1775 = vst.msk [vmem:[%s5795_s3] sm:$0xff] %vm1774_vm0, %v1770_v33  ;;  %v2005_v50 = vadd.f32 %v6321_v38, %v5343_v31  ;;  %v2006_v54 = vadd.f32 %v6322_v15, %v5346_v14  ;;  %v1898_v17 = vadd.f32 %v1894_v57, %v1888_v39  ;;  %v1899_v1 = vadd.f32 %v1895_v0, %v1889_v8  ;;  %v6327_v31 = vld [vmem:[#allocation167_spill] sm:$0xff]  ;;  %v6329_v8 = vld [vmem:[#allocation104_spill] sm:$0xff]  ;;  %v6332_v55 = vld [vmem:[#allocation141_spill] sm:$0xff] }
 0x6fe   :  { %1777 = vst.msk [vmem:[%s5795_s3 + $0x10] sm:$0xff] %vm1774_vm0, %v1772_v29  ;;  %v1900_v35 = vadd.f32 %v1896_v49, %v1890_v56  ;;  %v1901_v61 = vadd.f32 %v1897_v7, %v1891_v2  ;;  %v2013_v63 = vadd.f32 %v6323_v40, %v2003_v30  ;;  %v2014_v21 = vadd.f32 %v6324_v45, %v2004_v16  ;;  %v6328_v14 = vld [vmem:[#allocation111_spill] sm:$0xff]  ;;  %v6333_v38 = vld [vmem:[#allocation133_spill] sm:$0xff] }
 0x6ff   :  { %1779 = vst.msk [vmem:[%s5795_s3 + $0x18] sm:$0xf] %vm1778_vm4, %v1773_v34  ;;  %v2015_v42 = vadd.f32 %v6325_v52, %v2005_v50  ;;  %v2016_v23 = vadd.f32 %v6326_v19, %v2006_v54  ;;  %v1902_v33 = vmin.f32 %v1898_v17, 4.048737  ;;  %v1903_v44 = vmin.f32 %v1899_v1, 4.048737 }
 0x700   :  { %v1904_v18 = vmin.f32 %v1900_v35, 4.048737  ;;  %v2029_v13 = vmul.f32 %v6327_v31, %v6301_v12  ;;  %v1905_v9 = vmin.f32 %v1901_v61, 4.048737  ;;  %v2023_v39 = vadd.f32 %v6328_v14, %v2013_v63  ;;  %v6330_v34 = vld [vmem:[#allocation125_spill] sm:$0xff]  ;;  %v6336_v45 = vld [vmem:[#allocation51_spill] sm:$0xff] }
 0x701   :  { %v2024_v29 = vadd.f32 %v6329_v8, %v2014_v21  ;;  %v2025_v51 = vadd.f32 %v6330_v34, %v2015_v42  ;;  %v1906_v56 = vmax.f32 %v1902_v33, -4.042531  ;;  %v1907_v11 = vmax.f32 %v1903_v44, -4.042531  ;;  %v6334_v15 = vld [vmem:[#allocation157_spill] sm:$0xff]  ;;  %v6339_v33 = vld [vmem:[#allocation58_spill] sm:$0xff] }
 0x702   :  { %v1908_v2 = vmax.f32 %v1904_v18, -4.042531  ;;  %v2026_v57 = vadd.f32 %v6331_v32, %v2016_v23  ;;  %v1909_v0 = vmax.f32 %v1905_v9, -4.042531  ;;  %v2030_v49 = vmul.f32 %v6303_v27, %v6327_v31  ;;  %v6335_v61 = vld [vmem:[#allocation149_spill] sm:$0xff] }
 0x703   :  { %v2031_v7 = vmul.f32 %v6327_v31, %v5280_v24  ;;  %v2032_v6 = vmul.f32 %v5272_v58, %v6327_v31  ;;  %2843 = vst.msk [vmem:[%s5795_s3 + $0x20] sm:$0xff] %vm1774_vm0, %v1906_v56  ;;  %2844 = vst.msk [vmem:[%s5795_s3 + $0x28] sm:$0xff] %vm1774_vm0, %v1907_v11  ;;  %v2033_v30 = vadd.f32 %v2029_v13, %v2023_v39  ;;  %v6337_v21 = vld [vmem:[#allocation93_spill] sm:$0xff]  ;;  %v6340_v31 = vld [vmem:[#allocation112_spill] sm:$0xff] }
 0x704   :  { %2845 = vst.msk [vmem:[%s5795_s3 + $0x30] sm:$0xff] %vm1774_vm0, %v1908_v2  ;;  %v2138_v16 = vadd.f32 %v6332_v55, %v5351_v22  ;;  %v2139_v50 = vadd.f32 %v6333_v38, %v5354_v59  ;;  %v2140_v54 = vadd.f32 %v6334_v15, %v5371_v5  ;;  %v2034_v17 = vadd.f32 %v2030_v49, %v2024_v29  ;;  %v6338_v59 = vld [vmem:[#allocation68_spill] sm:$0xff]  ;;  %v6341_v9 = vld [vmem:[#allocation105_spill] sm:$0xff]  ;;  %v6342_v39 = vld [vmem:[#allocation126_spill] sm:$0xff] }
 0x705   :  { %2846 = vst.msk [vmem:[%s5795_s3 + $0x38] sm:$0xf] %vm1778_vm4, %v1909_v0  ;;  %v2035_v1 = vadd.f32 %v2031_v7, %v2025_v51  ;;  %v2036_v35 = vadd.f32 %v2032_v6, %v2026_v57  ;;  %v2141_v40 = vadd.f32 %v6335_v61, %v5374_v48  ;;  %v2037_v63 = vmin.f32 %v2033_v30, 4.048737  ;;  %v6343_v51 = vld [vmem:[#allocation119_spill] sm:$0xff]  ;;  %v6344_v11 = vld [vmem:[#allocation168_spill] sm:$0xff] }
 0x706   :  { %v2148_v22 = vadd.f32 %v6336_v45, %v2138_v16  ;;  %v2149_v52 = vadd.f32 %v6337_v21, %v2139_v50  ;;  %v2150_v42 = vadd.f32 %v6338_v59, %v2140_v54  ;;  %v2038_v19 = vmin.f32 %v2034_v17, 4.048737  ;;  %v6345_v49 = vld [vmem:[#allocation142_spill] sm:$0xff]  ;;  %v6351_v45 = vld [vmem:[#allocation13_spill] sm:$0xff] }
 0x707   :  { %v2039_v5 = vmin.f32 %v2035_v1, 4.048737  ;;  %v2040_v23 = vmin.f32 %v2036_v35, 4.048737  ;;  %v2151_v44 = vadd.f32 %v6339_v33, %v2141_v40  ;;  %v2041_v18 = vmax.f32 %v2037_v63, -4.042531 }
 0x708   :  { %v2158_v13 = vadd.f32 %v6340_v31, %v2148_v22  ;;  %v2159_v14 = vadd.f32 %v6341_v9, %v2149_v52  ;;  %v2160_v8 = vadd.f32 %v6342_v39, %v2150_v42  ;;  %v2042_v48 = vmax.f32 %v2038_v19, -4.042531  ;;  %v6346_v6 = vld [vmem:[#allocation134_spill] sm:$0xff]  ;;  %v6349_v35 = vld [vmem:[#allocation9_spill] sm:$0xff]  ;;  %v6350_v40 = vld [vmem:[#allocation44_spill] sm:$0xff] }
 0x709   :  { %v2043_v29 = vmax.f32 %v2039_v5, -4.042531  ;;  %v2044_v34 = vmax.f32 %v2040_v23, -4.042531  ;;  %v2161_v56 = vadd.f32 %v6343_v51, %v2151_v44  ;;  %2860 = vst.msk [vmem:[%s5795_s3 + $0x40] sm:$0xff] %vm1774_vm0, %v2041_v18  ;;  %v2164_v2 = vmul.f32 %v6344_v11, %v6301_v12  ;;  %v6347_v55 = vld [vmem:[#allocation158_spill] sm:$0xff] }
 0x70a   :  { %v2165_v32 = vmul.f32 %v6303_v27, %v6344_v11  ;;  %v2166_v57 = vmul.f32 %v6344_v11, %v5280_v24  ;;  %v2167_v0 = vmul.f32 %v5272_v58, %v6344_v11  ;;  %2861 = vst.msk [vmem:[%s5795_s3 + $0x48] sm:$0xff] %vm1774_vm0, %v2042_v48  ;;  %v2273_v7 = vadd.f32 %v6345_v49, %v5385_v4  ;;  %v6348_v38 = vld [vmem:[#allocation150_spill] sm:$0xff]  ;;  %v6352_v4 = vld [vmem:[#allocation59_spill] sm:$0xff] }
 0x70b   :  { %2862 = vst.msk [vmem:[%s5795_s3 + $0x50] sm:$0xff] %vm1774_vm0, %v2043_v29  ;;  %v2274_v30 = vadd.f32 %v6346_v6, %v5388_v46  ;;  %v2275_v16 = vadd.f32 %v6347_v55, %v5393_v20  ;;  %v2276_v50 = vadd.f32 %v6348_v38, %v5396_v37  ;;  %v2168_v15 = vadd.f32 %v2164_v2, %v2158_v13  ;;  %v6353_v20 = vld [vmem:[#allocation170_spill] sm:$0xff]  ;;  %v6354_v37 = vld [vmem:[#allocation113_spill] sm:$0xff]  ;;  %v6356_v44 = vld [vmem:[#allocation127_spill] sm:$0xff] }
 0x70c   :  { %2863 = vst.msk [vmem:[%s5795_s3 + $0x58] sm:$0xf] %vm1778_vm4, %v2044_v34  ;;  %v2169_v54 = vadd.f32 %v2165_v32, %v2159_v14  ;;  %v2170_v17 = vadd.f32 %v2166_v57, %v2160_v8  ;;  %v2171_v1 = vadd.f32 %v2167_v0, %v2161_v56  ;;  %v2283_v61 = vadd.f32 %v6349_v35, %v2273_v7  ;;  %v6355_v23 = vld [vmem:[#allocation106_spill] sm:$0xff]  ;;  %v6357_v14 = vld [vmem:[#allocation120_spill] sm:$0xff]  ;;  %v6358_v56 = vld [vmem:[#allocation143_spill] sm:$0xff] }
 0x70d   :  { %v2284_v63 = vadd.f32 %v6350_v40, %v2274_v30  ;;  %v2285_v22 = vadd.f32 %v6351_v45, %v2275_v16  ;;  %v2286_v21 = vadd.f32 %v6352_v4, %v2276_v50  ;;  %v2172_v52 = vmin.f32 %v2168_v15, 4.048737  ;;  %v6359_v2 = vld [vmem:[#allocation135_spill] sm:$0xff]  ;;  %v6362_v38 = vld [vmem:[#allocation29_spill] sm:$0xff]  ;;  %v6365_v35 = vld [vmem:[#allocation60_spill] sm:$0xff] }
 0x70e   :  { %v2173_v46 = vmin.f32 %v2169_v54, 4.048737  ;;  %v2174_v59 = vmin.f32 %v2170_v17, 4.048737  ;;  %v2299_v42 = vmul.f32 %v6353_v20, %v6301_v12  ;;  %v2175_v19 = vmin.f32 %v2171_v1, 4.048737 }
 0x70f   :  { %v2293_v5 = vadd.f32 %v6354_v37, %v2283_v61  ;;  %v2294_v33 = vadd.f32 %v6355_v23, %v2284_v63  ;;  %v2295_v18 = vadd.f32 %v6356_v44, %v2285_v22  ;;  %v2176_v31 = vmax.f32 %v2172_v52, -4.042531  ;;  %v6360_v57 = vld [vmem:[#allocation159_spill] sm:$0xff]  ;;  %v6363_v50 = vld [vmem:[#allocation45_spill] sm:$0xff]  ;;  %v6366_v63 = vld [vmem:[#allocation114_spill] sm:$0xff] }
 0x710   :  { %v2177_v13 = vmax.f32 %v2173_v46, -4.042531  ;;  %v2178_v9 = vmax.f32 %v2174_v59, -4.042531  ;;  %v2296_v39 = vadd.f32 %v6357_v14, %v2286_v21  ;;  %v2179_v8 = vmax.f32 %v2175_v19, -4.042531 }
 0x711   :  { %v2300_v48 = vmul.f32 %v6303_v27, %v6353_v20  ;;  %v2301_v29 = vmul.f32 %v6353_v20, %v5280_v24  ;;  %v2302_v34 = vmul.f32 %v5272_v58, %v6353_v20  ;;  %2877 = vst.msk [vmem:[%s5795_s3 + $0x60] sm:$0xff] %vm1774_vm0, %v2176_v31  ;;  %v2303_v51 = vadd.f32 %v2299_v42, %v2293_v5  ;;  %v6361_v30 = vld [vmem:[#allocation151_spill] sm:$0xff]  ;;  %v6368_v21 = vld [vmem:[#allocation128_spill] sm:$0xff]  ;;  %v6369_v20 = vld [vmem:[#allocation121_spill] sm:$0xff] }
 0x712   :  { %2878 = vst.msk [vmem:[%s5795_s3 + $0x68] sm:$0xff] %vm1774_vm0, %v2177_v13  ;;  %2879 = vst.msk [vmem:[%s5795_s3 + $0x70] sm:$0xff] %vm1774_vm0, %v2178_v9  ;;  %v2408_v11 = vadd.f32 %v6358_v56, %v5413_v53  ;;  %v2409_v32 = vadd.f32 %v6359_v2, %v5416_v60  ;;  %v2410_v0 = vadd.f32 %v6360_v57, %v5421_v3  ;;  %v6364_v60 = vld [vmem:[#allocation17_spill] sm:$0xff]  ;;  %v6367_v22 = vld [vmem:[#allocation107_spill] sm:$0xff] }
 0x713   :  { %2880 = vst.msk [vmem:[%s5795_s3 + $0x78] sm:$0xf] %vm1778_vm4, %v2179_v8  ;;  %v2304_v49 = vadd.f32 %v2300_v48, %v2294_v33  ;;  %v2305_v7 = vadd.f32 %v2301_v29, %v2295_v18  ;;  %v2306_v6 = vadd.f32 %v2302_v34, %v2296_v39  ;;  %v2411_v55 = vadd.f32 %v6361_v30, %v5424_v10  ;;  %v6370_v19 = vld [vmem:[#allocation171_spill] sm:$0xff]  ;;  %v6371_v44 = vld [vmem:[#allocation144_spill] sm:$0xff]  ;;  %v6375_v56 = vld [vmem:[#allocation10_spill] sm:$0xff] }
 0x714   :  { %v2307_v16 = vmin.f32 %v2303_v51, 4.048737  ;;  %v2418_v53 = vadd.f32 %v6362_v38, %v2408_v11  ;;  %v2419_v15 = vadd.f32 %v6363_v50, %v2409_v32  ;;  %v2420_v54 = vadd.f32 %v6364_v60, %v2410_v0  ;;  %v6372_v31 = vld [vmem:[#allocation136_spill] sm:$0xff]  ;;  %v6376_v2 = vld [vmem:[#allocation46_spill] sm:$0xff]  ;;  %v6377_v57 = vld [vmem:[#allocation69_spill] sm:$0xff] }
 0x715   :  { %v2308_v17 = vmin.f32 %v2304_v49, 4.048737  ;;  %v2309_v3 = vmin.f32 %v2305_v7, 4.048737  ;;  %v2310_v1 = vmin.f32 %v2306_v6, 4.048737  ;;  %v2421_v61 = vadd.f32 %v6365_v35, %v2411_v55 }
 0x716   :  { %v2311_v40 = vmax.f32 %v2307_v16, -4.042531  ;;  %v2428_v45 = vadd.f32 %v6366_v63, %v2418_v53  ;;  %v2429_v4 = vadd.f32 %v6367_v22, %v2419_v15  ;;  %v2430_v52 = vadd.f32 %v6368_v21, %v2420_v54  ;;  %v6373_v9 = vld [vmem:[#allocation160_spill] sm:$0xff]  ;;  %v6382_v50 = vld [vmem:[#allocation129_spill] sm:$0xff] }
 0x717   :  { %v2312_v10 = vmax.f32 %v2308_v17, -4.042531  ;;  %v2313_v46 = vmax.f32 %v2309_v3, -4.042531  ;;  %v2314_v59 = vmax.f32 %v2310_v1, -4.042531  ;;  %v2431_v42 = vadd.f32 %v6369_v20, %v2421_v61 }
 0x718   :  { %2894 = vst.msk [vmem:[%s5795_s3 + $0x80] sm:$0xff] %vm1774_vm0, %v2311_v40  ;;  %v2434_v37 = vmul.f32 %v6370_v19, %v6301_v12  ;;  %v2435_v5 = vmul.f32 %v6303_v27, %v6370_v19  ;;  %v2436_v23 = vmul.f32 %v6370_v19, %v5280_v24  ;;  %v2437_v33 = vmul.f32 %v5272_v58, %v6370_v19  ;;  %v6374_v39 = vld [vmem:[#allocation152_spill] sm:$0xff]  ;;  %v6383_v3 = vld [vmem:[#allocation122_spill] sm:$0xff]  ;;  %v6384_v22 = vld [vmem:[#allocation145_spill] sm:$0xff] }
 0x719   :  { %2895 = vst.msk [vmem:[%s5795_s3 + $0x88] sm:$0xff] %vm1774_vm0, %v2312_v10  ;;  %2896 = vst.msk [vmem:[%s5795_s3 + $0x90] sm:$0xff] %vm1774_vm0, %v2313_v46  ;;  %v2543_v18 = vadd.f32 %v6371_v44, %v5441_v47  ;;  %v2544_v13 = vadd.f32 %v6372_v31, %v5444_v41  ;;  %v2545_v14 = vadd.f32 %v6373_v9, %v5449_v25  ;;  %v6378_v47 = vld [vmem:[#allocation12_spill] sm:$0xff]  ;;  %v6385_v21 = vld [vmem:[#allocation137_spill] sm:$0xff] }
 0x71a   :  { %2897 = vst.msk [vmem:[%s5795_s3 + $0x98] sm:$0xf] %vm1778_vm4, %v2314_v59  ;;  %v2546_v8 = vadd.f32 %v6374_v39, %v5452_v62  ;;  %v2438_v48 = vadd.f32 %v2434_v37, %v2428_v45  ;;  %v2439_v29 = vadd.f32 %v2435_v5, %v2429_v4  ;;  %v2440_v34 = vadd.f32 %v2436_v23, %v2430_v52  ;;  %v6379_v25 = vld [vmem:[#allocation172_spill] sm:$0xff]  ;;  %v6380_v62 = vld [vmem:[#allocation115_spill] sm:$0xff]  ;;  %v6386_v10 = vld [vmem:[#allocation161_spill] sm:$0xff] }
 0x71b   :  { %v2441_v51 = vadd.f32 %v2437_v33, %v2431_v42  ;;  %v2553_v11 = vadd.f32 %v6375_v56, %v2543_v18  ;;  %v2554_v32 = vadd.f32 %v6376_v2, %v2544_v13  ;;  %v2555_v0 = vadd.f32 %v6377_v57, %v2545_v14  ;;  %v6381_v38 = vld [vmem:[#allocation108_spill] sm:$0xff]  ;;  %v6387_v19 = vld [vmem:[#allocation153_spill] sm:$0xff]  ;;  %v6388_v23 = vld [vmem:[#allocation11_spill] sm:$0xff] }
 0x71c   :  { %v2556_v49 = vadd.f32 %v6378_v47, %v2546_v8  ;;  %v2442_v7 = vmin.f32 %v2438_v48, 4.048737  ;;  %v2443_v41 = vmin.f32 %v2439_v29, 4.048737  ;;  %v2444_v6 = vmin.f32 %v2440_v34, 4.048737 }
 0x71d   :  { %v2569_v30 = vmul.f32 %v6379_v25, %v6301_v12  ;;  %v2445_v55 = vmin.f32 %v2441_v51, 4.048737  ;;  %v2563_v16 = vadd.f32 %v6380_v62, %v2553_v11  ;;  %v2564_v53 = vadd.f32 %v6381_v38, %v2554_v32  ;;  %v6389_v33 = vld [vmem:[#allocation47_spill] sm:$0xff]  ;;  %v6391_v9 = vld [vmem:[#allocation16_spill] sm:$0xff]  ;;  %v6393_v29 = vld [vmem:[#allocation109_spill] sm:$0xff] }
 0x71e   :  { %v2565_v15 = vadd.f32 %v6382_v50, %v2555_v0  ;;  %v2446_v60 = vmax.f32 %v2442_v7, -4.042531  ;;  %v2447_v54 = vmax.f32 %v2443_v41, -4.042531  ;;  %v2448_v17 = vmax.f32 %v2444_v6, -4.042531 }
 0x71f   :  { %v2566_v1 = vadd.f32 %v6383_v3, %v2556_v49  ;;  %v2449_v35 = vmax.f32 %v2445_v55, -4.042531  ;;  %v2570_v61 = vmul.f32 %v6303_v27, %v6379_v25  ;;  %v2571_v40 = vmul.f32 %v6379_v25, %v5280_v24  ;;  %v6392_v8 = vld [vmem:[#allocation116_spill] sm:$0xff]  ;;  %v6394_v51 = vld [vmem:[#allocation130_spill] sm:$0xff]  ;;  %v6395_v32 = vld [vmem:[#allocation123_spill] sm:$0xff] }
 0x720   :  { %v2572_v63 = vmul.f32 %v5272_v58, %v6379_v25  ;;  %2911 = vst.msk [vmem:[%s5795_s3 + $0xa0] sm:$0xff] %vm1774_vm0, %v2446_v60  ;;  %2912 = vst.msk [vmem:[%s5795_s3 + $0xa8] sm:$0xff] %vm1774_vm0, %v2447_v54  ;;  %v2573_v45 = vadd.f32 %v2569_v30, %v2563_v16  ;;  %v2678_v4 = vadd.f32 %v6384_v22, %v5469_v36  ;;  %v6396_v0 = vld [vmem:[#allocation173_spill] sm:$0xff] }
 0x721   :  { %2913 = vst.msk [vmem:[%s5795_s3 + $0xb0] sm:$0xff] %vm1774_vm0, %v2448_v17  ;;  %v2679_v52 = vadd.f32 %v6385_v21, %v5472_v43  ;;  %v2680_v46 = vadd.f32 %v6386_v10, %v5477_v28  ;;  %v2574_v59 = vadd.f32 %v2570_v61, %v2564_v53  ;;  %v2575_v20 = vadd.f32 %v2571_v40, %v2565_v15  ;;  %v6390_v43 = vld [vmem:[#allocation70_spill] sm:$0xff] }
 0x722   :  { %2914 = vst.msk [vmem:[%s5795_s3 + $0xb8] sm:$0xf] %vm1778_vm4, %v2449_v35  ;;  %v2576_v42 = vadd.f32 %v2572_v63, %v2566_v1  ;;  %v2681_v37 = vadd.f32 %v6387_v19, %v5480_v26  ;;  %v2577_v5 = vmin.f32 %v2573_v45, 4.048737  ;;  %v2688_v36 = vadd.f32 %v6388_v23, %v2678_v4 }
 0x723   :  { %v2689_v44 = vadd.f32 %v6389_v33, %v2679_v52  ;;  %v2690_v18 = vadd.f32 %v6390_v43, %v2680_v46  ;;  %v2578_v31 = vmin.f32 %v2574_v59, 4.048737  ;;  %v2579_v28 = vmin.f32 %v2575_v20, 4.048737 }
 0x724   :  { %v2580_v13 = vmin.f32 %v2576_v42, 4.048737  ;;  %v2691_v14 = vadd.f32 %v6391_v9, %v2681_v37  ;;  %v2581_v39 = vmax.f32 %v2577_v5, -4.042531  ;;  %v2698_v48 = vadd.f32 %v6392_v8, %v2688_v36 }
 0x725   :  { %v2699_v34 = vadd.f32 %v6393_v29, %v2689_v44  ;;  %v2700_v56 = vadd.f32 %v6394_v51, %v2690_v18  ;;  %v2582_v26 = vmax.f32 %v2578_v31, -4.042531  ;;  %v2583_v11 = vmax.f32 %v2579_v28, -4.042531 }
 0x726   :  { %v2584_v2 = vmax.f32 %v2580_v13, -4.042531  ;;  %v2701_v57 = vadd.f32 %v6395_v32, %v2691_v14  ;;  %2928 = vst.msk [vmem:[%s5795_s3 + $0xc0] sm:$0xff] %vm1774_vm0, %v2581_v39  ;;  %v2704_v47 = vmul.f32 %v6396_v0, %v6301_v12  ;;  %v2705_v49 = vmul.f32 %v6303_v27, %v6396_v0 }
 0x727   :  { %v2706_v7 = vmul.f32 %v6396_v0, %v5280_v24  ;;  %v2707_v41 = vmul.f32 %v5272_v58, %v6396_v0  ;;  %2929 = vst.msk [vmem:[%s5795_s3 + $0xc8] sm:$0xff] %vm1774_vm0, %v2582_v26  ;;  %2930 = vst.msk [vmem:[%s5795_s3 + $0xd0] sm:$0xff] %vm1774_vm0, %v2583_v11 }
 0x728   :  { %2931 = vst.msk [vmem:[%s5795_s3 + $0xd8] sm:$0xf] %vm1778_vm4, %v2584_v2  ;;  %v2708_v12 = vadd.f32 %v2704_v47, %v2698_v48  ;;  %v2709_v24 = vadd.f32 %v2705_v49, %v2699_v34 }
 0x729   :  { %v2710_v27 = vadd.f32 %v2706_v7, %v2700_v56  ;;  %v2711_v6 = vadd.f32 %v2707_v41, %v2701_v57 }
 0x72a   :  { %v2712_v58 = vmin.f32 %v2708_v12, 4.048737  ;;  %v2713_v25 = vmin.f32 %v2709_v24, 4.048737 }
 0x72b   :  { %v2714_v30 = vmin.f32 %v2710_v27, 4.048737  ;;  %v2715_v55 = vmin.f32 %v2711_v6, 4.048737 }
 0x72c   :  { %v2716_v62 = vmax.f32 %v2712_v58, -4.042531  ;;  %v2717_v16 = vmax.f32 %v2713_v25, -4.042531 }
 0x72d   :  { %v2718_v38 = vmax.f32 %v2714_v30, -4.042531  ;;  %v2719_v53 = vmax.f32 %v2715_v55, -4.042531 }
 0x72e   :  { %2945 = vst.msk [vmem:[%s5795_s3 + $0xe0] sm:$0xff] %vm1774_vm0, %v2716_v62  ;;  %2946 = vst.msk [vmem:[%s5795_s3 + $0xe8] sm:$0xff] %vm1774_vm0, %v2717_v16 }
 0x72f   :  { %2947 = vst.msk [vmem:[%s5795_s3 + $0xf0] sm:$0xff] %vm1774_vm0, %v2718_v38 }
 0x730   :  { %2948 = vst.msk [vmem:[%s5795_s3 + $0xf8] sm:$0xf] %vm1778_vm4, %v2719_v53 }
 0x731   :  { %2729 = vsyncpa [#allocation3], 1 }
 0x732   :  { %2730 = vsyncpa [#allocation5], 1 }

</bundles_post_ra>
